<compile_context>
chip_gen: v5e
topology: v5e:2x2
jax: 0.10.0
libtpu: 0.0.40
codegen_flags: <defaults>
</compile_context>

<pallas_src>
import math

import numpy as np
import jax
import jax.numpy as jnp
from jax.experimental import pallas as pl
from jax.experimental.pallas import tpu as pltpu

# Prefix-nested categorical field sets, exactly as passed to the PyTorch StackModel ctor.
FIELD_NAMES = [f"f{i}" for i in range(7)]
FIELD_NAMES1 = FIELD_NAMES[:4]
FIELD_NAMES2 = FIELD_NAMES[:5]
FIELD_NAMES3 = FIELD_NAMES[:6]
FIELD_NAMES4 = FIELD_NAMES[:7]

OUT_LANES = 128  # lane-dense output slab width


# ----------------------------------------------------------------------------
# Parameter init (xavier_normal_ weights, constant 0 biases — PyTorch-style init)
# ----------------------------------------------------------------------------
def xavier_normal(key, shape):
    fan_in = shape[0]
    fan_out = shape[1] if len(shape) > 1 else shape[0]
    std = math.sqrt(2.0 / (fan_in + fan_out))
    return (std * jax.random.normal(key, shape)).astype(jnp.float32)


def init_dcn(key, num_fields, vocab, emb_dim, mlp_hidden, n_cross):
    D = num_fields * emb_dim
    ks = jax.random.split(key, 3 + len(mlp_hidden))
    p = {}
    p["emb"] = xavier_normal(ks[0], (num_fields * vocab, emb_dim))
    p["cross_w"] = xavier_normal(ks[1], (n_cross, D))
    p["cross_b"] = jnp.zeros((n_cross, D), jnp.float32)
    mlp = []
    dims = [D] + list(mlp_hidden)
    for i in range(len(mlp_hidden)):
        mlp.append(xavier_normal(ks[2 + i], (dims[i], dims[i + 1])))
        mlp.append(jnp.zeros((1, dims[i + 1]), jnp.float32))
    p["mlp"] = mlp
    p["pred_w"] = xavier_normal(ks[-1], (D + mlp_hidden[-1], 1))
    p["pred_b"] = jnp.zeros((1, 1), jnp.float32)
    return p


def init_pnn(key, num_fields, vocab, emb_dim, mlp_hidden):
    D = num_fields * emb_dim
    P = num_fields * (num_fields - 1) // 2
    ks = jax.random.split(key, 2 + len(mlp_hidden))
    p = {}
    p["emb"] = xavier_normal(ks[0], (num_fields * vocab, emb_dim))
    mlp = []
    dims = [D + P] + list(mlp_hidden)
    for i in range(len(mlp_hidden)):
        mlp.append(xavier_normal(ks[1 + i], (dims[i], dims[i + 1])))
        mlp.append(jnp.zeros((1, dims[i + 1]), jnp.float32))
    p["mlp"] = mlp
    p["pred_w"] = xavier_normal(ks[-1], (mlp_hidden[-1], 1))
    p["pred_b"] = jnp.zeros((1, 1), jnp.float32)
    return p


def init_stack_model(key, vocab, emb_dim, mlp_hidden, cross_layer_num):
    ks = jax.random.split(key, 9)
    F1, F2, F3, F4 = map(len, (FIELD_NAMES1, FIELD_NAMES2, FIELD_NAMES3, FIELD_NAMES4))
    return {
        "dcn1": init_dcn(ks[0], F1, vocab, emb_dim, mlp_hidden, cross_layer_num),
        "dcn2": init_dcn(ks[1], F2, vocab, emb_dim, mlp_hidden, cross_layer_num),
        "dcn3": init_dcn(ks[2], F3, vocab, emb_dim, mlp_hidden, cross_layer_num),
        "pnn":  init_pnn(ks[3], F3, vocab, emb_dim, mlp_hidden),
        # The PyTorch __init__ then overrides: args.mlp_hidden_size=[256]; args.cross_layer_num=1
        "dcn1_": init_dcn(ks[4], F1, vocab, emb_dim, [256], 1),
        "dcn2_": init_dcn(ks[5], F2, vocab, emb_dim, [256], 1),
        "dcn3_": init_dcn(ks[6], F3, vocab, emb_dim, [256], 1),
        "dcn4_": init_dcn(ks[7], F4, vocab, emb_dim, [256], 1),
        "pnn_":  init_pnn(ks[8], F4, vocab, emb_dim, [256]),
    }


# ----------------------------------------------------------------------------
# Host-side (one-time) preparation of kernel-ready parameters
# ----------------------------------------------------------------------------
def _blockdiag_embedding(table, num_fields, vocab, emb_dim, fv_max):
    """Expand a (num_fields*vocab, E) table to (fv_max, num_fields*E) block-diagonal form
    so that  multi_hot @ W  reproduces the per-field embedding gather exactly."""
    table = np.asarray(table)
    W = np.zeros((fv_max, num_fields * emb_dim), np.float32)
    for f in range(num_fields):
        W[f * vocab:(f + 1) * vocab, f * emb_dim:(f + 1) * emb_dim] = \
            table[f * vocab:(f + 1) * vocab, :]
    return jnp.asarray(W)


def _pnn_selectors(num_fields, emb_dim):
    """Constant 0/1 matrices so pairwise field inner products become
    inner = ((x0 @ selL) * (x0 @ selR)) @ rsum, with the same (i<j) pair ordering."""
    D = num_fields * emb_dim
    pairs = [(i, j) for i in range(num_fields) for j in range(i + 1, num_fields)]
    P = len(pairs)
    selL = np.zeros((D, P * emb_dim), np.float32)
    selR = np.zeros((D, P * emb_dim), np.float32)
    rsum = np.zeros((P * emb_dim, P), np.float32)
    for p, (i, j) in enumerate(pairs):
        for e in range(emb_dim):
            selL[i * emb_dim + e, p * emb_dim + e] = 1.0
            selR[j * emb_dim + e, p * emb_dim + e] = 1.0
            rsum[p * emb_dim + e, p] = 1.0
    return jnp.asarray(selL), jnp.asarray(selR), jnp.asarray(rsum)


def prepare_dcn(p, num_fields, vocab, emb_dim, fv_max):
    D = num_fields * emb_dim
    args = [
        _blockdiag_embedding(p["emb"], num_fields, vocab, emb_dim, fv_max),
        p["cross_w"], p["cross_b"],
        *p["mlp"],
        p["pred_w"][:D, :], p["pred_w"][D:, :], p["pred_b"],   # split head -> no in-kernel concat
    ]
    desc = dict(kind="dcn", n_cross=int(p["cross_w"].shape[0]),
                n_mlp=len(p["mlp"]) // 2, n_args=len(args))
    return args, desc


def prepare_pnn(p, num_fields, vocab, emb_dim, fv_max):
    D = num_fields * emb_dim
    selL, selR, rsum = _pnn_selectors(num_fields, emb_dim)
    W1, b1 = p["mlp"][0], p["mlp"][1]
    args = [
        _blockdiag_embedding(p["emb"], num_fields, vocab, emb_dim, fv_max),
        selL, selR, rsum,
        W1[:D, :], W1[D:, :], b1,                              # split first layer -> no concat
        *p["mlp"][2:],
        p["pred_w"], p["pred_b"],
    ]
    desc = dict(kind="pnn", n_mlp=len(p["mlp"]) // 2, n_args=len(args))
    return args, desc


def prepare_stack_model(params, vocab, emb_dim):
    F1, F2, F3, F4 = map(len, (FIELD_NAMES1, FIELD_NAMES2, FIELD_NAMES3, FIELD_NAMES4))
    fv_max = F4 * vocab
    plan = [
        ("dcn1", "dcn", F1), ("dcn2", "dcn", F2), ("dcn3", "dcn", F3),
        ("pnn", "pnn", F3),
        ("dcn1_", "dcn", F1), ("dcn2_", "dcn", F2), ("dcn3_", "dcn", F3),
        ("dcn4_", "dcn", F4),
        ("pnn_", "pnn", F4),
    ]
    flat_args, descs = [], []
    for name, kind, nf in plan:
        if kind == "dcn":
            args, desc = prepare_dcn(params[name], nf, vocab, emb_dim, fv_max)
        else:
            args, desc = prepare_pnn(params[name], nf, vocab, emb_dim, fv_max)
        flat_args.extend(args)
        descs.append(desc)
    return flat_args, descs


# ----------------------------------------------------------------------------
# Fused Pallas kernel: multi-hot gather + 9 sub-models + combine, all in VMEM
# ----------------------------------------------------------------------------
def _sigmoid(x):
    # exp -> EUP; approx reciprocal -> EUP (argument 1+exp(-x) >= 1, well-conditioned)
    return pl.reciprocal(1.0 + jnp.exp(-x), approx=True)


def make_stack_kernel(descs, vocab, num_fields_max):
    fv = num_fields_max * vocab

    def dcn_prob(mh, refs, n_cross, n_mlp):
        x0 = jnp.dot(mh, refs[0][...], preferred_element_type=jnp.float32)   # (tb, D)
        cw = refs[1][...]
        cb = refs[2][...]
        # cross network: x_{l+1} = x0 * (x_l . w_l) + b_l + x_l
        xl = x0
        for l in range(n_cross):
            w = cw[l:l + 1, :]
            b = cb[l:l + 1, :]
            xlw = jnp.sum(xl * w, axis=-1, keepdims=True)
            xl = x0 * xlw + b + xl
        # deep MLP on x0
        h = x0
        for i in range(n_mlp):
            W = refs[3 + 2 * i][...]
            b = refs[4 + 2 * i][...]
            h = jnp.maximum(jnp.dot(h, W, preferred_element_type=jnp.float32) + b, 0.0)
        # predict head on [cross_out, deep_out] via split weights (no concat)
        wc = refs[3 + 2 * n_mlp][...]
        wd = refs[4 + 2 * n_mlp][...]
        pb = refs[5 + 2 * n_mlp][...]
        logit = (jnp.dot(xl, wc, preferred_element_type=jnp.float32)
                 + jnp.dot(h, wd, preferred_element_type=jnp.float32) + pb)
        return _sigmoid(logit)

    def pnn_prob(mh, refs, n_mlp):
        x0 = jnp.dot(mh, refs[0][...], preferred_element_type=jnp.float32)   # (tb, F*E)
        # pairwise field inner products as selector matmuls (MXU, no slices/concats)
        left = jnp.dot(x0, refs[1][...], preferred_element_type=jnp.float32)
        right = jnp.dot(x0, refs[2][...], preferred_element_type=jnp.float32)
        inner = jnp.dot(left * right, refs[3][...], preferred_element_type=jnp.float32)
        # first MLP layer with split weights (equivalent to concat([x0, inner]) @ W1)
        h = jnp.maximum(
            jnp.dot(x0, refs[4][...], preferred_element_type=jnp.float32)
            + jnp.dot(inner, refs[5][...], preferred_element_type=jnp.float32)
            + refs[6][...], 0.0)
        for i in range(1, n_mlp):
            W = refs[7 + 2 * (i - 1)][...]
            b = refs[8 + 2 * (i - 1)][...]
            h = jnp.maximum(jnp.dot(h, W, preferred_element_type=jnp.float32) + b, 0.0)
        pw = refs[7 + 2 * (n_mlp - 1)][...]
        pb = refs[8 + 2 * (n_mlp - 1)][...]
        logit = jnp.dot(h, pw, preferred_element_type=jnp.float32) + pb
        return _sigmoid(logit)

    def kernel(*refs):
        ids_ref = refs[0]
        out_ref = refs[-1]
        param_refs = refs[1:-1]

        ids = ids_ref[...]                                    # (tb, F_max) int32
        tb = ids.shape[0]

        # In-kernel "gather": multi-hot over the flattened 7-field vocab.
        lane = jax.lax.broadcasted_iota(jnp.int32, (tb, fv), 1)
        mh = jnp.zeros((tb, fv), jnp.float32)
        for f in range(num_fields_max):
            flat_f = ids[:, f:f + 1] + f * vocab              # (tb, 1)
            mh = mh + (lane == flat_f).astype(jnp.float32)

        total = jnp.zeros((tb, 1), jnp.float32)
        cursor = 0
        for d in descs:
            sub = param_refs[cursor:cursor + d["n_args"]]
            cursor += d["n_args"]
            if d["kind"] == "dcn":
                total = total + dcn_prob(mh, sub, d["n_cross"], d["n_mlp"])
            else:
                total = total + pnn_prob(mh, sub, d["n_mlp"])

        final = _sigmoid(total / float(len(descs)))           # sigmoid(mean of 9 probs)
        out_ref[...] = jnp.broadcast_to(final, (tb, OUT_LANES))   # lane-dense unmasked store

    return kernel


# ----------------------------------------------------------------------------
# Forward wrapper
# ----------------------------------------------------------------------------
def _const_index_map(ndim):
    return lambda i: (0,) * ndim


def _pick_batch_tile(B):
    if B % 8 != 0:
        return B
    for t in (512, 256, 128, 64, 32, 16, 8):
        if B % t == 0:
            return t
    return B


def stack_model_forward(flat_args, descs, interaction, vocab):
    ids = jnp.stack([interaction[n] for n in FIELD_NAMES4], axis=1).astype(jnp.int32)  # (B, 7)
    B, F_max = ids.shape
    tb = _pick_batch_tile(B)
    grid = (B // tb,)

    kernel = make_stack_kernel(descs, vocab, F_max)

    in_specs = [pl.BlockSpec((tb, F_max), lambda i: (i, 0))]
    for a in flat_args:
        in_specs.append(pl.BlockSpec(a.shape, _const_index_map(a.ndim)))

    out = pl.pallas_call(
        kernel,
        out_shape=jax.ShapeDtypeStruct((B, OUT_LANES), jnp.float32),
        grid=grid,
        in_specs=in_specs,
        out_specs=pl.BlockSpec((tb, OUT_LANES), lambda i: (i, 0)),
        compiler_params=pltpu.CompilerParams(
            dimension_semantics=("parallel",)),   # batch tiles split across TCs on v7x
    )(ids, *flat_args)
    return out[:, 0]   # (B,) probabilities = sigmoid(sum(9 probs) / 9), matching PyTorch


# ----------------------------------------------------------------------------
if __name__ == "__main__":
    B = 8            # batch
    EMB_DIM = 8      # embedding_size
    VOCAB = 10       # tokens per field (field2num)
    MLP_HIDDEN = [32, 16]   # args.mlp_hidden_size before the in-__init__ override
    CROSS_LAYERS = 2        # args.cross_layer_num before the in-__init__ override

    key = jax.random.PRNGKey(0)
    pkey, dkey = jax.random.split(key)
    params = init_stack_model(pkey, VOCAB, EMB_DIM, MLP_HIDDEN, CROSS_LAYERS)
    flat_args, descs = prepare_stack_model(params, VOCAB, EMB_DIM)

    # interaction: one (B,) int32 id vector per categorical field
    field_keys = jax.random.split(dkey, len(FIELD_NAMES))
    interaction = {
        name: jax.random.randint(k, (B,), 0, VOCAB, dtype=jnp.int32)
        for name, k in zip(FIELD_NAMES, field_keys)
    }

    out = stack_model_forward(flat_args, descs, interaction, VOCAB)
    out = jax.block_until_ready(out)
    assert out.shape == (B,)
    assert bool(jnp.all(jnp.isfinite(out)))
    print("KERNEL_OK")
</pallas_src>

<mosaic_0001>
module attributes {stable_mosaic.version = 11 : i64} {
  func.func @kernel(%arg0: i32, %arg1: memref<8x7xi32, #tpu.memory_space<vmem>>, %arg2: memref<70x32xf32, #tpu.memory_space<vmem>>, %arg3: memref<2x32xf32, #tpu.memory_space<vmem>>, %arg4: memref<2x32xf32, #tpu.memory_space<vmem>>, %arg5: memref<32x32xf32, #tpu.memory_space<vmem>>, %arg6: memref<1x32xf32, #tpu.memory_space<vmem>>, %arg7: memref<32x16xf32, #tpu.memory_space<vmem>>, %arg8: memref<1x16xf32, #tpu.memory_space<vmem>>, %arg9: memref<32x1xf32, #tpu.memory_space<vmem>>, %arg10: memref<16x1xf32, #tpu.memory_space<vmem>>, %arg11: memref<1x1xf32, #tpu.memory_space<vmem>>, %arg12: memref<70x40xf32, #tpu.memory_space<vmem>>, %arg13: memref<2x40xf32, #tpu.memory_space<vmem>>, %arg14: memref<2x40xf32, #tpu.memory_space<vmem>>, %arg15: memref<40x32xf32, #tpu.memory_space<vmem>>, %arg16: memref<1x32xf32, #tpu.memory_space<vmem>>, %arg17: memref<32x16xf32, #tpu.memory_space<vmem>>, %arg18: memref<1x16xf32, #tpu.memory_space<vmem>>, %arg19: memref<40x1xf32, #tpu.memory_space<vmem>>, %arg20: memref<16x1xf32, #tpu.memory_space<vmem>>, %arg21: memref<1x1xf32, #tpu.memory_space<vmem>>, %arg22: memref<70x48xf32, #tpu.memory_space<vmem>>, %arg23: memref<2x48xf32, #tpu.memory_space<vmem>>, %arg24: memref<2x48xf32, #tpu.memory_space<vmem>>, %arg25: memref<48x32xf32, #tpu.memory_space<vmem>>, %arg26: memref<1x32xf32, #tpu.memory_space<vmem>>, %arg27: memref<32x16xf32, #tpu.memory_space<vmem>>, %arg28: memref<1x16xf32, #tpu.memory_space<vmem>>, %arg29: memref<48x1xf32, #tpu.memory_space<vmem>>, %arg30: memref<16x1xf32, #tpu.memory_space<vmem>>, %arg31: memref<1x1xf32, #tpu.memory_space<vmem>>, %arg32: memref<70x48xf32, #tpu.memory_space<vmem>>, %arg33: memref<48x120xf32, #tpu.memory_space<vmem>>, %arg34: memref<48x120xf32, #tpu.memory_space<vmem>>, %arg35: memref<120x15xf32, #tpu.memory_space<vmem>>, %arg36: memref<48x32xf32, #tpu.memory_space<vmem>>, %arg37: memref<15x32xf32, #tpu.memory_space<vmem>>, %arg38: memref<1x32xf32, #tpu.memory_space<vmem>>, %arg39: memref<32x16xf32, #tpu.memory_space<vmem>>, %arg40: memref<1x16xf32, #tpu.memory_space<vmem>>, %arg41: memref<16x1xf32, #tpu.memory_space<vmem>>, %arg42: memref<1x1xf32, #tpu.memory_space<vmem>>, %arg43: memref<70x32xf32, #tpu.memory_space<vmem>>, %arg44: memref<1x32xf32, #tpu.memory_space<vmem>>, %arg45: memref<1x32xf32, #tpu.memory_space<vmem>>, %arg46: memref<32x256xf32, #tpu.memory_space<vmem>>, %arg47: memref<1x256xf32, #tpu.memory_space<vmem>>, %arg48: memref<32x1xf32, #tpu.memory_space<vmem>>, %arg49: memref<256x1xf32, #tpu.memory_space<vmem>>, %arg50: memref<1x1xf32, #tpu.memory_space<vmem>>, %arg51: memref<70x40xf32, #tpu.memory_space<vmem>>, %arg52: memref<1x40xf32, #tpu.memory_space<vmem>>, %arg53: memref<1x40xf32, #tpu.memory_space<vmem>>, %arg54: memref<40x256xf32, #tpu.memory_space<vmem>>, %arg55: memref<1x256xf32, #tpu.memory_space<vmem>>, %arg56: memref<40x1xf32, #tpu.memory_space<vmem>>, %arg57: memref<256x1xf32, #tpu.memory_space<vmem>>, %arg58: memref<1x1xf32, #tpu.memory_space<vmem>>, %arg59: memref<70x48xf32, #tpu.memory_space<vmem>>, %arg60: memref<1x48xf32, #tpu.memory_space<vmem>>, %arg61: memref<1x48xf32, #tpu.memory_space<vmem>>, %arg62: memref<48x256xf32, #tpu.memory_space<vmem>>, %arg63: memref<1x256xf32, #tpu.memory_space<vmem>>, %arg64: memref<48x1xf32, #tpu.memory_space<vmem>>, %arg65: memref<256x1xf32, #tpu.memory_space<vmem>>, %arg66: memref<1x1xf32, #tpu.memory_space<vmem>>, %arg67: memref<70x56xf32, #tpu.memory_space<vmem>>, %arg68: memref<1x56xf32, #tpu.memory_space<vmem>>, %arg69: memref<1x56xf32, #tpu.memory_space<vmem>>, %arg70: memref<56x256xf32, #tpu.memory_space<vmem>>, %arg71: memref<1x256xf32, #tpu.memory_space<vmem>>, %arg72: memref<56x1xf32, #tpu.memory_space<vmem>>, %arg73: memref<256x1xf32, #tpu.memory_space<vmem>>, %arg74: memref<1x1xf32, #tpu.memory_space<vmem>>, %arg75: memref<70x56xf32, #tpu.memory_space<vmem>>, %arg76: memref<56x168xf32, #tpu.memory_space<vmem>>, %arg77: memref<56x168xf32, #tpu.memory_space<vmem>>, %arg78: memref<168x21xf32, #tpu.memory_space<vmem>>, %arg79: memref<56x256xf32, #tpu.memory_space<vmem>>, %arg80: memref<21x256xf32, #tpu.memory_space<vmem>>, %arg81: memref<1x256xf32, #tpu.memory_space<vmem>>, %arg82: memref<256x1xf32, #tpu.memory_space<vmem>>, %arg83: memref<1x1xf32, #tpu.memory_space<vmem>>, %arg84: memref<8x128xf32, #tpu.memory_space<vmem>>) attributes {dimension_semantics = [#tpu.dimension_semantics<parallel>], iteration_bounds = array<i64: 1>, scalar_prefetch = 0 : i64, scratch_operands = 0 : i64, tpu.core_type = #tpu.core_type<tc>, window_params = [{transform_indices = @transform_0, window_bounds = array<i64: 8, 7>}, {pipeline_mode = #tpu.pipeline_mode<synchronous>, transform_indices = @transform_1, window_bounds = array<i64: 70, 32>}, {pipeline_mode = #tpu.pipeline_mode<synchronous>, transform_indices = @transform_2, window_bounds = array<i64: 2, 32>}, {pipeline_mode = #tpu.pipeline_mode<synchronous>, transform_indices = @transform_3, window_bounds = array<i64: 2, 32>}, {pipeline_mode = #tpu.pipeline_mode<synchronous>, transform_indices = @transform_4, window_bounds = array<i64: 32, 32>}, {pipeline_mode = #tpu.pipeline_mode<synchronous>, transform_indices = @transform_5, window_bounds = array<i64: 1, 32>}, {pipeline_mode = #tpu.pipeline_mode<synchronous>, transform_indices = @transform_6, window_bounds = array<i64: 32, 16>}, {pipeline_mode = #tpu.pipeline_mode<synchronous>, transform_indices = @transform_7, window_bounds = array<i64: 1, 16>}, {pipeline_mode = #tpu.pipeline_mode<synchronous>, transform_indices = @transform_8, window_bounds = array<i64: 32, 1>}, {pipeline_mode = #tpu.pipeline_mode<synchronous>, transform_indices = @transform_9, window_bounds = array<i64: 16, 1>}, {pipeline_mode = #tpu.pipeline_mode<synchronous>, transform_indices = @transform_10, window_bounds = array<i64: 1, 1>}, {pipeline_mode = #tpu.pipeline_mode<synchronous>, transform_indices = @transform_11, window_bounds = array<i64: 70, 40>}, {pipeline_mode = #tpu.pipeline_mode<synchronous>, transform_indices = @transform_12, window_bounds = array<i64: 2, 40>}, {pipeline_mode = #tpu.pipeline_mode<synchronous>, transform_indices = @transform_13, window_bounds = array<i64: 2, 40>}, {pipeline_mode = #tpu.pipeline_mode<synchronous>, transform_indices = @transform_14, window_bounds = array<i64: 40, 32>}, {pipeline_mode = #tpu.pipeline_mode<synchronous>, transform_indices = @transform_15, window_bounds = array<i64: 1, 32>}, {pipeline_mode = #tpu.pipeline_mode<synchronous>, transform_indices = @transform_16, window_bounds = array<i64: 32, 16>}, {pipeline_mode = #tpu.pipeline_mode<synchronous>, transform_indices = @transform_17, window_bounds = array<i64: 1, 16>}, {pipeline_mode = #tpu.pipeline_mode<synchronous>, transform_indices = @transform_18, window_bounds = array<i64: 40, 1>}, {pipeline_mode = #tpu.pipeline_mode<synchronous>, transform_indices = @transform_19, window_bounds = array<i64: 16, 1>}, {pipeline_mode = #tpu.pipeline_mode<synchronous>, transform_indices = @transform_20, window_bounds = array<i64: 1, 1>}, {pipeline_mode = #tpu.pipeline_mode<synchronous>, transform_indices = @transform_21, window_bounds = array<i64: 70, 48>}, {pipeline_mode = #tpu.pipeline_mode<synchronous>, transform_indices = @transform_22, window_bounds = array<i64: 2, 48>}, {pipeline_mode = #tpu.pipeline_mode<synchronous>, transform_indices = @transform_23, window_bounds = array<i64: 2, 48>}, {pipeline_mode = #tpu.pipeline_mode<synchronous>, transform_indices = @transform_24, window_bounds = array<i64: 48, 32>}, {pipeline_mode = #tpu.pipeline_mode<synchronous>, transform_indices = @transform_25, window_bounds = array<i64: 1, 32>}, {pipeline_mode = #tpu.pipeline_mode<synchronous>, transform_indices = @transform_26, window_bounds = array<i64: 32, 16>}, {pipeline_mode = #tpu.pipeline_mode<synchronous>, transform_indices = @transform_27, window_bounds = array<i64: 1, 16>}, {pipeline_mode = #tpu.pipeline_mode<synchronous>, transform_indices = @transform_28, window_bounds = array<i64: 48, 1>}, {pipeline_mode = #tpu.pipeline_mode<synchronous>, transform_indices = @transform_29, window_bounds = array<i64: 16, 1>}, {pipeline_mode = #tpu.pipeline_mode<synchronous>, transform_indices = @transform_30, window_bounds = array<i64: 1, 1>}, {pipeline_mode = #tpu.pipeline_mode<synchronous>, transform_indices = @transform_31, window_bounds = array<i64: 70, 48>}, {pipeline_mode = #tpu.pipeline_mode<synchronous>, transform_indices = @transform_32, window_bounds = array<i64: 48, 120>}, {pipeline_mode = #tpu.pipeline_mode<synchronous>, transform_indices = @transform_33, window_bounds = array<i64: 48, 120>}, {pipeline_mode = #tpu.pipeline_mode<synchronous>, transform_indices = @transform_34, window_bounds = array<i64: 120, 15>}, {pipeline_mode = #tpu.pipeline_mode<synchronous>, transform_indices = @transform_35, window_bounds = array<i64: 48, 32>}, {pipeline_mode = #tpu.pipeline_mode<synchronous>, transform_indices = @transform_36, window_bounds = array<i64: 15, 32>}, {pipeline_mode = #tpu.pipeline_mode<synchronous>, transform_indices = @transform_37, window_bounds = array<i64: 1, 32>}, {pipeline_mode = #tpu.pipeline_mode<synchronous>, transform_indices = @transform_38, window_bounds = array<i64: 32, 16>}, {pipeline_mode = #tpu.pipeline_mode<synchronous>, transform_indices = @transform_39, window_bounds = array<i64: 1, 16>}, {pipeline_mode = #tpu.pipeline_mode<synchronous>, transform_indices = @transform_40, window_bounds = array<i64: 16, 1>}, {pipeline_mode = #tpu.pipeline_mode<synchronous>, transform_indices = @transform_41, window_bounds = array<i64: 1, 1>}, {pipeline_mode = #tpu.pipeline_mode<synchronous>, transform_indices = @transform_42, window_bounds = array<i64: 70, 32>}, {pipeline_mode = #tpu.pipeline_mode<synchronous>, transform_indices = @transform_43, window_bounds = array<i64: 1, 32>}, {pipeline_mode = #tpu.pipeline_mode<synchronous>, transform_indices = @transform_44, window_bounds = array<i64: 1, 32>}, {pipeline_mode = #tpu.pipeline_mode<synchronous>, transform_indices = @transform_45, window_bounds = array<i64: 32, 256>}, {pipeline_mode = #tpu.pipeline_mode<synchronous>, transform_indices = @transform_46, window_bounds = array<i64: 1, 256>}, {pipeline_mode = #tpu.pipeline_mode<synchronous>, transform_indices = @transform_47, window_bounds = array<i64: 32, 1>}, {pipeline_mode = #tpu.pipeline_mode<synchronous>, transform_indices = @transform_48, window_bounds = array<i64: 256, 1>}, {pipeline_mode = #tpu.pipeline_mode<synchronous>, transform_indices = @transform_49, window_bounds = array<i64: 1, 1>}, {pipeline_mode = #tpu.pipeline_mode<synchronous>, transform_indices = @transform_50, window_bounds = array<i64: 70, 40>}, {pipeline_mode = #tpu.pipeline_mode<synchronous>, transform_indices = @transform_51, window_bounds = array<i64: 1, 40>}, {pipeline_mode = #tpu.pipeline_mode<synchronous>, transform_indices = @transform_52, window_bounds = array<i64: 1, 40>}, {pipeline_mode = #tpu.pipeline_mode<synchronous>, transform_indices = @transform_53, window_bounds = array<i64: 40, 256>}, {pipeline_mode = #tpu.pipeline_mode<synchronous>, transform_indices = @transform_54, window_bounds = array<i64: 1, 256>}, {pipeline_mode = #tpu.pipeline_mode<synchronous>, transform_indices = @transform_55, window_bounds = array<i64: 40, 1>}, {pipeline_mode = #tpu.pipeline_mode<synchronous>, transform_indices = @transform_56, window_bounds = array<i64: 256, 1>}, {pipeline_mode = #tpu.pipeline_mode<synchronous>, transform_indices = @transform_57, window_bounds = array<i64: 1, 1>}, {pipeline_mode = #tpu.pipeline_mode<synchronous>, transform_indices = @transform_58, window_bounds = array<i64: 70, 48>}, {pipeline_mode = #tpu.pipeline_mode<synchronous>, transform_indices = @transform_59, window_bounds = array<i64: 1, 48>}, {pipeline_mode = #tpu.pipeline_mode<synchronous>, transform_indices = @transform_60, window_bounds = array<i64: 1, 48>}, {pipeline_mode = #tpu.pipeline_mode<synchronous>, transform_indices = @transform_61, window_bounds = array<i64: 48, 256>}, {pipeline_mode = #tpu.pipeline_mode<synchronous>, transform_indices = @transform_62, window_bounds = array<i64: 1, 256>}, {pipeline_mode = #tpu.pipeline_mode<synchronous>, transform_indices = @transform_63, window_bounds = array<i64: 48, 1>}, {pipeline_mode = #tpu.pipeline_mode<synchronous>, transform_indices = @transform_64, window_bounds = array<i64: 256, 1>}, {pipeline_mode = #tpu.pipeline_mode<synchronous>, transform_indices = @transform_65, window_bounds = array<i64: 1, 1>}, {pipeline_mode = #tpu.pipeline_mode<synchronous>, transform_indices = @transform_66, window_bounds = array<i64: 70, 56>}, {pipeline_mode = #tpu.pipeline_mode<synchronous>, transform_indices = @transform_67, window_bounds = array<i64: 1, 56>}, {pipeline_mode = #tpu.pipeline_mode<synchronous>, transform_indices = @transform_68, window_bounds = array<i64: 1, 56>}, {pipeline_mode = #tpu.pipeline_mode<synchronous>, transform_indices = @transform_69, window_bounds = array<i64: 56, 256>}, {pipeline_mode = #tpu.pipeline_mode<synchronous>, transform_indices = @transform_70, window_bounds = array<i64: 1, 256>}, {pipeline_mode = #tpu.pipeline_mode<synchronous>, transform_indices = @transform_71, window_bounds = array<i64: 56, 1>}, {pipeline_mode = #tpu.pipeline_mode<synchronous>, transform_indices = @transform_72, window_bounds = array<i64: 256, 1>}, {pipeline_mode = #tpu.pipeline_mode<synchronous>, transform_indices = @transform_73, window_bounds = array<i64: 1, 1>}, {pipeline_mode = #tpu.pipeline_mode<synchronous>, transform_indices = @transform_74, window_bounds = array<i64: 70, 56>}, {pipeline_mode = #tpu.pipeline_mode<synchronous>, transform_indices = @transform_75, window_bounds = array<i64: 56, 168>}, {pipeline_mode = #tpu.pipeline_mode<synchronous>, transform_indices = @transform_76, window_bounds = array<i64: 56, 168>}, {pipeline_mode = #tpu.pipeline_mode<synchronous>, transform_indices = @transform_77, window_bounds = array<i64: 168, 21>}, {pipeline_mode = #tpu.pipeline_mode<synchronous>, transform_indices = @transform_78, window_bounds = array<i64: 56, 256>}, {pipeline_mode = #tpu.pipeline_mode<synchronous>, transform_indices = @transform_79, window_bounds = array<i64: 21, 256>}, {pipeline_mode = #tpu.pipeline_mode<synchronous>, transform_indices = @transform_80, window_bounds = array<i64: 1, 256>}, {pipeline_mode = #tpu.pipeline_mode<synchronous>, transform_indices = @transform_81, window_bounds = array<i64: 256, 1>}, {pipeline_mode = #tpu.pipeline_mode<synchronous>, transform_indices = @transform_82, window_bounds = array<i64: 1, 1>}, {transform_indices = @transform_83, window_bounds = array<i64: 8, 128>}]} {
    %c0 = arith.constant 0 : index
    %c0_0 = arith.constant 0 : index
    %0 = vector.load %arg1[%c0, %c0_0] : memref<8x7xi32, #tpu.memory_space<vmem>>, vector<8x7xi32>
    %1 = tpu.iota {dimensions = array<i32: 1>} : vector<8x70xi32>
    %cst = arith.constant 0.000000e+00 : f32
    %2 = vector.broadcast %cst : f32 to vector<8x70xf32>
    %3 = vector.extract_strided_slice %0 {offsets = [0, 0], sizes = [8, 1], strides = [1, 1]} : vector<8x7xi32> to vector<8x1xi32>
    %c0_i32 = arith.constant 0 : i32
    %4 = vector.broadcast %c0_i32 : i32 to vector<8x1xi32>
    %5 = arith.addi %3, %4 : vector<8x1xi32>
    %6 = vector.broadcast %5 : vector<8x1xi32> to vector<8x70xi32>
    %7 = arith.cmpi eq, %1, %6 : vector<8x70xi32>
    %8 = arith.extui %7 : vector<8x70xi1> to vector<8x70xi32>
    %9 = arith.sitofp %8 : vector<8x70xi32> to vector<8x70xf32>
    %10 = arith.addf %2, %9 : vector<8x70xf32>
    %11 = vector.extract_strided_slice %0 {offsets = [0, 1], sizes = [8, 1], strides = [1, 1]} : vector<8x7xi32> to vector<8x1xi32>
    %c10_i32 = arith.constant 10 : i32
    %12 = vector.broadcast %c10_i32 : i32 to vector<8x1xi32>
    %13 = arith.addi %11, %12 : vector<8x1xi32>
    %14 = vector.broadcast %13 : vector<8x1xi32> to vector<8x70xi32>
    %15 = arith.cmpi eq, %1, %14 : vector<8x70xi32>
    %16 = arith.extui %15 : vector<8x70xi1> to vector<8x70xi32>
    %17 = arith.sitofp %16 : vector<8x70xi32> to vector<8x70xf32>
    %18 = arith.addf %10, %17 : vector<8x70xf32>
    %19 = vector.extract_strided_slice %0 {offsets = [0, 2], sizes = [8, 1], strides = [1, 1]} : vector<8x7xi32> to vector<8x1xi32>
    %c20_i32 = arith.constant 20 : i32
    %20 = vector.broadcast %c20_i32 : i32 to vector<8x1xi32>
    %21 = arith.addi %19, %20 : vector<8x1xi32>
    %22 = vector.broadcast %21 : vector<8x1xi32> to vector<8x70xi32>
    %23 = arith.cmpi eq, %1, %22 : vector<8x70xi32>
    %24 = arith.extui %23 : vector<8x70xi1> to vector<8x70xi32>
    %25 = arith.sitofp %24 : vector<8x70xi32> to vector<8x70xf32>
    %26 = arith.addf %18, %25 : vector<8x70xf32>
    %27 = vector.extract_strided_slice %0 {offsets = [0, 3], sizes = [8, 1], strides = [1, 1]} : vector<8x7xi32> to vector<8x1xi32>
    %c30_i32 = arith.constant 30 : i32
    %28 = vector.broadcast %c30_i32 : i32 to vector<8x1xi32>
    %29 = arith.addi %27, %28 : vector<8x1xi32>
    %30 = vector.broadcast %29 : vector<8x1xi32> to vector<8x70xi32>
    %31 = arith.cmpi eq, %1, %30 : vector<8x70xi32>
    %32 = arith.extui %31 : vector<8x70xi1> to vector<8x70xi32>
    %33 = arith.sitofp %32 : vector<8x70xi32> to vector<8x70xf32>
    %34 = arith.addf %26, %33 : vector<8x70xf32>
    %35 = vector.extract_strided_slice %0 {offsets = [0, 4], sizes = [8, 1], strides = [1, 1]} : vector<8x7xi32> to vector<8x1xi32>
    %c40_i32 = arith.constant 40 : i32
    %36 = vector.broadcast %c40_i32 : i32 to vector<8x1xi32>
    %37 = arith.addi %35, %36 : vector<8x1xi32>
    %38 = vector.broadcast %37 : vector<8x1xi32> to vector<8x70xi32>
    %39 = arith.cmpi eq, %1, %38 : vector<8x70xi32>
    %40 = arith.extui %39 : vector<8x70xi1> to vector<8x70xi32>
    %41 = arith.sitofp %40 : vector<8x70xi32> to vector<8x70xf32>
    %42 = arith.addf %34, %41 : vector<8x70xf32>
    %43 = vector.extract_strided_slice %0 {offsets = [0, 5], sizes = [8, 1], strides = [1, 1]} : vector<8x7xi32> to vector<8x1xi32>
    %c50_i32 = arith.constant 50 : i32
    %44 = vector.broadcast %c50_i32 : i32 to vector<8x1xi32>
    %45 = arith.addi %43, %44 : vector<8x1xi32>
    %46 = vector.broadcast %45 : vector<8x1xi32> to vector<8x70xi32>
    %47 = arith.cmpi eq, %1, %46 : vector<8x70xi32>
    %48 = arith.extui %47 : vector<8x70xi1> to vector<8x70xi32>
    %49 = arith.sitofp %48 : vector<8x70xi32> to vector<8x70xf32>
    %50 = arith.addf %42, %49 : vector<8x70xf32>
    %51 = vector.extract_strided_slice %0 {offsets = [0, 6], sizes = [8, 1], strides = [1, 1]} : vector<8x7xi32> to vector<8x1xi32>
    %c60_i32 = arith.constant 60 : i32
    %52 = vector.broadcast %c60_i32 : i32 to vector<8x1xi32>
    %53 = arith.addi %51, %52 : vector<8x1xi32>
    %54 = vector.broadcast %53 : vector<8x1xi32> to vector<8x70xi32>
    %55 = arith.cmpi eq, %1, %54 : vector<8x70xi32>
    %56 = arith.extui %55 : vector<8x70xi1> to vector<8x70xi32>
    %57 = arith.sitofp %56 : vector<8x70xi32> to vector<8x70xf32>
    %58 = arith.addf %50, %57 : vector<8x70xf32>
    %cst_1 = arith.constant 0.000000e+00 : f32
    %59 = vector.broadcast %cst_1 : f32 to vector<8x1xf32>
    %c0_2 = arith.constant 0 : index
    %c0_3 = arith.constant 0 : index
    %60 = vector.load %arg2[%c0_2, %c0_3] : memref<70x32xf32, #tpu.memory_space<vmem>>, vector<70x32xf32>
    %cst_4 = arith.constant dense<0.000000e+00> : vector<8x32xf32>
    %61 = tpu.matmul %58, %60, %cst_4 {dimension_numbers = #tpu.dot_dimension_numbers<[1], [0], [0], [1], [0, 0, 1, 1], [], []>} : vector<8x70xf32>, vector<70x32xf32>, vector<8x32xf32> -> vector<8x32xf32>
    %c0_5 = arith.constant 0 : index
    %c0_6 = arith.constant 0 : index
    %62 = vector.load %arg3[%c0_5, %c0_6] : memref<2x32xf32, #tpu.memory_space<vmem>>, vector<2x32xf32>
    %c0_7 = arith.constant 0 : index
    %c0_8 = arith.constant 0 : index
    %63 = vector.load %arg4[%c0_7, %c0_8] : memref<2x32xf32, #tpu.memory_space<vmem>>, vector<2x32xf32>
    %64 = vector.extract_strided_slice %62 {offsets = [0, 0], sizes = [1, 32], strides = [1, 1]} : vector<2x32xf32> to vector<1x32xf32>
    %65 = vector.extract_strided_slice %63 {offsets = [0, 0], sizes = [1, 32], strides = [1, 1]} : vector<2x32xf32> to vector<1x32xf32>
    %66 = vector.broadcast %64 : vector<1x32xf32> to vector<8x32xf32>
    %67 = arith.mulf %61, %66 : vector<8x32xf32>
    %cst_9 = arith.constant dense<0.000000e+00> : vector<8xf32>
    %68 = vector.multi_reduction <add>, %67, %cst_9 [1] : vector<8x32xf32> to vector<8xf32>
    %69 = vector.shape_cast %68 : vector<8xf32> to vector<8x1xf32>
    %70 = vector.broadcast %69 : vector<8x1xf32> to vector<8x32xf32>
    %71 = arith.mulf %61, %70 : vector<8x32xf32>
    %72 = vector.broadcast %65 : vector<1x32xf32> to vector<8x32xf32>
    %73 = arith.addf %71, %72 : vector<8x32xf32>
    %74 = arith.addf %73, %61 : vector<8x32xf32>
    %75 = vector.extract_strided_slice %62 {offsets = [1, 0], sizes = [1, 32], strides = [1, 1]} : vector<2x32xf32> to vector<1x32xf32>
    %76 = vector.extract_strided_slice %63 {offsets = [1, 0], sizes = [1, 32], strides = [1, 1]} : vector<2x32xf32> to vector<1x32xf32>
    %77 = vector.broadcast %75 : vector<1x32xf32> to vector<8x32xf32>
    %78 = arith.mulf %74, %77 : vector<8x32xf32>
    %cst_10 = arith.constant dense<0.000000e+00> : vector<8xf32>
    %79 = vector.multi_reduction <add>, %78, %cst_10 [1] : vector<8x32xf32> to vector<8xf32>
    %80 = vector.shape_cast %79 : vector<8xf32> to vector<8x1xf32>
    %81 = vector.broadcast %80 : vector<8x1xf32> to vector<8x32xf32>
    %82 = arith.mulf %61, %81 : vector<8x32xf32>
    %83 = vector.broadcast %76 : vector<1x32xf32> to vector<8x32xf32>
    %84 = arith.addf %82, %83 : vector<8x32xf32>
    %85 = arith.addf %84, %74 : vector<8x32xf32>
    %c0_11 = arith.constant 0 : index
    %c0_12 = arith.constant 0 : index
    %86 = vector.load %arg5[%c0_11, %c0_12] : memref<32x32xf32, #tpu.memory_space<vmem>>, vector<32x32xf32>
    %c0_13 = arith.constant 0 : index
    %c0_14 = arith.constant 0 : index
    %87 = vector.load %arg6[%c0_13, %c0_14] : memref<1x32xf32, #tpu.memory_space<vmem>>, vector<1x32xf32>
    %cst_15 = arith.constant dense<0.000000e+00> : vector<8x32xf32>
    %88 = tpu.matmul %61, %86, %cst_15 {dimension_numbers = #tpu.dot_dimension_numbers<[1], [0], [0], [1], [0, 0, 1, 1], [], []>} : vector<8x32xf32>, vector<32x32xf32>, vector<8x32xf32> -> vector<8x32xf32>
    %89 = vector.broadcast %87 : vector<1x32xf32> to vector<8x32xf32>
    %90 = arith.addf %88, %89 : vector<8x32xf32>
    %cst_16 = arith.constant 0.000000e+00 : f32
    %91 = vector.broadcast %cst_16 : f32 to vector<8x32xf32>
    %92 = arith.maximumf %90, %91 : vector<8x32xf32>
    %c0_17 = arith.constant 0 : index
    %c0_18 = arith.constant 0 : index
    %93 = vector.load %arg7[%c0_17, %c0_18] : memref<32x16xf32, #tpu.memory_space<vmem>>, vector<32x16xf32>
    %c0_19 = arith.constant 0 : index
    %c0_20 = arith.constant 0 : index
    %94 = vector.load %arg8[%c0_19, %c0_20] : memref<1x16xf32, #tpu.memory_space<vmem>>, vector<1x16xf32>
    %cst_21 = arith.constant dense<0.000000e+00> : vector<8x16xf32>
    %95 = tpu.matmul %92, %93, %cst_21 {dimension_numbers = #tpu.dot_dimension_numbers<[1], [0], [0], [1], [0, 0, 1, 1], [], []>} : vector<8x32xf32>, vector<32x16xf32>, vector<8x16xf32> -> vector<8x16xf32>
    %96 = vector.broadcast %94 : vector<1x16xf32> to vector<8x16xf32>
    %97 = arith.addf %95, %96 : vector<8x16xf32>
    %cst_22 = arith.constant 0.000000e+00 : f32
    %98 = vector.broadcast %cst_22 : f32 to vector<8x16xf32>
    %99 = arith.maximumf %97, %98 : vector<8x16xf32>
    %c0_23 = arith.constant 0 : index
    %c0_24 = arith.constant 0 : index
    %100 = vector.load %arg9[%c0_23, %c0_24] : memref<32x1xf32, #tpu.memory_space<vmem>>, vector<32x1xf32>
    %c0_25 = arith.constant 0 : index
    %c0_26 = arith.constant 0 : index
    %101 = vector.load %arg10[%c0_25, %c0_26] : memref<16x1xf32, #tpu.memory_space<vmem>>, vector<16x1xf32>
    %c0_27 = arith.constant 0 : index
    %c0_28 = arith.constant 0 : index
    %102 = vector.load %arg11[%c0_27, %c0_28] : memref<1x1xf32, #tpu.memory_space<vmem>>, vector<1x1xf32>
    %cst_29 = arith.constant dense<0.000000e+00> : vector<8x1xf32>
    %103 = tpu.matmul %85, %100, %cst_29 {dimension_numbers = #tpu.dot_dimension_numbers<[1], [0], [0], [1], [0, 0, 1, 1], [], []>} : vector<8x32xf32>, vector<32x1xf32>, vector<8x1xf32> -> vector<8x1xf32>
    %cst_30 = arith.constant dense<0.000000e+00> : vector<8x1xf32>
    %104 = tpu.matmul %99, %101, %cst_30 {dimension_numbers = #tpu.dot_dimension_numbers<[1], [0], [0], [1], [0, 0, 1, 1], [], []>} : vector<8x16xf32>, vector<16x1xf32>, vector<8x1xf32> -> vector<8x1xf32>
    %105 = arith.addf %103, %104 : vector<8x1xf32>
    %106 = vector.broadcast %102 : vector<1x1xf32> to vector<8x1xf32>
    %107 = arith.addf %105, %106 : vector<8x1xf32>
    %cst_31 = arith.constant 0.000000e+00 : f32
    %108 = vector.broadcast %cst_31 : f32 to vector<8x1xf32>
    %109 = arith.subf %108, %107 : vector<8x1xf32>
    %110 = math.exp %109 : vector<8x1xf32>
    %cst_32 = arith.constant 1.000000e+00 : f32
    %111 = vector.broadcast %cst_32 : f32 to vector<8x1xf32>
    %112 = arith.addf %111, %110 : vector<8x1xf32>
    %113 = tpu.reciprocal %112 {approx = true} : vector<8x1xf32> -> vector<8x1xf32>
    %114 = arith.addf %59, %113 : vector<8x1xf32>
    %c0_33 = arith.constant 0 : index
    %c0_34 = arith.constant 0 : index
    %115 = vector.load %arg12[%c0_33, %c0_34] : memref<70x40xf32, #tpu.memory_space<vmem>>, vector<70x40xf32>
    %cst_35 = arith.constant dense<0.000000e+00> : vector<8x40xf32>
    %116 = tpu.matmul %58, %115, %cst_35 {dimension_numbers = #tpu.dot_dimension_numbers<[1], [0], [0], [1], [0, 0, 1, 1], [], []>} : vector<8x70xf32>, vector<70x40xf32>, vector<8x40xf32> -> vector<8x40xf32>
    %c0_36 = arith.constant 0 : index
    %c0_37 = arith.constant 0 : index
    %117 = vector.load %arg13[%c0_36, %c0_37] : memref<2x40xf32, #tpu.memory_space<vmem>>, vector<2x40xf32>
    %c0_38 = arith.constant 0 : index
    %c0_39 = arith.constant 0 : index
    %118 = vector.load %arg14[%c0_38, %c0_39] : memref<2x40xf32, #tpu.memory_space<vmem>>, vector<2x40xf32>
    %119 = vector.extract_strided_slice %117 {offsets = [0, 0], sizes = [1, 40], strides = [1, 1]} : vector<2x40xf32> to vector<1x40xf32>
    %120 = vector.extract_strided_slice %118 {offsets = [0, 0], sizes = [1, 40], strides = [1, 1]} : vector<2x40xf32> to vector<1x40xf32>
    %121 = vector.broadcast %119 : vector<1x40xf32> to vector<8x40xf32>
    %122 = arith.mulf %116, %121 : vector<8x40xf32>
    %cst_40 = arith.constant dense<0.000000e+00> : vector<8xf32>
    %123 = vector.multi_reduction <add>, %122, %cst_40 [1] : vector<8x40xf32> to vector<8xf32>
    %124 = vector.shape_cast %123 : vector<8xf32> to vector<8x1xf32>
    %125 = vector.broadcast %124 : vector<8x1xf32> to vector<8x40xf32>
    %126 = arith.mulf %116, %125 : vector<8x40xf32>
    %127 = vector.broadcast %120 : vector<1x40xf32> to vector<8x40xf32>
    %128 = arith.addf %126, %127 : vector<8x40xf32>
    %129 = arith.addf %128, %116 : vector<8x40xf32>
    %130 = vector.extract_strided_slice %117 {offsets = [1, 0], sizes = [1, 40], strides = [1, 1]} : vector<2x40xf32> to vector<1x40xf32>
    %131 = vector.extract_strided_slice %118 {offsets = [1, 0], sizes = [1, 40], strides = [1, 1]} : vector<2x40xf32> to vector<1x40xf32>
    %132 = vector.broadcast %130 : vector<1x40xf32> to vector<8x40xf32>
    %133 = arith.mulf %129, %132 : vector<8x40xf32>
    %cst_41 = arith.constant dense<0.000000e+00> : vector<8xf32>
    %134 = vector.multi_reduction <add>, %133, %cst_41 [1] : vector<8x40xf32> to vector<8xf32>
    %135 = vector.shape_cast %134 : vector<8xf32> to vector<8x1xf32>
    %136 = vector.broadcast %135 : vector<8x1xf32> to vector<8x40xf32>
    %137 = arith.mulf %116, %136 : vector<8x40xf32>
    %138 = vector.broadcast %131 : vector<1x40xf32> to vector<8x40xf32>
    %139 = arith.addf %137, %138 : vector<8x40xf32>
    %140 = arith.addf %139, %129 : vector<8x40xf32>
    %c0_42 = arith.constant 0 : index
    %c0_43 = arith.constant 0 : index
    %141 = vector.load %arg15[%c0_42, %c0_43] : memref<40x32xf32, #tpu.memory_space<vmem>>, vector<40x32xf32>
    %c0_44 = arith.constant 0 : index
    %c0_45 = arith.constant 0 : index
    %142 = vector.load %arg16[%c0_44, %c0_45] : memref<1x32xf32, #tpu.memory_space<vmem>>, vector<1x32xf32>
    %cst_46 = arith.constant dense<0.000000e+00> : vector<8x32xf32>
    %143 = tpu.matmul %116, %141, %cst_46 {dimension_numbers = #tpu.dot_dimension_numbers<[1], [0], [0], [1], [0, 0, 1, 1], [], []>} : vector<8x40xf32>, vector<40x32xf32>, vector<8x32xf32> -> vector<8x32xf32>
    %144 = vector.broadcast %142 : vector<1x32xf32> to vector<8x32xf32>
    %145 = arith.addf %143, %144 : vector<8x32xf32>
    %cst_47 = arith.constant 0.000000e+00 : f32
    %146 = vector.broadcast %cst_47 : f32 to vector<8x32xf32>
    %147 = arith.maximumf %145, %146 : vector<8x32xf32>
    %c0_48 = arith.constant 0 : index
    %c0_49 = arith.constant 0 : index
    %148 = vector.load %arg17[%c0_48, %c0_49] : memref<32x16xf32, #tpu.memory_space<vmem>>, vector<32x16xf32>
    %c0_50 = arith.constant 0 : index
    %c0_51 = arith.constant 0 : index
    %149 = vector.load %arg18[%c0_50, %c0_51] : memref<1x16xf32, #tpu.memory_space<vmem>>, vector<1x16xf32>
    %cst_52 = arith.constant dense<0.000000e+00> : vector<8x16xf32>
    %150 = tpu.matmul %147, %148, %cst_52 {dimension_numbers = #tpu.dot_dimension_numbers<[1], [0], [0], [1], [0, 0, 1, 1], [], []>} : vector<8x32xf32>, vector<32x16xf32>, vector<8x16xf32> -> vector<8x16xf32>
    %151 = vector.broadcast %149 : vector<1x16xf32> to vector<8x16xf32>
    %152 = arith.addf %150, %151 : vector<8x16xf32>
    %cst_53 = arith.constant 0.000000e+00 : f32
    %153 = vector.broadcast %cst_53 : f32 to vector<8x16xf32>
    %154 = arith.maximumf %152, %153 : vector<8x16xf32>
    %c0_54 = arith.constant 0 : index
    %c0_55 = arith.constant 0 : index
    %155 = vector.load %arg19[%c0_54, %c0_55] : memref<40x1xf32, #tpu.memory_space<vmem>>, vector<40x1xf32>
    %c0_56 = arith.constant 0 : index
    %c0_57 = arith.constant 0 : index
    %156 = vector.load %arg20[%c0_56, %c0_57] : memref<16x1xf32, #tpu.memory_space<vmem>>, vector<16x1xf32>
    %c0_58 = arith.constant 0 : index
    %c0_59 = arith.constant 0 : index
    %157 = vector.load %arg21[%c0_58, %c0_59] : memref<1x1xf32, #tpu.memory_space<vmem>>, vector<1x1xf32>
    %cst_60 = arith.constant dense<0.000000e+00> : vector<8x1xf32>
    %158 = tpu.matmul %140, %155, %cst_60 {dimension_numbers = #tpu.dot_dimension_numbers<[1], [0], [0], [1], [0, 0, 1, 1], [], []>} : vector<8x40xf32>, vector<40x1xf32>, vector<8x1xf32> -> vector<8x1xf32>
    %cst_61 = arith.constant dense<0.000000e+00> : vector<8x1xf32>
    %159 = tpu.matmul %154, %156, %cst_61 {dimension_numbers = #tpu.dot_dimension_numbers<[1], [0], [0], [1], [0, 0, 1, 1], [], []>} : vector<8x16xf32>, vector<16x1xf32>, vector<8x1xf32> -> vector<8x1xf32>
    %160 = arith.addf %158, %159 : vector<8x1xf32>
    %161 = vector.broadcast %157 : vector<1x1xf32> to vector<8x1xf32>
    %162 = arith.addf %160, %161 : vector<8x1xf32>
    %cst_62 = arith.constant 0.000000e+00 : f32
    %163 = vector.broadcast %cst_62 : f32 to vector<8x1xf32>
    %164 = arith.subf %163, %162 : vector<8x1xf32>
    %165 = math.exp %164 : vector<8x1xf32>
    %cst_63 = arith.constant 1.000000e+00 : f32
    %166 = vector.broadcast %cst_63 : f32 to vector<8x1xf32>
    %167 = arith.addf %166, %165 : vector<8x1xf32>
    %168 = tpu.reciprocal %167 {approx = true} : vector<8x1xf32> -> vector<8x1xf32>
    %169 = arith.addf %114, %168 : vector<8x1xf32>
    %c0_64 = arith.constant 0 : index
    %c0_65 = arith.constant 0 : index
    %170 = vector.load %arg22[%c0_64, %c0_65] : memref<70x48xf32, #tpu.memory_space<vmem>>, vector<70x48xf32>
    %cst_66 = arith.constant dense<0.000000e+00> : vector<8x48xf32>
    %171 = tpu.matmul %58, %170, %cst_66 {dimension_numbers = #tpu.dot_dimension_numbers<[1], [0], [0], [1], [0, 0, 1, 1], [], []>} : vector<8x70xf32>, vector<70x48xf32>, vector<8x48xf32> -> vector<8x48xf32>
    %c0_67 = arith.constant 0 : index
    %c0_68 = arith.constant 0 : index
    %172 = vector.load %arg23[%c0_67, %c0_68] : memref<2x48xf32, #tpu.memory_space<vmem>>, vector<2x48xf32>
    %c0_69 = arith.constant 0 : index
    %c0_70 = arith.constant 0 : index
    %173 = vector.load %arg24[%c0_69, %c0_70] : memref<2x48xf32, #tpu.memory_space<vmem>>, vector<2x48xf32>
    %174 = vector.extract_strided_slice %172 {offsets = [0, 0], sizes = [1, 48], strides = [1, 1]} : vector<2x48xf32> to vector<1x48xf32>
    %175 = vector.extract_strided_slice %173 {offsets = [0, 0], sizes = [1, 48], strides = [1, 1]} : vector<2x48xf32> to vector<1x48xf32>
    %176 = vector.broadcast %174 : vector<1x48xf32> to vector<8x48xf32>
    %177 = arith.mulf %171, %176 : vector<8x48xf32>
    %cst_71 = arith.constant dense<0.000000e+00> : vector<8xf32>
    %178 = vector.multi_reduction <add>, %177, %cst_71 [1] : vector<8x48xf32> to vector<8xf32>
    %179 = vector.shape_cast %178 : vector<8xf32> to vector<8x1xf32>
    %180 = vector.broadcast %179 : vector<8x1xf32> to vector<8x48xf32>
    %181 = arith.mulf %171, %180 : vector<8x48xf32>
    %182 = vector.broadcast %175 : vector<1x48xf32> to vector<8x48xf32>
    %183 = arith.addf %181, %182 : vector<8x48xf32>
    %184 = arith.addf %183, %171 : vector<8x48xf32>
    %185 = vector.extract_strided_slice %172 {offsets = [1, 0], sizes = [1, 48], strides = [1, 1]} : vector<2x48xf32> to vector<1x48xf32>
    %186 = vector.extract_strided_slice %173 {offsets = [1, 0], sizes = [1, 48], strides = [1, 1]} : vector<2x48xf32> to vector<1x48xf32>
    %187 = vector.broadcast %185 : vector<1x48xf32> to vector<8x48xf32>
    %188 = arith.mulf %184, %187 : vector<8x48xf32>
    %cst_72 = arith.constant dense<0.000000e+00> : vector<8xf32>
    %189 = vector.multi_reduction <add>, %188, %cst_72 [1] : vector<8x48xf32> to vector<8xf32>
    %190 = vector.shape_cast %189 : vector<8xf32> to vector<8x1xf32>
    %191 = vector.broadcast %190 : vector<8x1xf32> to vector<8x48xf32>
    %192 = arith.mulf %171, %191 : vector<8x48xf32>
    %193 = vector.broadcast %186 : vector<1x48xf32> to vector<8x48xf32>
    %194 = arith.addf %192, %193 : vector<8x48xf32>
    %195 = arith.addf %194, %184 : vector<8x48xf32>
    %c0_73 = arith.constant 0 : index
    %c0_74 = arith.constant 0 : index
    %196 = vector.load %arg25[%c0_73, %c0_74] : memref<48x32xf32, #tpu.memory_space<vmem>>, vector<48x32xf32>
    %c0_75 = arith.constant 0 : index
    %c0_76 = arith.constant 0 : index
    %197 = vector.load %arg26[%c0_75, %c0_76] : memref<1x32xf32, #tpu.memory_space<vmem>>, vector<1x32xf32>
    %cst_77 = arith.constant dense<0.000000e+00> : vector<8x32xf32>
    %198 = tpu.matmul %171, %196, %cst_77 {dimension_numbers = #tpu.dot_dimension_numbers<[1], [0], [0], [1], [0, 0, 1, 1], [], []>} : vector<8x48xf32>, vector<48x32xf32>, vector<8x32xf32> -> vector<8x32xf32>
    %199 = vector.broadcast %197 : vector<1x32xf32> to vector<8x32xf32>
    %200 = arith.addf %198, %199 : vector<8x32xf32>
    %cst_78 = arith.constant 0.000000e+00 : f32
    %201 = vector.broadcast %cst_78 : f32 to vector<8x32xf32>
    %202 = arith.maximumf %200, %201 : vector<8x32xf32>
    %c0_79 = arith.constant 0 : index
    %c0_80 = arith.constant 0 : index
    %203 = vector.load %arg27[%c0_79, %c0_80] : memref<32x16xf32, #tpu.memory_space<vmem>>, vector<32x16xf32>
    %c0_81 = arith.constant 0 : index
    %c0_82 = arith.constant 0 : index
    %204 = vector.load %arg28[%c0_81, %c0_82] : memref<1x16xf32, #tpu.memory_space<vmem>>, vector<1x16xf32>
    %cst_83 = arith.constant dense<0.000000e+00> : vector<8x16xf32>
    %205 = tpu.matmul %202, %203, %cst_83 {dimension_numbers = #tpu.dot_dimension_numbers<[1], [0], [0], [1], [0, 0, 1, 1], [], []>} : vector<8x32xf32>, vector<32x16xf32>, vector<8x16xf32> -> vector<8x16xf32>
    %206 = vector.broadcast %204 : vector<1x16xf32> to vector<8x16xf32>
    %207 = arith.addf %205, %206 : vector<8x16xf32>
    %cst_84 = arith.constant 0.000000e+00 : f32
    %208 = vector.broadcast %cst_84 : f32 to vector<8x16xf32>
    %209 = arith.maximumf %207, %208 : vector<8x16xf32>
    %c0_85 = arith.constant 0 : index
    %c0_86 = arith.constant 0 : index
    %210 = vector.load %arg29[%c0_85, %c0_86] : memref<48x1xf32, #tpu.memory_space<vmem>>, vector<48x1xf32>
    %c0_87 = arith.constant 0 : index
    %c0_88 = arith.constant 0 : index
    %211 = vector.load %arg30[%c0_87, %c0_88] : memref<16x1xf32, #tpu.memory_space<vmem>>, vector<16x1xf32>
    %c0_89 = arith.constant 0 : index
    %c0_90 = arith.constant 0 : index
    %212 = vector.load %arg31[%c0_89, %c0_90] : memref<1x1xf32, #tpu.memory_space<vmem>>, vector<1x1xf32>
    %cst_91 = arith.constant dense<0.000000e+00> : vector<8x1xf32>
    %213 = tpu.matmul %195, %210, %cst_91 {dimension_numbers = #tpu.dot_dimension_numbers<[1], [0], [0], [1], [0, 0, 1, 1], [], []>} : vector<8x48xf32>, vector<48x1xf32>, vector<8x1xf32> -> vector<8x1xf32>
    %cst_92 = arith.constant dense<0.000000e+00> : vector<8x1xf32>
    %214 = tpu.matmul %209, %211, %cst_92 {dimension_numbers = #tpu.dot_dimension_numbers<[1], [0], [0], [1], [0, 0, 1, 1], [], []>} : vector<8x16xf32>, vector<16x1xf32>, vector<8x1xf32> -> vector<8x1xf32>
    %215 = arith.addf %213, %214 : vector<8x1xf32>
    %216 = vector.broadcast %212 : vector<1x1xf32> to vector<8x1xf32>
    %217 = arith.addf %215, %216 : vector<8x1xf32>
    %cst_93 = arith.constant 0.000000e+00 : f32
    %218 = vector.broadcast %cst_93 : f32 to vector<8x1xf32>
    %219 = arith.subf %218, %217 : vector<8x1xf32>
    %220 = math.exp %219 : vector<8x1xf32>
    %cst_94 = arith.constant 1.000000e+00 : f32
    %221 = vector.broadcast %cst_94 : f32 to vector<8x1xf32>
    %222 = arith.addf %221, %220 : vector<8x1xf32>
    %223 = tpu.reciprocal %222 {approx = true} : vector<8x1xf32> -> vector<8x1xf32>
    %224 = arith.addf %169, %223 : vector<8x1xf32>
    %c0_95 = arith.constant 0 : index
    %c0_96 = arith.constant 0 : index
    %225 = vector.load %arg32[%c0_95, %c0_96] : memref<70x48xf32, #tpu.memory_space<vmem>>, vector<70x48xf32>
    %cst_97 = arith.constant dense<0.000000e+00> : vector<8x48xf32>
    %226 = tpu.matmul %58, %225, %cst_97 {dimension_numbers = #tpu.dot_dimension_numbers<[1], [0], [0], [1], [0, 0, 1, 1], [], []>} : vector<8x70xf32>, vector<70x48xf32>, vector<8x48xf32> -> vector<8x48xf32>
    %c0_98 = arith.constant 0 : index
    %c0_99 = arith.constant 0 : index
    %227 = vector.load %arg33[%c0_98, %c0_99] : memref<48x120xf32, #tpu.memory_space<vmem>>, vector<48x120xf32>
    %cst_100 = arith.constant dense<0.000000e+00> : vector<8x120xf32>
    %228 = tpu.matmul %226, %227, %cst_100 {dimension_numbers = #tpu.dot_dimension_numbers<[1], [0], [0], [1], [0, 0, 1, 1], [], []>} : vector<8x48xf32>, vector<48x120xf32>, vector<8x120xf32> -> vector<8x120xf32>
    %c0_101 = arith.constant 0 : index
    %c0_102 = arith.constant 0 : index
    %229 = vector.load %arg34[%c0_101, %c0_102] : memref<48x120xf32, #tpu.memory_space<vmem>>, vector<48x120xf32>
    %cst_103 = arith.constant dense<0.000000e+00> : vector<8x120xf32>
    %230 = tpu.matmul %226, %229, %cst_103 {dimension_numbers = #tpu.dot_dimension_numbers<[1], [0], [0], [1], [0, 0, 1, 1], [], []>} : vector<8x48xf32>, vector<48x120xf32>, vector<8x120xf32> -> vector<8x120xf32>
    %231 = arith.mulf %228, %230 : vector<8x120xf32>
    %c0_104 = arith.constant 0 : index
    %c0_105 = arith.constant 0 : index
    %232 = vector.load %arg35[%c0_104, %c0_105] : memref<120x15xf32, #tpu.memory_space<vmem>>, vector<120x15xf32>
    %cst_106 = arith.constant dense<0.000000e+00> : vector<8x15xf32>
    %233 = tpu.matmul %231, %232, %cst_106 {dimension_numbers = #tpu.dot_dimension_numbers<[1], [0], [0], [1], [0, 0, 1, 1], [], []>} : vector<8x120xf32>, vector<120x15xf32>, vector<8x15xf32> -> vector<8x15xf32>
    %c0_107 = arith.constant 0 : index
    %c0_108 = arith.constant 0 : index
    %234 = vector.load %arg36[%c0_107, %c0_108] : memref<48x32xf32, #tpu.memory_space<vmem>>, vector<48x32xf32>
    %cst_109 = arith.constant dense<0.000000e+00> : vector<8x32xf32>
    %235 = tpu.matmul %226, %234, %cst_109 {dimension_numbers = #tpu.dot_dimension_numbers<[1], [0], [0], [1], [0, 0, 1, 1], [], []>} : vector<8x48xf32>, vector<48x32xf32>, vector<8x32xf32> -> vector<8x32xf32>
    %c0_110 = arith.constant 0 : index
    %c0_111 = arith.constant 0 : index
    %236 = vector.load %arg37[%c0_110, %c0_111] : memref<15x32xf32, #tpu.memory_space<vmem>>, vector<15x32xf32>
    %cst_112 = arith.constant dense<0.000000e+00> : vector<8x32xf32>
    %237 = tpu.matmul %233, %236, %cst_112 {dimension_numbers = #tpu.dot_dimension_numbers<[1], [0], [0], [1], [0, 0, 1, 1], [], []>} : vector<8x15xf32>, vector<15x32xf32>, vector<8x32xf32> -> vector<8x32xf32>
    %238 = arith.addf %235, %237 : vector<8x32xf32>
    %c0_113 = arith.constant 0 : index
    %c0_114 = arith.constant 0 : index
    %239 = vector.load %arg38[%c0_113, %c0_114] : memref<1x32xf32, #tpu.memory_space<vmem>>, vector<1x32xf32>
    %240 = vector.broadcast %239 : vector<1x32xf32> to vector<8x32xf32>
    %241 = arith.addf %238, %240 : vector<8x32xf32>
    %cst_115 = arith.constant 0.000000e+00 : f32
    %242 = vector.broadcast %cst_115 : f32 to vector<8x32xf32>
    %243 = arith.maximumf %241, %242 : vector<8x32xf32>
    %c0_116 = arith.constant 0 : index
    %c0_117 = arith.constant 0 : index
    %244 = vector.load %arg39[%c0_116, %c0_117] : memref<32x16xf32, #tpu.memory_space<vmem>>, vector<32x16xf32>
    %c0_118 = arith.constant 0 : index
    %c0_119 = arith.constant 0 : index
    %245 = vector.load %arg40[%c0_118, %c0_119] : memref<1x16xf32, #tpu.memory_space<vmem>>, vector<1x16xf32>
    %cst_120 = arith.constant dense<0.000000e+00> : vector<8x16xf32>
    %246 = tpu.matmul %243, %244, %cst_120 {dimension_numbers = #tpu.dot_dimension_numbers<[1], [0], [0], [1], [0, 0, 1, 1], [], []>} : vector<8x32xf32>, vector<32x16xf32>, vector<8x16xf32> -> vector<8x16xf32>
    %247 = vector.broadcast %245 : vector<1x16xf32> to vector<8x16xf32>
    %248 = arith.addf %246, %247 : vector<8x16xf32>
    %cst_121 = arith.constant 0.000000e+00 : f32
    %249 = vector.broadcast %cst_121 : f32 to vector<8x16xf32>
    %250 = arith.maximumf %248, %249 : vector<8x16xf32>
    %c0_122 = arith.constant 0 : index
    %c0_123 = arith.constant 0 : index
    %251 = vector.load %arg41[%c0_122, %c0_123] : memref<16x1xf32, #tpu.memory_space<vmem>>, vector<16x1xf32>
    %c0_124 = arith.constant 0 : index
    %c0_125 = arith.constant 0 : index
    %252 = vector.load %arg42[%c0_124, %c0_125] : memref<1x1xf32, #tpu.memory_space<vmem>>, vector<1x1xf32>
    %cst_126 = arith.constant dense<0.000000e+00> : vector<8x1xf32>
    %253 = tpu.matmul %250, %251, %cst_126 {dimension_numbers = #tpu.dot_dimension_numbers<[1], [0], [0], [1], [0, 0, 1, 1], [], []>} : vector<8x16xf32>, vector<16x1xf32>, vector<8x1xf32> -> vector<8x1xf32>
    %254 = vector.broadcast %252 : vector<1x1xf32> to vector<8x1xf32>
    %255 = arith.addf %253, %254 : vector<8x1xf32>
    %cst_127 = arith.constant 0.000000e+00 : f32
    %256 = vector.broadcast %cst_127 : f32 to vector<8x1xf32>
    %257 = arith.subf %256, %255 : vector<8x1xf32>
    %258 = math.exp %257 : vector<8x1xf32>
    %cst_128 = arith.constant 1.000000e+00 : f32
    %259 = vector.broadcast %cst_128 : f32 to vector<8x1xf32>
    %260 = arith.addf %259, %258 : vector<8x1xf32>
    %261 = tpu.reciprocal %260 {approx = true} : vector<8x1xf32> -> vector<8x1xf32>
    %262 = arith.addf %224, %261 : vector<8x1xf32>
    %c0_129 = arith.constant 0 : index
    %c0_130 = arith.constant 0 : index
    %263 = vector.load %arg43[%c0_129, %c0_130] : memref<70x32xf32, #tpu.memory_space<vmem>>, vector<70x32xf32>
    %cst_131 = arith.constant dense<0.000000e+00> : vector<8x32xf32>
    %264 = tpu.matmul %58, %263, %cst_131 {dimension_numbers = #tpu.dot_dimension_numbers<[1], [0], [0], [1], [0, 0, 1, 1], [], []>} : vector<8x70xf32>, vector<70x32xf32>, vector<8x32xf32> -> vector<8x32xf32>
    %c0_132 = arith.constant 0 : index
    %c0_133 = arith.constant 0 : index
    %265 = vector.load %arg44[%c0_132, %c0_133] : memref<1x32xf32, #tpu.memory_space<vmem>>, vector<1x32xf32>
    %c0_134 = arith.constant 0 : index
    %c0_135 = arith.constant 0 : index
    %266 = vector.load %arg45[%c0_134, %c0_135] : memref<1x32xf32, #tpu.memory_space<vmem>>, vector<1x32xf32>
    %267 = vector.broadcast %265 : vector<1x32xf32> to vector<8x32xf32>
    %268 = arith.mulf %264, %267 : vector<8x32xf32>
    %cst_136 = arith.constant dense<0.000000e+00> : vector<8xf32>
    %269 = vector.multi_reduction <add>, %268, %cst_136 [1] : vector<8x32xf32> to vector<8xf32>
    %270 = vector.shape_cast %269 : vector<8xf32> to vector<8x1xf32>
    %271 = vector.broadcast %270 : vector<8x1xf32> to vector<8x32xf32>
    %272 = arith.mulf %264, %271 : vector<8x32xf32>
    %273 = vector.broadcast %266 : vector<1x32xf32> to vector<8x32xf32>
    %274 = arith.addf %272, %273 : vector<8x32xf32>
    %275 = arith.addf %274, %264 : vector<8x32xf32>
    %c0_137 = arith.constant 0 : index
    %c0_138 = arith.constant 0 : index
    %276 = vector.load %arg46[%c0_137, %c0_138] : memref<32x256xf32, #tpu.memory_space<vmem>>, vector<32x256xf32>
    %c0_139 = arith.constant 0 : index
    %c0_140 = arith.constant 0 : index
    %277 = vector.load %arg47[%c0_139, %c0_140] : memref<1x256xf32, #tpu.memory_space<vmem>>, vector<1x256xf32>
    %cst_141 = arith.constant dense<0.000000e+00> : vector<8x256xf32>
    %278 = tpu.matmul %264, %276, %cst_141 {dimension_numbers = #tpu.dot_dimension_numbers<[1], [0], [0], [1], [0, 0, 1, 1], [], []>} : vector<8x32xf32>, vector<32x256xf32>, vector<8x256xf32> -> vector<8x256xf32>
    %279 = vector.broadcast %277 : vector<1x256xf32> to vector<8x256xf32>
    %280 = arith.addf %278, %279 : vector<8x256xf32>
    %cst_142 = arith.constant 0.000000e+00 : f32
    %281 = vector.broadcast %cst_142 : f32 to vector<8x256xf32>
    %282 = arith.maximumf %280, %281 : vector<8x256xf32>
    %c0_143 = arith.constant 0 : index
    %c0_144 = arith.constant 0 : index
    %283 = vector.load %arg48[%c0_143, %c0_144] : memref<32x1xf32, #tpu.memory_space<vmem>>, vector<32x1xf32>
    %c0_145 = arith.constant 0 : index
    %c0_146 = arith.constant 0 : index
    %284 = vector.load %arg49[%c0_145, %c0_146] : memref<256x1xf32, #tpu.memory_space<vmem>>, vector<256x1xf32>
    %c0_147 = arith.constant 0 : index
    %c0_148 = arith.constant 0 : index
    %285 = vector.load %arg50[%c0_147, %c0_148] : memref<1x1xf32, #tpu.memory_space<vmem>>, vector<1x1xf32>
    %cst_149 = arith.constant dense<0.000000e+00> : vector<8x1xf32>
    %286 = tpu.matmul %275, %283, %cst_149 {dimension_numbers = #tpu.dot_dimension_numbers<[1], [0], [0], [1], [0, 0, 1, 1], [], []>} : vector<8x32xf32>, vector<32x1xf32>, vector<8x1xf32> -> vector<8x1xf32>
    %cst_150 = arith.constant dense<0.000000e+00> : vector<8x1xf32>
    %287 = tpu.matmul %282, %284, %cst_150 {dimension_numbers = #tpu.dot_dimension_numbers<[1], [0], [0], [1], [0, 0, 1, 1], [], []>} : vector<8x256xf32>, vector<256x1xf32>, vector<8x1xf32> -> vector<8x1xf32>
    %288 = arith.addf %286, %287 : vector<8x1xf32>
    %289 = vector.broadcast %285 : vector<1x1xf32> to vector<8x1xf32>
    %290 = arith.addf %288, %289 : vector<8x1xf32>
    %cst_151 = arith.constant 0.000000e+00 : f32
    %291 = vector.broadcast %cst_151 : f32 to vector<8x1xf32>
    %292 = arith.subf %291, %290 : vector<8x1xf32>
    %293 = math.exp %292 : vector<8x1xf32>
    %cst_152 = arith.constant 1.000000e+00 : f32
    %294 = vector.broadcast %cst_152 : f32 to vector<8x1xf32>
    %295 = arith.addf %294, %293 : vector<8x1xf32>
    %296 = tpu.reciprocal %295 {approx = true} : vector<8x1xf32> -> vector<8x1xf32>
    %297 = arith.addf %262, %296 : vector<8x1xf32>
    %c0_153 = arith.constant 0 : index
    %c0_154 = arith.constant 0 : index
    %298 = vector.load %arg51[%c0_153, %c0_154] : memref<70x40xf32, #tpu.memory_space<vmem>>, vector<70x40xf32>
    %cst_155 = arith.constant dense<0.000000e+00> : vector<8x40xf32>
    %299 = tpu.matmul %58, %298, %cst_155 {dimension_numbers = #tpu.dot_dimension_numbers<[1], [0], [0], [1], [0, 0, 1, 1], [], []>} : vector<8x70xf32>, vector<70x40xf32>, vector<8x40xf32> -> vector<8x40xf32>
    %c0_156 = arith.constant 0 : index
    %c0_157 = arith.constant 0 : index
    %300 = vector.load %arg52[%c0_156, %c0_157] : memref<1x40xf32, #tpu.memory_space<vmem>>, vector<1x40xf32>
    %c0_158 = arith.constant 0 : index
    %c0_159 = arith.constant 0 : index
    %301 = vector.load %arg53[%c0_158, %c0_159] : memref<1x40xf32, #tpu.memory_space<vmem>>, vector<1x40xf32>
    %302 = vector.broadcast %300 : vector<1x40xf32> to vector<8x40xf32>
    %303 = arith.mulf %299, %302 : vector<8x40xf32>
    %cst_160 = arith.constant dense<0.000000e+00> : vector<8xf32>
    %304 = vector.multi_reduction <add>, %303, %cst_160 [1] : vector<8x40xf32> to vector<8xf32>
    %305 = vector.shape_cast %304 : vector<8xf32> to vector<8x1xf32>
    %306 = vector.broadcast %305 : vector<8x1xf32> to vector<8x40xf32>
    %307 = arith.mulf %299, %306 : vector<8x40xf32>
    %308 = vector.broadcast %301 : vector<1x40xf32> to vector<8x40xf32>
    %309 = arith.addf %307, %308 : vector<8x40xf32>
    %310 = arith.addf %309, %299 : vector<8x40xf32>
    %c0_161 = arith.constant 0 : index
    %c0_162 = arith.constant 0 : index
    %311 = vector.load %arg54[%c0_161, %c0_162] : memref<40x256xf32, #tpu.memory_space<vmem>>, vector<40x256xf32>
    %c0_163 = arith.constant 0 : index
    %c0_164 = arith.constant 0 : index
    %312 = vector.load %arg55[%c0_163, %c0_164] : memref<1x256xf32, #tpu.memory_space<vmem>>, vector<1x256xf32>
    %cst_165 = arith.constant dense<0.000000e+00> : vector<8x256xf32>
    %313 = tpu.matmul %299, %311, %cst_165 {dimension_numbers = #tpu.dot_dimension_numbers<[1], [0], [0], [1], [0, 0, 1, 1], [], []>} : vector<8x40xf32>, vector<40x256xf32>, vector<8x256xf32> -> vector<8x256xf32>
    %314 = vector.broadcast %312 : vector<1x256xf32> to vector<8x256xf32>
    %315 = arith.addf %313, %314 : vector<8x256xf32>
    %cst_166 = arith.constant 0.000000e+00 : f32
    %316 = vector.broadcast %cst_166 : f32 to vector<8x256xf32>
    %317 = arith.maximumf %315, %316 : vector<8x256xf32>
    %c0_167 = arith.constant 0 : index
    %c0_168 = arith.constant 0 : index
    %318 = vector.load %arg56[%c0_167, %c0_168] : memref<40x1xf32, #tpu.memory_space<vmem>>, vector<40x1xf32>
    %c0_169 = arith.constant 0 : index
    %c0_170 = arith.constant 0 : index
    %319 = vector.load %arg57[%c0_169, %c0_170] : memref<256x1xf32, #tpu.memory_space<vmem>>, vector<256x1xf32>
    %c0_171 = arith.constant 0 : index
    %c0_172 = arith.constant 0 : index
    %320 = vector.load %arg58[%c0_171, %c0_172] : memref<1x1xf32, #tpu.memory_space<vmem>>, vector<1x1xf32>
    %cst_173 = arith.constant dense<0.000000e+00> : vector<8x1xf32>
    %321 = tpu.matmul %310, %318, %cst_173 {dimension_numbers = #tpu.dot_dimension_numbers<[1], [0], [0], [1], [0, 0, 1, 1], [], []>} : vector<8x40xf32>, vector<40x1xf32>, vector<8x1xf32> -> vector<8x1xf32>
    %cst_174 = arith.constant dense<0.000000e+00> : vector<8x1xf32>
    %322 = tpu.matmul %317, %319, %cst_174 {dimension_numbers = #tpu.dot_dimension_numbers<[1], [0], [0], [1], [0, 0, 1, 1], [], []>} : vector<8x256xf32>, vector<256x1xf32>, vector<8x1xf32> -> vector<8x1xf32>
    %323 = arith.addf %321, %322 : vector<8x1xf32>
    %324 = vector.broadcast %320 : vector<1x1xf32> to vector<8x1xf32>
    %325 = arith.addf %323, %324 : vector<8x1xf32>
    %cst_175 = arith.constant 0.000000e+00 : f32
    %326 = vector.broadcast %cst_175 : f32 to vector<8x1xf32>
    %327 = arith.subf %326, %325 : vector<8x1xf32>
    %328 = math.exp %327 : vector<8x1xf32>
    %cst_176 = arith.constant 1.000000e+00 : f32
    %329 = vector.broadcast %cst_176 : f32 to vector<8x1xf32>
    %330 = arith.addf %329, %328 : vector<8x1xf32>
    %331 = tpu.reciprocal %330 {approx = true} : vector<8x1xf32> -> vector<8x1xf32>
    %332 = arith.addf %297, %331 : vector<8x1xf32>
    %c0_177 = arith.constant 0 : index
    %c0_178 = arith.constant 0 : index
    %333 = vector.load %arg59[%c0_177, %c0_178] : memref<70x48xf32, #tpu.memory_space<vmem>>, vector<70x48xf32>
    %cst_179 = arith.constant dense<0.000000e+00> : vector<8x48xf32>
    %334 = tpu.matmul %58, %333, %cst_179 {dimension_numbers = #tpu.dot_dimension_numbers<[1], [0], [0], [1], [0, 0, 1, 1], [], []>} : vector<8x70xf32>, vector<70x48xf32>, vector<8x48xf32> -> vector<8x48xf32>
    %c0_180 = arith.constant 0 : index
    %c0_181 = arith.constant 0 : index
    %335 = vector.load %arg60[%c0_180, %c0_181] : memref<1x48xf32, #tpu.memory_space<vmem>>, vector<1x48xf32>
    %c0_182 = arith.constant 0 : index
    %c0_183 = arith.constant 0 : index
    %336 = vector.load %arg61[%c0_182, %c0_183] : memref<1x48xf32, #tpu.memory_space<vmem>>, vector<1x48xf32>
    %337 = vector.broadcast %335 : vector<1x48xf32> to vector<8x48xf32>
    %338 = arith.mulf %334, %337 : vector<8x48xf32>
    %cst_184 = arith.constant dense<0.000000e+00> : vector<8xf32>
    %339 = vector.multi_reduction <add>, %338, %cst_184 [1] : vector<8x48xf32> to vector<8xf32>
    %340 = vector.shape_cast %339 : vector<8xf32> to vector<8x1xf32>
    %341 = vector.broadcast %340 : vector<8x1xf32> to vector<8x48xf32>
    %342 = arith.mulf %334, %341 : vector<8x48xf32>
    %343 = vector.broadcast %336 : vector<1x48xf32> to vector<8x48xf32>
    %344 = arith.addf %342, %343 : vector<8x48xf32>
    %345 = arith.addf %344, %334 : vector<8x48xf32>
    %c0_185 = arith.constant 0 : index
    %c0_186 = arith.constant 0 : index
    %346 = vector.load %arg62[%c0_185, %c0_186] : memref<48x256xf32, #tpu.memory_space<vmem>>, vector<48x256xf32>
    %c0_187 = arith.constant 0 : index
    %c0_188 = arith.constant 0 : index
    %347 = vector.load %arg63[%c0_187, %c0_188] : memref<1x256xf32, #tpu.memory_space<vmem>>, vector<1x256xf32>
    %cst_189 = arith.constant dense<0.000000e+00> : vector<8x256xf32>
    %348 = tpu.matmul %334, %346, %cst_189 {dimension_numbers = #tpu.dot_dimension_numbers<[1], [0], [0], [1], [0, 0, 1, 1], [], []>} : vector<8x48xf32>, vector<48x256xf32>, vector<8x256xf32> -> vector<8x256xf32>
    %349 = vector.broadcast %347 : vector<1x256xf32> to vector<8x256xf32>
    %350 = arith.addf %348, %349 : vector<8x256xf32>
    %cst_190 = arith.constant 0.000000e+00 : f32
    %351 = vector.broadcast %cst_190 : f32 to vector<8x256xf32>
    %352 = arith.maximumf %350, %351 : vector<8x256xf32>
    %c0_191 = arith.constant 0 : index
    %c0_192 = arith.constant 0 : index
    %353 = vector.load %arg64[%c0_191, %c0_192] : memref<48x1xf32, #tpu.memory_space<vmem>>, vector<48x1xf32>
    %c0_193 = arith.constant 0 : index
    %c0_194 = arith.constant 0 : index
    %354 = vector.load %arg65[%c0_193, %c0_194] : memref<256x1xf32, #tpu.memory_space<vmem>>, vector<256x1xf32>
    %c0_195 = arith.constant 0 : index
    %c0_196 = arith.constant 0 : index
    %355 = vector.load %arg66[%c0_195, %c0_196] : memref<1x1xf32, #tpu.memory_space<vmem>>, vector<1x1xf32>
    %cst_197 = arith.constant dense<0.000000e+00> : vector<8x1xf32>
    %356 = tpu.matmul %345, %353, %cst_197 {dimension_numbers = #tpu.dot_dimension_numbers<[1], [0], [0], [1], [0, 0, 1, 1], [], []>} : vector<8x48xf32>, vector<48x1xf32>, vector<8x1xf32> -> vector<8x1xf32>
    %cst_198 = arith.constant dense<0.000000e+00> : vector<8x1xf32>
    %357 = tpu.matmul %352, %354, %cst_198 {dimension_numbers = #tpu.dot_dimension_numbers<[1], [0], [0], [1], [0, 0, 1, 1], [], []>} : vector<8x256xf32>, vector<256x1xf32>, vector<8x1xf32> -> vector<8x1xf32>
    %358 = arith.addf %356, %357 : vector<8x1xf32>
    %359 = vector.broadcast %355 : vector<1x1xf32> to vector<8x1xf32>
    %360 = arith.addf %358, %359 : vector<8x1xf32>
    %cst_199 = arith.constant 0.000000e+00 : f32
    %361 = vector.broadcast %cst_199 : f32 to vector<8x1xf32>
    %362 = arith.subf %361, %360 : vector<8x1xf32>
    %363 = math.exp %362 : vector<8x1xf32>
    %cst_200 = arith.constant 1.000000e+00 : f32
    %364 = vector.broadcast %cst_200 : f32 to vector<8x1xf32>
    %365 = arith.addf %364, %363 : vector<8x1xf32>
    %366 = tpu.reciprocal %365 {approx = true} : vector<8x1xf32> -> vector<8x1xf32>
    %367 = arith.addf %332, %366 : vector<8x1xf32>
    %c0_201 = arith.constant 0 : index
    %c0_202 = arith.constant 0 : index
    %368 = vector.load %arg67[%c0_201, %c0_202] : memref<70x56xf32, #tpu.memory_space<vmem>>, vector<70x56xf32>
    %cst_203 = arith.constant dense<0.000000e+00> : vector<8x56xf32>
    %369 = tpu.matmul %58, %368, %cst_203 {dimension_numbers = #tpu.dot_dimension_numbers<[1], [0], [0], [1], [0, 0, 1, 1], [], []>} : vector<8x70xf32>, vector<70x56xf32>, vector<8x56xf32> -> vector<8x56xf32>
    %c0_204 = arith.constant 0 : index
    %c0_205 = arith.constant 0 : index
    %370 = vector.load %arg68[%c0_204, %c0_205] : memref<1x56xf32, #tpu.memory_space<vmem>>, vector<1x56xf32>
    %c0_206 = arith.constant 0 : index
    %c0_207 = arith.constant 0 : index
    %371 = vector.load %arg69[%c0_206, %c0_207] : memref<1x56xf32, #tpu.memory_space<vmem>>, vector<1x56xf32>
    %372 = vector.broadcast %370 : vector<1x56xf32> to vector<8x56xf32>
    %373 = arith.mulf %369, %372 : vector<8x56xf32>
    %cst_208 = arith.constant dense<0.000000e+00> : vector<8xf32>
    %374 = vector.multi_reduction <add>, %373, %cst_208 [1] : vector<8x56xf32> to vector<8xf32>
    %375 = vector.shape_cast %374 : vector<8xf32> to vector<8x1xf32>
    %376 = vector.broadcast %375 : vector<8x1xf32> to vector<8x56xf32>
    %377 = arith.mulf %369, %376 : vector<8x56xf32>
    %378 = vector.broadcast %371 : vector<1x56xf32> to vector<8x56xf32>
    %379 = arith.addf %377, %378 : vector<8x56xf32>
    %380 = arith.addf %379, %369 : vector<8x56xf32>
    %c0_209 = arith.constant 0 : index
    %c0_210 = arith.constant 0 : index
    %381 = vector.load %arg70[%c0_209, %c0_210] : memref<56x256xf32, #tpu.memory_space<vmem>>, vector<56x256xf32>
    %c0_211 = arith.constant 0 : index
    %c0_212 = arith.constant 0 : index
    %382 = vector.load %arg71[%c0_211, %c0_212] : memref<1x256xf32, #tpu.memory_space<vmem>>, vector<1x256xf32>
    %cst_213 = arith.constant dense<0.000000e+00> : vector<8x256xf32>
    %383 = tpu.matmul %369, %381, %cst_213 {dimension_numbers = #tpu.dot_dimension_numbers<[1], [0], [0], [1], [0, 0, 1, 1], [], []>} : vector<8x56xf32>, vector<56x256xf32>, vector<8x256xf32> -> vector<8x256xf32>
    %384 = vector.broadcast %382 : vector<1x256xf32> to vector<8x256xf32>
    %385 = arith.addf %383, %384 : vector<8x256xf32>
    %cst_214 = arith.constant 0.000000e+00 : f32
    %386 = vector.broadcast %cst_214 : f32 to vector<8x256xf32>
    %387 = arith.maximumf %385, %386 : vector<8x256xf32>
    %c0_215 = arith.constant 0 : index
    %c0_216 = arith.constant 0 : index
    %388 = vector.load %arg72[%c0_215, %c0_216] : memref<56x1xf32, #tpu.memory_space<vmem>>, vector<56x1xf32>
    %c0_217 = arith.constant 0 : index
    %c0_218 = arith.constant 0 : index
    %389 = vector.load %arg73[%c0_217, %c0_218] : memref<256x1xf32, #tpu.memory_space<vmem>>, vector<256x1xf32>
    %c0_219 = arith.constant 0 : index
    %c0_220 = arith.constant 0 : index
    %390 = vector.load %arg74[%c0_219, %c0_220] : memref<1x1xf32, #tpu.memory_space<vmem>>, vector<1x1xf32>
    %cst_221 = arith.constant dense<0.000000e+00> : vector<8x1xf32>
    %391 = tpu.matmul %380, %388, %cst_221 {dimension_numbers = #tpu.dot_dimension_numbers<[1], [0], [0], [1], [0, 0, 1, 1], [], []>} : vector<8x56xf32>, vector<56x1xf32>, vector<8x1xf32> -> vector<8x1xf32>
    %cst_222 = arith.constant dense<0.000000e+00> : vector<8x1xf32>
    %392 = tpu.matmul %387, %389, %cst_222 {dimension_numbers = #tpu.dot_dimension_numbers<[1], [0], [0], [1], [0, 0, 1, 1], [], []>} : vector<8x256xf32>, vector<256x1xf32>, vector<8x1xf32> -> vector<8x1xf32>
    %393 = arith.addf %391, %392 : vector<8x1xf32>
    %394 = vector.broadcast %390 : vector<1x1xf32> to vector<8x1xf32>
    %395 = arith.addf %393, %394 : vector<8x1xf32>
    %cst_223 = arith.constant 0.000000e+00 : f32
    %396 = vector.broadcast %cst_223 : f32 to vector<8x1xf32>
    %397 = arith.subf %396, %395 : vector<8x1xf32>
    %398 = math.exp %397 : vector<8x1xf32>
    %cst_224 = arith.constant 1.000000e+00 : f32
    %399 = vector.broadcast %cst_224 : f32 to vector<8x1xf32>
    %400 = arith.addf %399, %398 : vector<8x1xf32>
    %401 = tpu.reciprocal %400 {approx = true} : vector<8x1xf32> -> vector<8x1xf32>
    %402 = arith.addf %367, %401 : vector<8x1xf32>
    %c0_225 = arith.constant 0 : index
    %c0_226 = arith.constant 0 : index
    %403 = vector.load %arg75[%c0_225, %c0_226] : memref<70x56xf32, #tpu.memory_space<vmem>>, vector<70x56xf32>
    %cst_227 = arith.constant dense<0.000000e+00> : vector<8x56xf32>
    %404 = tpu.matmul %58, %403, %cst_227 {dimension_numbers = #tpu.dot_dimension_numbers<[1], [0], [0], [1], [0, 0, 1, 1], [], []>} : vector<8x70xf32>, vector<70x56xf32>, vector<8x56xf32> -> vector<8x56xf32>
    %c0_228 = arith.constant 0 : index
    %c0_229 = arith.constant 0 : index
    %405 = vector.load %arg76[%c0_228, %c0_229] : memref<56x168xf32, #tpu.memory_space<vmem>>, vector<56x168xf32>
    %cst_230 = arith.constant dense<0.000000e+00> : vector<8x168xf32>
    %406 = tpu.matmul %404, %405, %cst_230 {dimension_numbers = #tpu.dot_dimension_numbers<[1], [0], [0], [1], [0, 0, 1, 1], [], []>} : vector<8x56xf32>, vector<56x168xf32>, vector<8x168xf32> -> vector<8x168xf32>
    %c0_231 = arith.constant 0 : index
    %c0_232 = arith.constant 0 : index
    %407 = vector.load %arg77[%c0_231, %c0_232] : memref<56x168xf32, #tpu.memory_space<vmem>>, vector<56x168xf32>
    %cst_233 = arith.constant dense<0.000000e+00> : vector<8x168xf32>
    %408 = tpu.matmul %404, %407, %cst_233 {dimension_numbers = #tpu.dot_dimension_numbers<[1], [0], [0], [1], [0, 0, 1, 1], [], []>} : vector<8x56xf32>, vector<56x168xf32>, vector<8x168xf32> -> vector<8x168xf32>
    %409 = arith.mulf %406, %408 : vector<8x168xf32>
    %c0_234 = arith.constant 0 : index
    %c0_235 = arith.constant 0 : index
    %410 = vector.load %arg78[%c0_234, %c0_235] : memref<168x21xf32, #tpu.memory_space<vmem>>, vector<168x21xf32>
    %cst_236 = arith.constant dense<0.000000e+00> : vector<8x21xf32>
    %411 = tpu.matmul %409, %410, %cst_236 {dimension_numbers = #tpu.dot_dimension_numbers<[1], [0], [0], [1], [0, 0, 1, 1], [], []>} : vector<8x168xf32>, vector<168x21xf32>, vector<8x21xf32> -> vector<8x21xf32>
    %c0_237 = arith.constant 0 : index
    %c0_238 = arith.constant 0 : index
    %412 = vector.load %arg79[%c0_237, %c0_238] : memref<56x256xf32, #tpu.memory_space<vmem>>, vector<56x256xf32>
    %cst_239 = arith.constant dense<0.000000e+00> : vector<8x256xf32>
    %413 = tpu.matmul %404, %412, %cst_239 {dimension_numbers = #tpu.dot_dimension_numbers<[1], [0], [0], [1], [0, 0, 1, 1], [], []>} : vector<8x56xf32>, vector<56x256xf32>, vector<8x256xf32> -> vector<8x256xf32>
    %c0_240 = arith.constant 0 : index
    %c0_241 = arith.constant 0 : index
    %414 = vector.load %arg80[%c0_240, %c0_241] : memref<21x256xf32, #tpu.memory_space<vmem>>, vector<21x256xf32>
    %cst_242 = arith.constant dense<0.000000e+00> : vector<8x256xf32>
    %415 = tpu.matmul %411, %414, %cst_242 {dimension_numbers = #tpu.dot_dimension_numbers<[1], [0], [0], [1], [0, 0, 1, 1], [], []>} : vector<8x21xf32>, vector<21x256xf32>, vector<8x256xf32> -> vector<8x256xf32>
    %416 = arith.addf %413, %415 : vector<8x256xf32>
    %c0_243 = arith.constant 0 : index
    %c0_244 = arith.constant 0 : index
    %417 = vector.load %arg81[%c0_243, %c0_244] : memref<1x256xf32, #tpu.memory_space<vmem>>, vector<1x256xf32>
    %418 = vector.broadcast %417 : vector<1x256xf32> to vector<8x256xf32>
    %419 = arith.addf %416, %418 : vector<8x256xf32>
    %cst_245 = arith.constant 0.000000e+00 : f32
    %420 = vector.broadcast %cst_245 : f32 to vector<8x256xf32>
    %421 = arith.maximumf %419, %420 : vector<8x256xf32>
    %c0_246 = arith.constant 0 : index
    %c0_247 = arith.constant 0 : index
    %422 = vector.load %arg82[%c0_246, %c0_247] : memref<256x1xf32, #tpu.memory_space<vmem>>, vector<256x1xf32>
    %c0_248 = arith.constant 0 : index
    %c0_249 = arith.constant 0 : index
    %423 = vector.load %arg83[%c0_248, %c0_249] : memref<1x1xf32, #tpu.memory_space<vmem>>, vector<1x1xf32>
    %cst_250 = arith.constant dense<0.000000e+00> : vector<8x1xf32>
    %424 = tpu.matmul %421, %422, %cst_250 {dimension_numbers = #tpu.dot_dimension_numbers<[1], [0], [0], [1], [0, 0, 1, 1], [], []>} : vector<8x256xf32>, vector<256x1xf32>, vector<8x1xf32> -> vector<8x1xf32>
    %425 = vector.broadcast %423 : vector<1x1xf32> to vector<8x1xf32>
    %426 = arith.addf %424, %425 : vector<8x1xf32>
    %cst_251 = arith.constant 0.000000e+00 : f32
    %427 = vector.broadcast %cst_251 : f32 to vector<8x1xf32>
    %428 = arith.subf %427, %426 : vector<8x1xf32>
    %429 = math.exp %428 : vector<8x1xf32>
    %cst_252 = arith.constant 1.000000e+00 : f32
    %430 = vector.broadcast %cst_252 : f32 to vector<8x1xf32>
    %431 = arith.addf %430, %429 : vector<8x1xf32>
    %432 = tpu.reciprocal %431 {approx = true} : vector<8x1xf32> -> vector<8x1xf32>
    %433 = arith.addf %402, %432 : vector<8x1xf32>
    %cst_253 = arith.constant 9.000000e+00 : f32
    %434 = vector.broadcast %cst_253 : f32 to vector<8x1xf32>
    %435 = arith.divf %433, %434 : vector<8x1xf32>
    %cst_254 = arith.constant 0.000000e+00 : f32
    %436 = vector.broadcast %cst_254 : f32 to vector<8x1xf32>
    %437 = arith.subf %436, %435 : vector<8x1xf32>
    %438 = math.exp %437 : vector<8x1xf32>
    %cst_255 = arith.constant 1.000000e+00 : f32
    %439 = vector.broadcast %cst_255 : f32 to vector<8x1xf32>
    %440 = arith.addf %439, %438 : vector<8x1xf32>
    %441 = tpu.reciprocal %440 {approx = true} : vector<8x1xf32> -> vector<8x1xf32>
    %442 = vector.shape_cast %441 : vector<8x1xf32> to vector<8x1xf32>
    %443 = vector.broadcast %442 : vector<8x1xf32> to vector<8x128xf32>
    %c0_256 = arith.constant 0 : index
    %c0_257 = arith.constant 0 : index
    %444 = vector.load %arg84[%c0_256, %c0_257] : memref<8x128xf32, #tpu.memory_space<vmem>>, vector<8x128xf32>
    tpu.vector_store %arg84[%c0_256, %c0_257], %443 {strides = array<i32>} : memref<8x128xf32, #tpu.memory_space<vmem>>, vector<8x128xf32>,
    return
  }
  func.func @transform_0(%arg0: i32) -> (i32, i32) {
    %c0_i32 = arith.constant 0 : i32
    %c0_i32_0 = arith.constant 0 : i32
    return %arg0, %c0_i32 : i32, i32
  }
  func.func @transform_1(%arg0: i32) -> (i32, i32) {
    %c0_i32 = arith.constant 0 : i32
    %c0_i32_0 = arith.constant 0 : i32
    %c0_i32_1 = arith.constant 0 : i32
    return %c0_i32, %c0_i32_0 : i32, i32
  }
  func.func @transform_2(%arg0: i32) -> (i32, i32) {
    %c0_i32 = arith.constant 0 : i32
    %c0_i32_0 = arith.constant 0 : i32
    %c0_i32_1 = arith.constant 0 : i32
    return %c0_i32, %c0_i32_0 : i32, i32
  }
  func.func @transform_3(%arg0: i32) -> (i32, i32) {
    %c0_i32 = arith.constant 0 : i32
    %c0_i32_0 = arith.constant 0 : i32
    %c0_i32_1 = arith.constant 0 : i32
    return %c0_i32, %c0_i32_0 : i32, i32
  }
  func.func @transform_4(%arg0: i32) -> (i32, i32) {
    %c0_i32 = arith.constant 0 : i32
    %c0_i32_0 = arith.constant 0 : i32
    %c0_i32_1 = arith.constant 0 : i32
    return %c0_i32, %c0_i32_0 : i32, i32
  }
  func.func @transform_5(%arg0: i32) -> (i32, i32) {
    %c0_i32 = arith.constant 0 : i32
    %c0_i32_0 = arith.constant 0 : i32
    %c0_i32_1 = arith.constant 0 : i32
    return %c0_i32, %c0_i32_0 : i32, i32
  }
  func.func @transform_6(%arg0: i32) -> (i32, i32) {
    %c0_i32 = arith.constant 0 : i32
    %c0_i32_0 = arith.constant 0 : i32
    %c0_i32_1 = arith.constant 0 : i32
    return %c0_i32, %c0_i32_0 : i32, i32
  }
  func.func @transform_7(%arg0: i32) -> (i32, i32) {
    %c0_i32 = arith.constant 0 : i32
    %c0_i32_0 = arith.constant 0 : i32
    %c0_i32_1 = arith.constant 0 : i32
    return %c0_i32, %c0_i32_0 : i32, i32
  }
  func.func @transform_8(%arg0: i32) -> (i32, i32) {
    %c0_i32 = arith.constant 0 : i32
    %c0_i32_0 = arith.constant 0 : i32
    %c0_i32_1 = arith.constant 0 : i32
    return %c0_i32, %c0_i32_0 : i32, i32
  }
  func.func @transform_9(%arg0: i32) -> (i32, i32) {
    %c0_i32 = arith.constant 0 : i32
    %c0_i32_0 = arith.constant 0 : i32
    %c0_i32_1 = arith.constant 0 : i32
    return %c0_i32, %c0_i32_0 : i32, i32
  }
  func.func @transform_10(%arg0: i32) -> (i32, i32) {
    %c0_i32 = arith.constant 0 : i32
    %c0_i32_0 = arith.constant 0 : i32
    %c0_i32_1 = arith.constant 0 : i32
    return %c0_i32, %c0_i32_0 : i32, i32
  }
  func.func @transform_11(%arg0: i32) -> (i32, i32) {
    %c0_i32 = arith.constant 0 : i32
    %c0_i32_0 = arith.constant 0 : i32
    %c0_i32_1 = arith.constant 0 : i32
    return %c0_i32, %c0_i32_0 : i32, i32
  }
  func.func @transform_12(%arg0: i32) -> (i32, i32) {
    %c0_i32 = arith.constant 0 : i32
    %c0_i32_0 = arith.constant 0 : i32
    %c0_i32_1 = arith.constant 0 : i32
    return %c0_i32, %c0_i32_0 : i32, i32
  }
  func.func @transform_13(%arg0: i32) -> (i32, i32) {
    %c0_i32 = arith.constant 0 : i32
    %c0_i32_0 = arith.constant 0 : i32
    %c0_i32_1 = arith.constant 0 : i32
    return %c0_i32, %c0_i32_0 : i32, i32
  }
  func.func @transform_14(%arg0: i32) -> (i32, i32) {
    %c0_i32 = arith.constant 0 : i32
    %c0_i32_0 = arith.constant 0 : i32
    %c0_i32_1 = arith.constant 0 : i32
    return %c0_i32, %c0_i32_0 : i32, i32
  }
  func.func @transform_15(%arg0: i32) -> (i32, i32) {
    %c0_i32 = arith.constant 0 : i32
    %c0_i32_0 = arith.constant 0 : i32
    %c0_i32_1 = arith.constant 0 : i32
    return %c0_i32, %c0_i32_0 : i32, i32
  }
  func.func @transform_16(%arg0: i32) -> (i32, i32) {
    %c0_i32 = arith.constant 0 : i32
    %c0_i32_0 = arith.constant 0 : i32
    %c0_i32_1 = arith.constant 0 : i32
    return %c0_i32, %c0_i32_0 : i32, i32
  }
  func.func @transform_17(%arg0: i32) -> (i32, i32) {
    %c0_i32 = arith.constant 0 : i32
    %c0_i32_0 = arith.constant 0 : i32
    %c0_i32_1 = arith.constant 0 : i32
    return %c0_i32, %c0_i32_0 : i32, i32
  }
  func.func @transform_18(%arg0: i32) -> (i32, i32) {
    %c0_i32 = arith.constant 0 : i32
    %c0_i32_0 = arith.constant 0 : i32
    %c0_i32_1 = arith.constant 0 : i32
    return %c0_i32, %c0_i32_0 : i32, i32
  }
  func.func @transform_19(%arg0: i32) -> (i32, i32) {
    %c0_i32 = arith.constant 0 : i32
    %c0_i32_0 = arith.constant 0 : i32
    %c0_i32_1 = arith.constant 0 : i32
    return %c0_i32, %c0_i32_0 : i32, i32
  }
  func.func @transform_20(%arg0: i32) -> (i32, i32) {
    %c0_i32 = arith.constant 0 : i32
    %c0_i32_0 = arith.constant 0 : i32
    %c0_i32_1 = arith.constant 0 : i32
    return %c0_i32, %c0_i32_0 : i32, i32
  }
  func.func @transform_21(%arg0: i32) -> (i32, i32) {
    %c0_i32 = arith.constant 0 : i32
    %c0_i32_0 = arith.constant 0 : i32
    %c0_i32_1 = arith.constant 0 : i32
    return %c0_i32, %c0_i32_0 : i32, i32
  }
  func.func @transform_22(%arg0: i32) -> (i32, i32) {
    %c0_i32 = arith.constant 0 : i32
    %c0_i32_0 = arith.constant 0 : i32
    %c0_i32_1 = arith.constant 0 : i32
    return %c0_i32, %c0_i32_0 : i32, i32
  }
  func.func @transform_23(%arg0: i32) -> (i32, i32) {
    %c0_i32 = arith.constant 0 : i32
    %c0_i32_0 = arith.constant 0 : i32
    %c0_i32_1 = arith.constant 0 : i32
    return %c0_i32, %c0_i32_0 : i32, i32
  }
  func.func @transform_24(%arg0: i32) -> (i32, i32) {
    %c0_i32 = arith.constant 0 : i32
    %c0_i32_0 = arith.constant 0 : i32
    %c0_i32_1 = arith.constant 0 : i32
    return %c0_i32, %c0_i32_0 : i32, i32
  }
  func.func @transform_25(%arg0: i32) -> (i32, i32) {
    %c0_i32 = arith.constant 0 : i32
    %c0_i32_0 = arith.constant 0 : i32
    %c0_i32_1 = arith.constant 0 : i32
    return %c0_i32, %c0_i32_0 : i32, i32
  }
  func.func @transform_26(%arg0: i32) -> (i32, i32) {
    %c0_i32 = arith.constant 0 : i32
    %c0_i32_0 = arith.constant 0 : i32
    %c0_i32_1 = arith.constant 0 : i32
    return %c0_i32, %c0_i32_0 : i32, i32
  }
  func.func @transform_27(%arg0: i32) -> (i32, i32) {
    %c0_i32 = arith.constant 0 : i32
    %c0_i32_0 = arith.constant 0 : i32
    %c0_i32_1 = arith.constant 0 : i32
    return %c0_i32, %c0_i32_0 : i32, i32
  }
  func.func @transform_28(%arg0: i32) -> (i32, i32) {
    %c0_i32 = arith.constant 0 : i32
    %c0_i32_0 = arith.constant 0 : i32
    %c0_i32_1 = arith.constant 0 : i32
    return %c0_i32, %c0_i32_0 : i32, i32
  }
  func.func @transform_29(%arg0: i32) -> (i32, i32) {
    %c0_i32 = arith.constant 0 : i32
    %c0_i32_0 = arith.constant 0 : i32
    %c0_i32_1 = arith.constant 0 : i32
    return %c0_i32, %c0_i32_0 : i32, i32
  }
  func.func @transform_30(%arg0: i32) -> (i32, i32) {
    %c0_i32 = arith.constant 0 : i32
    %c0_i32_0 = arith.constant 0 : i32
    %c0_i32_1 = arith.constant 0 : i32
    return %c0_i32, %c0_i32_0 : i32, i32
  }
  func.func @transform_31(%arg0: i32) -> (i32, i32) {
    %c0_i32 = arith.constant 0 : i32
    %c0_i32_0 = arith.constant 0 : i32
    %c0_i32_1 = arith.constant 0 : i32
    return %c0_i32, %c0_i32_0 : i32, i32
  }
  func.func @transform_32(%arg0: i32) -> (i32, i32) {
    %c0_i32 = arith.constant 0 : i32
    %c0_i32_0 = arith.constant 0 : i32
    %c0_i32_1 = arith.constant 0 : i32
    return %c0_i32, %c0_i32_0 : i32, i32
  }
  func.func @transform_33(%arg0: i32) -> (i32, i32) {
    %c0_i32 = arith.constant 0 : i32
    %c0_i32_0 = arith.constant 0 : i32
    %c0_i32_1 = arith.constant 0 : i32
    return %c0_i32, %c0_i32_0 : i32, i32
  }
  func.func @transform_34(%arg0: i32) -> (i32, i32) {
    %c0_i32 = arith.constant 0 : i32
    %c0_i32_0 = arith.constant 0 : i32
    %c0_i32_1 = arith.constant 0 : i32
    return %c0_i32, %c0_i32_0 : i32, i32
  }
  func.func @transform_35(%arg0: i32) -> (i32, i32) {
    %c0_i32 = arith.constant 0 : i32
    %c0_i32_0 = arith.constant 0 : i32
    %c0_i32_1 = arith.constant 0 : i32
    return %c0_i32, %c0_i32_0 : i32, i32
  }
  func.func @transform_36(%arg0: i32) -> (i32, i32) {
    %c0_i32 = arith.constant 0 : i32
    %c0_i32_0 = arith.constant 0 : i32
    %c0_i32_1 = arith.constant 0 : i32
    return %c0_i32, %c0_i32_0 : i32, i32
  }
  func.func @transform_37(%arg0: i32) -> (i32, i32) {
    %c0_i32 = arith.constant 0 : i32
    %c0_i32_0 = arith.constant 0 : i32
    %c0_i32_1 = arith.constant 0 : i32
    return %c0_i32, %c0_i32_0 : i32, i32
  }
  func.func @transform_38(%arg0: i32) -> (i32, i32) {
    %c0_i32 = arith.constant 0 : i32
    %c0_i32_0 = arith.constant 0 : i32
    %c0_i32_1 = arith.constant 0 : i32
    return %c0_i32, %c0_i32_0 : i32, i32
  }
  func.func @transform_39(%arg0: i32) -> (i32, i32) {
    %c0_i32 = arith.constant 0 : i32
    %c0_i32_0 = arith.constant 0 : i32
    %c0_i32_1 = arith.constant 0 : i32
    return %c0_i32, %c0_i32_0 : i32, i32
  }
  func.func @transform_40(%arg0: i32) -> (i32, i32) {
    %c0_i32 = arith.constant 0 : i32
    %c0_i32_0 = arith.constant 0 : i32
    %c0_i32_1 = arith.constant 0 : i32
    return %c0_i32, %c0_i32_0 : i32, i32
  }
  func.func @transform_41(%arg0: i32) -> (i32, i32) {
    %c0_i32 = arith.constant 0 : i32
    %c0_i32_0 = arith.constant 0 : i32
    %c0_i32_1 = arith.constant 0 : i32
    return %c0_i32, %c0_i32_0 : i32, i32
  }
  func.func @transform_42(%arg0: i32) -> (i32, i32) {
    %c0_i32 = arith.constant 0 : i32
    %c0_i32_0 = arith.constant 0 : i32
    %c0_i32_1 = arith.constant 0 : i32
    return %c0_i32, %c0_i32_0 : i32, i32
  }
  func.func @transform_43(%arg0: i32) -> (i32, i32) {
    %c0_i32 = arith.constant 0 : i32
    %c0_i32_0 = arith.constant 0 : i32
    %c0_i32_1 = arith.constant 0 : i32
    return %c0_i32, %c0_i32_0 : i32, i32
  }
  func.func @transform_44(%arg0: i32) -> (i32, i32) {
    %c0_i32 = arith.constant 0 : i32
    %c0_i32_0 = arith.constant 0 : i32
    %c0_i32_1 = arith.constant 0 : i32
    return %c0_i32, %c0_i32_0 : i32, i32
  }
  func.func @transform_45(%arg0: i32) -> (i32, i32) {
    %c0_i32 = arith.constant 0 : i32
    %c0_i32_0 = arith.constant 0 : i32
    %c0_i32_1 = arith.constant 0 : i32
    return %c0_i32, %c0_i32_0 : i32, i32
  }
  func.func @transform_46(%arg0: i32) -> (i32, i32) {
    %c0_i32 = arith.constant 0 : i32
    %c0_i32_0 = arith.constant 0 : i32
    %c0_i32_1 = arith.constant 0 : i32
    return %c0_i32, %c0_i32_0 : i32, i32
  }
  func.func @transform_47(%arg0: i32) -> (i32, i32) {
    %c0_i32 = arith.constant 0 : i32
    %c0_i32_0 = arith.constant 0 : i32
    %c0_i32_1 = arith.constant 0 : i32
    return %c0_i32, %c0_i32_0 : i32, i32
  }
  func.func @transform_48(%arg0: i32) -> (i32, i32) {
    %c0_i32 = arith.constant 0 : i32
    %c0_i32_0 = arith.constant 0 : i32
    %c0_i32_1 = arith.constant 0 : i32
    return %c0_i32, %c0_i32_0 : i32, i32
  }
  func.func @transform_49(%arg0: i32) -> (i32, i32) {
    %c0_i32 = arith.constant 0 : i32
    %c0_i32_0 = arith.constant 0 : i32
    %c0_i32_1 = arith.constant 0 : i32
    return %c0_i32, %c0_i32_0 : i32, i32
  }
  func.func @transform_50(%arg0: i32) -> (i32, i32) {
    %c0_i32 = arith.constant 0 : i32
    %c0_i32_0 = arith.constant 0 : i32
    %c0_i32_1 = arith.constant 0 : i32
    return %c0_i32, %c0_i32_0 : i32, i32
  }
  func.func @transform_51(%arg0: i32) -> (i32, i32) {
    %c0_i32 = arith.constant 0 : i32
    %c0_i32_0 = arith.constant 0 : i32
    %c0_i32_1 = arith.constant 0 : i32
    return %c0_i32, %c0_i32_0 : i32, i32
  }
  func.func @transform_52(%arg0: i32) -> (i32, i32) {
    %c0_i32 = arith.constant 0 : i32
    %c0_i32_0 = arith.constant 0 : i32
    %c0_i32_1 = arith.constant 0 : i32
    return %c0_i32, %c0_i32_0 : i32, i32
  }
  func.func @transform_53(%arg0: i32) -> (i32, i32) {
    %c0_i32 = arith.constant 0 : i32
    %c0_i32_0 = arith.constant 0 : i32
    %c0_i32_1 = arith.constant 0 : i32
    return %c0_i32, %c0_i32_0 : i32, i32
  }
  func.func @transform_54(%arg0: i32) -> (i32, i32) {
    %c0_i32 = arith.constant 0 : i32
    %c0_i32_0 = arith.constant 0 : i32
    %c0_i32_1 = arith.constant 0 : i32
    return %c0_i32, %c0_i32_0 : i32, i32
  }
  func.func @transform_55(%arg0: i32) -> (i32, i32) {
    %c0_i32 = arith.constant 0 : i32
    %c0_i32_0 = arith.constant 0 : i32
    %c0_i32_1 = arith.constant 0 : i32
    return %c0_i32, %c0_i32_0 : i32, i32
  }
  func.func @transform_56(%arg0: i32) -> (i32, i32) {
    %c0_i32 = arith.constant 0 : i32
    %c0_i32_0 = arith.constant 0 : i32
    %c0_i32_1 = arith.constant 0 : i32
    return %c0_i32, %c0_i32_0 : i32, i32
  }
  func.func @transform_57(%arg0: i32) -> (i32, i32) {
    %c0_i32 = arith.constant 0 : i32
    %c0_i32_0 = arith.constant 0 : i32
    %c0_i32_1 = arith.constant 0 : i32
    return %c0_i32, %c0_i32_0 : i32, i32
  }
  func.func @transform_58(%arg0: i32) -> (i32, i32) {
    %c0_i32 = arith.constant 0 : i32
    %c0_i32_0 = arith.constant 0 : i32
    %c0_i32_1 = arith.constant 0 : i32
    return %c0_i32, %c0_i32_0 : i32, i32
  }
  func.func @transform_59(%arg0: i32) -> (i32, i32) {
    %c0_i32 = arith.constant 0 : i32
    %c0_i32_0 = arith.constant 0 : i32
    %c0_i32_1 = arith.constant 0 : i32
    return %c0_i32, %c0_i32_0 : i32, i32
  }
  func.func @transform_60(%arg0: i32) -> (i32, i32) {
    %c0_i32 = arith.constant 0 : i32
    %c0_i32_0 = arith.constant 0 : i32
    %c0_i32_1 = arith.constant 0 : i32
    return %c0_i32, %c0_i32_0 : i32, i32
  }
  func.func @transform_61(%arg0: i32) -> (i32, i32) {
    %c0_i32 = arith.constant 0 : i32
    %c0_i32_0 = arith.constant 0 : i32
    %c0_i32_1 = arith.constant 0 : i32
    return %c0_i32, %c0_i32_0 : i32, i32
  }
  func.func @transform_62(%arg0: i32) -> (i32, i32) {
    %c0_i32 = arith.constant 0 : i32
    %c0_i32_0 = arith.constant 0 : i32
    %c0_i32_1 = arith.constant 0 : i32
    return %c0_i32, %c0_i32_0 : i32, i32
  }
  func.func @transform_63(%arg0: i32) -> (i32, i32) {
    %c0_i32 = arith.constant 0 : i32
    %c0_i32_0 = arith.constant 0 : i32
    %c0_i32_1 = arith.constant 0 : i32
    return %c0_i32, %c0_i32_0 : i32, i32
  }
  func.func @transform_64(%arg0: i32) -> (i32, i32) {
    %c0_i32 = arith.constant 0 : i32
    %c0_i32_0 = arith.constant 0 : i32
    %c0_i32_1 = arith.constant 0 : i32
    return %c0_i32, %c0_i32_0 : i32, i32
  }
  func.func @transform_65(%arg0: i32) -> (i32, i32) {
    %c0_i32 = arith.constant 0 : i32
    %c0_i32_0 = arith.constant 0 : i32
    %c0_i32_1 = arith.constant 0 : i32
    return %c0_i32, %c0_i32_0 : i32, i32
  }
  func.func @transform_66(%arg0: i32) -> (i32, i32) {
    %c0_i32 = arith.constant 0 : i32
    %c0_i32_0 = arith.constant 0 : i32
    %c0_i32_1 = arith.constant 0 : i32
    return %c0_i32, %c0_i32_0 : i32, i32
  }
  func.func @transform_67(%arg0: i32) -> (i32, i32) {
    %c0_i32 = arith.constant 0 : i32
    %c0_i32_0 = arith.constant 0 : i32
    %c0_i32_1 = arith.constant 0 : i32
    return %c0_i32, %c0_i32_0 : i32, i32
  }
  func.func @transform_68(%arg0: i32) -> (i32, i32) {
    %c0_i32 = arith.constant 0 : i32
    %c0_i32_0 = arith.constant 0 : i32
    %c0_i32_1 = arith.constant 0 : i32
    return %c0_i32, %c0_i32_0 : i32, i32
  }
  func.func @transform_69(%arg0: i32) -> (i32, i32) {
    %c0_i32 = arith.constant 0 : i32
    %c0_i32_0 = arith.constant 0 : i32
    %c0_i32_1 = arith.constant 0 : i32
    return %c0_i32, %c0_i32_0 : i32, i32
  }
  func.func @transform_70(%arg0: i32) -> (i32, i32) {
    %c0_i32 = arith.constant 0 : i32
    %c0_i32_0 = arith.constant 0 : i32
    %c0_i32_1 = arith.constant 0 : i32
    return %c0_i32, %c0_i32_0 : i32, i32
  }
  func.func @transform_71(%arg0: i32) -> (i32, i32) {
    %c0_i32 = arith.constant 0 : i32
    %c0_i32_0 = arith.constant 0 : i32
    %c0_i32_1 = arith.constant 0 : i32
    return %c0_i32, %c0_i32_0 : i32, i32
  }
  func.func @transform_72(%arg0: i32) -> (i32, i32) {
    %c0_i32 = arith.constant 0 : i32
    %c0_i32_0 = arith.constant 0 : i32
    %c0_i32_1 = arith.constant 0 : i32
    return %c0_i32, %c0_i32_0 : i32, i32
  }
  func.func @transform_73(%arg0: i32) -> (i32, i32) {
    %c0_i32 = arith.constant 0 : i32
    %c0_i32_0 = arith.constant 0 : i32
    %c0_i32_1 = arith.constant 0 : i32
    return %c0_i32, %c0_i32_0 : i32, i32
  }
  func.func @transform_74(%arg0: i32) -> (i32, i32) {
    %c0_i32 = arith.constant 0 : i32
    %c0_i32_0 = arith.constant 0 : i32
    %c0_i32_1 = arith.constant 0 : i32
    return %c0_i32, %c0_i32_0 : i32, i32
  }
  func.func @transform_75(%arg0: i32) -> (i32, i32) {
    %c0_i32 = arith.constant 0 : i32
    %c0_i32_0 = arith.constant 0 : i32
    %c0_i32_1 = arith.constant 0 : i32
    return %c0_i32, %c0_i32_0 : i32, i32
  }
  func.func @transform_76(%arg0: i32) -> (i32, i32) {
    %c0_i32 = arith.constant 0 : i32
    %c0_i32_0 = arith.constant 0 : i32
    %c0_i32_1 = arith.constant 0 : i32
    return %c0_i32, %c0_i32_0 : i32, i32
  }
  func.func @transform_77(%arg0: i32) -> (i32, i32) {
    %c0_i32 = arith.constant 0 : i32
    %c0_i32_0 = arith.constant 0 : i32
    %c0_i32_1 = arith.constant 0 : i32
    return %c0_i32, %c0_i32_0 : i32, i32
  }
  func.func @transform_78(%arg0: i32) -> (i32, i32) {
    %c0_i32 = arith.constant 0 : i32
    %c0_i32_0 = arith.constant 0 : i32
    %c0_i32_1 = arith.constant 0 : i32
    return %c0_i32, %c0_i32_0 : i32, i32
  }
  func.func @transform_79(%arg0: i32) -> (i32, i32) {
    %c0_i32 = arith.constant 0 : i32
    %c0_i32_0 = arith.constant 0 : i32
    %c0_i32_1 = arith.constant 0 : i32
    return %c0_i32, %c0_i32_0 : i32, i32
  }
  func.func @transform_80(%arg0: i32) -> (i32, i32) {
    %c0_i32 = arith.constant 0 : i32
    %c0_i32_0 = arith.constant 0 : i32
    %c0_i32_1 = arith.constant 0 : i32
    return %c0_i32, %c0_i32_0 : i32, i32
  }
  func.func @transform_81(%arg0: i32) -> (i32, i32) {
    %c0_i32 = arith.constant 0 : i32
    %c0_i32_0 = arith.constant 0 : i32
    %c0_i32_1 = arith.constant 0 : i32
    return %c0_i32, %c0_i32_0 : i32, i32
  }
  func.func @transform_82(%arg0: i32) -> (i32, i32) {
    %c0_i32 = arith.constant 0 : i32
    %c0_i32_0 = arith.constant 0 : i32
    %c0_i32_1 = arith.constant 0 : i32
    return %c0_i32, %c0_i32_0 : i32, i32
  }
  func.func @transform_83(%arg0: i32) -> (i32, i32) {
    %c0_i32 = arith.constant 0 : i32
    %c0_i32_0 = arith.constant 0 : i32
    return %arg0, %c0_i32 : i32, i32
  }
}

</mosaic_0001>

<bundles_post_ra>
// kernel: tpu_custom_call.1
= control target key start
LH: loop header
LB: loop body
LE: loop exit
PB: predicated region body
PF: predicated region fallthrough
CT: control target
= control target key end

     0   :  { %s3101_s6 = smov 1   ;;  %s3102_s10 = smov 2   ;;  %s4272_s0 = inlined_call_operand.smem [shape: u32[84], index: -1, kind: input, shape index: {}] }
   0x1   :  { %s3207_s5 = sld [smem:[%s4272_s0]]   ;;  %s3103_s14 = smov 3  }
   0x2   :  { %s3212_s9 = sld [smem:[%s4272_s0 + %s3101_s6]]   ;;  %s3104_s18 = smov 4  }
   0x3   :  { %s3217_s13 = sld [smem:[%s4272_s0 + %s3102_s10]]   ;;  %s3105_s22 = smov 5  }
   0x4   :  { %s3222_s17 = sld [smem:[%s4272_s0 + %s3103_s14]]   ;;  %s3106_s26 = smov 6  }
   0x5   :  { %s3227_s21 = sld [smem:[%s4272_s0 + %s3104_s18]]   ;;  %s3107_s30 = smov 7  }
   0x6   :  { %s3232_s25 = sld [smem:[%s4272_s0 + %s3105_s22]]   ;;  %s3108_s4 = smov 8  }
   0x7   :  { %s3237_s29 = sld [smem:[%s4272_s0 + %s3106_s26]]   ;;  %s3109_s10 = smov 9  }
   0x8   :  { %s3242_s3 = sld [smem:[%s4272_s0 + %s3107_s30]]   ;;  %s3110_s15 = smov 10  }
   0x9   :  { %s3247_s8 = sld [smem:[%s4272_s0 + %s3108_s4]]   ;;  %s3111_s20 = smov 11  }
   0xa   :  { %4317 = sst [smem:[#allocation25_spill]] %s3222_s17  ;;  %s3112_s26 = smov 12  }
   0xb   :  { %s3252_s14 = sld [smem:[%s4272_s0 + %s3109_s10]]   ;;  %s3113_s1 = smov 13  }
   0xc   :  { %4318 = sst [smem:[#allocation26_spill]] %s3232_s25  ;;  %s3114_s7 = smov 14  }
   0xd   :  { %s3257_s19 = sld [smem:[%s4272_s0 + %s3110_s15]]   ;;  %s3115_s15 = smov 15  }
   0xe   :  { %4319 = sst [smem:[#allocation27_spill]] %s3242_s3  ;;  %s3116_s22 = smov 16  }
   0xf   :  { %4320 = sst [smem:[#allocation28_spill]] %s3247_s8  ;;  %s3117_s28 = smov 17  }
  0x10   :  { %s3262_s24 = sld [smem:[%s4272_s0 + %s3111_s20]]   ;;  %s3180_s18 = smov 57  }
  0x11   :  { %4321 = sst [smem:[#allocation29_spill]] %s3252_s14  ;;  %s3183_s25 = smov 82  }
  0x12   :  { %s3267_s30 = sld [smem:[%s4272_s0 + %s3112_s26]]  }
  0x13   :  { %s3272_s6 = sld [smem:[%s4272_s0 + %s3113_s1]]   ;;  %v172_v0 = vstv %s3257_s19  ;;  %s3146_s19 = smov 50  }
  0x14   :  { %s3277_s12 = sld [smem:[%s4272_s0 + %s3114_s7]]   ;;  %s3118_s7 = smov 18   ;;  %173 = vst [vmem:[#allocation2] sm:$0x1] %v172_v0 }
  0x15   :  { %s3282_s20 = sld [smem:[%s4272_s0 + %s3115_s15]]   ;;  %s3119_s15 = smov 19  }
  0x16   :  { %4322 = sst [smem:[#allocation30_spill]] %s3262_s24 }
  0x17   :  { %s3287_s27 = sld [smem:[%s4272_s0 + %s3116_s22]]   ;;  %s3120_s22 = smov 21  }
  0x18   :  { %4323 = sst [smem:[#allocation31_spill]] %s3267_s30 }
  0x19   :  { %4324 = sst [smem:[#allocation32_spill]] %s3272_s6 }
  0x1a   :  { %4325 = sst [smem:[#allocation33_spill]] %s3277_s12  ;;  %s3178_s12 = smov 41  }
  0x1b   :  { %4326 = sst [smem:[#allocation34_spill]] %s3282_s20 }
  0x1c   :  { %s3292_s4 = sld [smem:[%s4272_s0 + %s3117_s28]]   ;;  %s3121_s28 = smov 22  }
  0x1d   :  { %4327 = sst [smem:[#allocation35_spill]] %s3287_s27 }
  0x1e   :  { %s3297_s6 = sld [smem:[%s4272_s0 + %s3118_s7]]   ;;  %s3122_s7 = smov 23  }
  0x1f   :  { %s3302_s20 = sld [smem:[%s4272_s0 + %s3119_s15]]   ;;  %s3123_s15 = smov 24  }
  0x20   :  { %s3307_s27 = sld [smem:[%s4272_s0 + %s3120_s22]]   ;;  %s3124_s22 = smov 25  }
  0x21   :  { %s2664_s11 = sld [smem:[%s4272_s0 + %s3178_s12]]  }
  0x22   :  { %4328 = sst [smem:[#allocation36_spill]] %s3292_s4 }
  0x23   :  { %s3312_s4 = sld [smem:[%s4272_s0 + %s3121_s28]]   ;;  %s3125_s28 = smov 26  }
  0x24   :  { %4329 = sst [smem:[#allocation37_spill]] %s3297_s6 }
  0x25   :  { %4330 = sst [smem:[#allocation38_spill]] %s3302_s20 }
  0x26   :  { %4331 = sst [smem:[#allocation39_spill]] %s3307_s27 }
  0x27   :  { %s3317_s6 = sld [smem:[%s4272_s0 + %s3122_s7]]   ;;  %s3126_s7 = smov 27   ;;  %v178_v3 = vstv %s2664_s11 }
  0x28   :  { %s3322_s20 = sld [smem:[%s4272_s0 + %s3123_s15]]   ;;  %s3127_s15 = smov 28   ;;  %179 = vst [vmem:[#allocation5] sm:$0x1] %v178_v3 }
  0x29   :  { %4332 = sst [smem:[#allocation40_spill]] %s3312_s4 }
  0x2a   :  { %s3327_s27 = sld [smem:[%s4272_s0 + %s3124_s22]]   ;;  %s3128_s22 = smov 29  }
  0x2b   :  { %s3332_s4 = sld [smem:[%s4272_s0 + %s3125_s28]]   ;;  %s3129_s28 = smov 31  }
  0x2d   :  { %4333 = sst [smem:[#allocation41_spill]] %s3317_s6 }
  0x2e   :  { %4334 = sst [smem:[#allocation42_spill]] %s3322_s20 }
  0x2f   :  { %s3337_s6 = sld [smem:[%s4272_s0 + %s3126_s7]]   ;;  %s3130_s7 = smov 32  }
  0x30   :  { %4335 = sst [smem:[#allocation43_spill]] %s3327_s27 }
  0x31   :  { %4336 = sst [smem:[#allocation44_spill]] %s3332_s4 }
  0x32   :  { %s3342_s20 = sld [smem:[%s4272_s0 + %s3127_s15]]   ;;  %s3131_s15 = smov 33  }
  0x33   :  { %s3347_s27 = sld [smem:[%s4272_s0 + %s3128_s22]]   ;;  %s3132_s22 = smov 34  }
  0x34   :  { %s3352_s4 = sld [smem:[%s4272_s0 + %s3129_s28]]   ;;  %s3133_s28 = smov 35  }
  0x35   :  { %4337 = sst [smem:[#allocation45_spill]] %s3337_s6 }
  0x36   :  { %s3357_s6 = sld [smem:[%s4272_s0 + %s3130_s7]]   ;;  %s3134_s7 = smov 36  }
  0x38   :  { %4338 = sst [smem:[#allocation46_spill]] %s3342_s20 }
  0x39   :  { %4339 = sst [smem:[#allocation47_spill]] %s3347_s27 }
  0x3a   :  { %4340 = sst [smem:[#allocation48_spill]] %s3352_s4 }
  0x3b   :  { %s3362_s20 = sld [smem:[%s4272_s0 + %s3131_s15]]   ;;  %s3135_s15 = smov 37  }
  0x3c   :  { %4341 = sst [smem:[#allocation49_spill]] %s3357_s6 }
  0x3d   :  { %s3367_s27 = sld [smem:[%s4272_s0 + %s3132_s22]]   ;;  %s3136_s22 = smov 38  }
  0x3e   :  { %s3372_s4 = sld [smem:[%s4272_s0 + %s3133_s28]]   ;;  %s3137_s28 = smov 39  }
  0x3f   :  { %s3377_s6 = sld [smem:[%s4272_s0 + %s3134_s7]]   ;;  %s3138_s7 = smov 40  }
  0x40   :  { %s3382_s23 = sld [smem:[%s4272_s0 + %s3135_s15]]   ;;  %s3139_s15 = smov 42  }
  0x41   :  { %4342 = sst [smem:[#allocation50_spill]] %s3362_s20 }
  0x42   :  { %s3387_s1 = sld [smem:[%s4272_s0 + %s3136_s22]]  }
  0x43   :  { %4343 = sst [smem:[#allocation51_spill]] %s3367_s27  ;;  %s3140_s27 = smov 43  }
  0x44   :  { %4344 = sst [smem:[#allocation52_spill]] %s3372_s4  ;;  %s3141_s4 = smov 44  }
  0x45   :  { %4345 = sst [smem:[#allocation53_spill]] %s3377_s6  ;;  %s3142_s6 = smov 45  }
  0x46   :  { %4346 = sst [smem:[#allocation54_spill]] %s3382_s23  ;;  %s3143_s23 = smov 46  }
  0x47   :  { %s3392_s10 = sld [smem:[%s4272_s0 + %s3137_s28]]   ;;  %s3145_s28 = smov 48  }
  0x48   :  { %4347 = sst [smem:[#allocation55_spill]] %s3387_s1 }
  0x49   :  { %s3397_s16 = sld [smem:[%s4272_s0 + %s3138_s7]]  }
  0x4a   :  { %s3402_s20 = sld [smem:[%s4272_s0 + %s3139_s15]]  }
  0x4b   :  { %s3407_s1 = sld [smem:[%s4272_s0 + %s3140_s27]]   ;;  %s3144_s27 = smov 47  }
  0x4c   :  { %s3423_s22 = sld [smem:[%s4272_s0 + %s3143_s23]]   ;;  %s3147_s23 = smov 51  }
  0x4d   :  { %4348 = sst [smem:[#allocation56_spill]] %s3392_s10 }
  0x4e   :  { %s3412_s10 = sld [smem:[%s4272_s0 + %s3141_s4]]  }
  0x4f   :  { %4349 = sst [smem:[#allocation57_spill]] %s3397_s16 }
  0x50   :  { %4350 = sst [smem:[#allocation58_spill]] %s3402_s20 }
  0x51   :  { %4351 = sst [smem:[#allocation59_spill]] %s3407_s1  ;;  %s3148_s1 = smov 52  }
  0x52   :  { %s3417_s16 = sld [smem:[%s4272_s0 + %s3142_s6]]  }
  0x53   :  { %4354 = sst [smem:[#allocation62_spill]] %s3423_s22  ;;  %s3151_s22 = smov 55  }
  0x54   :  { %4352 = sst [smem:[#allocation60_spill]] %s3412_s10  ;;  %s3149_s10 = smov 53  }
  0x55   :  { %s3428_s4 = sld [smem:[%s4272_s0 + %s3144_s27]]   ;;  %s3181_s27 = smov 65  }
  0x56   :  { %s3433_s6 = sld [smem:[%s4272_s0 + %s3145_s28]]   ;;  %s3177_s28 = smov 30  }
  0x57   :  { %s3438_s15 = sld [smem:[%s4272_s0 + %s3146_s19]]   ;;  %s3150_s19 = smov 54  }
  0x58   :  { %4353 = sst [smem:[#allocation61_spill]] %s3417_s16 }
  0x59   :  { %s3443_s16 = sld [smem:[%s4272_s0 + %s3147_s23]]  }
  0x5a   :  { %s2705_s23 = sld [smem:[%s4272_s0 + %s3183_s25]]  }
  0x5b   :  { %4355 = sst [smem:[#allocation63_spill]] %s3428_s4 }
  0x5c   :  { %4356 = sst [smem:[#allocation64_spill]] %s3433_s6 }
  0x5d   :  { %4357 = sst [smem:[#allocation65_spill]] %s3438_s15 }
  0x5e   :  { %s3448_s4 = sld [smem:[%s4272_s0 + %s3148_s1]]   ;;  %s3152_s1 = smov 56  }
  0x5f   :  { %4358 = sst [smem:[#allocation66_spill]] %s3443_s16 }
  0x60   :  { %s3453_s6 = sld [smem:[%s4272_s0 + %s3149_s10]]   ;;  %s3153_s10 = smov 58   ;;  %v188_v8 = vstv %s2705_s23 }
  0x61   :  { %s3458_s15 = sld [smem:[%s4272_s0 + %s3150_s19]]   ;;  %s3154_s19 = smov 59   ;;  %189 = vst [vmem:[#allocation10] sm:$0x1] %v188_v8 }
  0x62   :  { %s3463_s16 = sld [smem:[%s4272_s0 + %s3151_s22]]   ;;  %s3155_s22 = smov 60  }
  0x63   :  { %s3468_s20 = sld [smem:[%s4272_s0 + %s3152_s1]]   ;;  %s3156_s1 = smov 61  }
  0x66   :  { %4359 = sst [smem:[#allocation67_spill]] %s3453_s6 }
  0x67   :  { %4360 = sst [smem:[#allocation68_spill]] %s3458_s15 }
  0x68   :  { %4361 = sst [smem:[#allocation69_spill]] %s3463_s16 }
  0x69   :  { %4362 = sst [smem:[#allocation70_spill]] %s3468_s20 }
  0x6a   :  { %s3473_s6 = sld [smem:[%s4272_s0 + %s3153_s10]]   ;;  %s3157_s10 = smov 62  }
  0x6b   :  { %s3478_s15 = sld [smem:[%s4272_s0 + %s3154_s19]]   ;;  %s3158_s19 = smov 63  }
  0x6c   :  { %s3483_s16 = sld [smem:[%s4272_s0 + %s3155_s22]]   ;;  %s3159_s22 = smov 64  }
  0x6d   :  { %s3488_s20 = sld [smem:[%s4272_s0 + %s3156_s1]]   ;;  %s3160_s1 = smov 66  }
  0x6e   :  { %s3498_s30 = sld [smem:[%s4272_s0 + %s3158_s19]]   ;;  %s3162_s19 = smov 68  }
  0x6f   :  { %s3503_s3 = sld [smem:[%s4272_s0 + %s3159_s22]]   ;;  %s3163_s22 = smov 69  }
  0x70   :  { %4363 = sst [smem:[#allocation71_spill]] %s3473_s6 }
  0x71   :  { %s3493_s6 = sld [smem:[%s4272_s0 + %s3157_s10]]   ;;  %s3161_s10 = smov 67  }
  0x73   :  { %4364 = sst [smem:[#allocation72_spill]] %s3488_s20 }
  0x74   :  { %4366 = sst [smem:[#allocation74_spill]] %s3498_s30 }
  0x75   :  { %4367 = sst [smem:[#allocation75_spill]] %s3503_s3 }
  0x76   :  { %s3508_s20 = sld [smem:[%s4272_s0 + %s3160_s1]]   ;;  %s3164_s1 = smov 70  }
  0x77   :  { %4365 = sst [smem:[#allocation73_spill]] %s3493_s6 }
  0x78   :  { %s3513_s6 = sld [smem:[%s4272_s0 + %s3161_s10]]   ;;  %s3165_s10 = smov 71  }
  0x79   :  { %s3518_s30 = sld [smem:[%s4272_s0 + %s3162_s19]]   ;;  %s3166_s19 = smov 72  }
  0x7a   :  { %s3523_s3 = sld [smem:[%s4272_s0 + %s3163_s22]]   ;;  %s3167_s22 = smov 74  }
  0x7b   :  { %s3533_s8 = sld [smem:[%s4272_s0 + %s3165_s10]]   ;;  %s3169_s10 = smov 76  }
  0x7c   :  { %4368 = sst [smem:[#allocation76_spill]] %s3508_s20 }
  0x7d   :  { %s3528_s20 = sld [smem:[%s4272_s0 + %s3164_s1]]   ;;  %s3168_s1 = smov 75  }
  0x7e   :  { %s3538_s14 = sld [smem:[%s4272_s0 + %s3166_s19]]   ;;  %s3170_s19 = smov 77  }
  0x80   :  { %4369 = sst [smem:[#allocation77_spill]] %s3523_s3 }
  0x81   :  { %4371 = sst [smem:[#allocation79_spill]] %s3533_s8 }
  0x82   :  { %s3543_s3 = sld [smem:[%s4272_s0 + %s3167_s22]]   ;;  %s3171_s22 = smov 78  }
  0x83   :  { %4370 = sst [smem:[#allocation78_spill]] %s3528_s20 }
  0x84   :  { %4372 = sst [smem:[#allocation80_spill]] %s3538_s14 }
  0x85   :  { %s3548_s20 = sld [smem:[%s4272_s0 + %s3168_s1]]   ;;  %s3172_s1 = smov 79  }
  0x86   :  { %s3553_s8 = sld [smem:[%s4272_s0 + %s3169_s10]]   ;;  %s3173_s10 = smov 80  }
  0x87   :  { %s3558_s14 = sld [smem:[%s4272_s0 + %s3170_s19]]   ;;  %s3174_s19 = smov 81  }
  0x88   :  { %4373 = sst [smem:[#allocation81_spill]] %s3543_s3 }
  0x89   :  { %s3563_s3 = sld [smem:[%s4272_s0 + %s3171_s22]]   ;;  %s3175_s22 = smov 83  }
  0x8b   :  { %4374 = sst [smem:[#allocation82_spill]] %s3548_s20 }
  0x8c   :  { %4375 = sst [smem:[#allocation83_spill]] %s3553_s8 }
  0x8d   :  { %4376 = sst [smem:[#allocation84_spill]] %s3558_s14 }
  0x8e   :  { %s3568_s20 = sld [smem:[%s4272_s0 + %s3172_s1]]   ;;  %s3176_s1 = smov 20  }
  0x8f   :  { %4377 = sst [smem:[#allocation85_spill]] %s3563_s3 }
  0x90   :  { %s3573_s8 = sld [smem:[%s4272_s0 + %s3173_s10]]   ;;  %s3182_s10 = smov 73  }
  0x91   :  { %s3578_s14 = sld [smem:[%s4272_s0 + %s3174_s19]]  }
  0x92   :  { %s3583_s3 = sld [smem:[%s4272_s0 + %s3175_s22]]  }
  0x93   :  { %s2696_s12 = sld [smem:[%s4272_s0 + %s3182_s10]]  }
  0x94   :  { %4378 = sst [smem:[#allocation86_spill]] %s3568_s20 }
  0x95   :  { %s2643_s20 = sld [smem:[%s4272_s0 + %s3176_s1]]  }
  0x96   :  { %4379 = sst [smem:[#allocation87_spill]] %s3573_s8 }
  0x97   :  { %4380 = sst [smem:[#allocation88_spill]] %s3578_s14  ;;  %s3179_s14 = smov 49  }
  0x98   :  { %4381 = sst [smem:[#allocation89_spill]] %s3583_s3 }
  0x99   :  { %s2653_s8 = sld [smem:[%s4272_s0 + %s3177_s28]]   ;;  %v186_v7 = vstv %s2696_s12 }
  0x9a   :  { %s2672_s22 = sld [smem:[%s4272_s0 + %s3179_s14]]   ;;  %187 = vst [vmem:[#allocation9] sm:$0x1] %v186_v7 }
  0x9b   :  { %s2680_s1 = sld [smem:[%s4272_s0 + %s3180_s18]]   ;;  %v174_v1 = vstv %s2643_s20 }
  0x9c   :  { %s2688_s28 = sld [smem:[%s4272_s0 + %s3181_s27]]   ;;  %175 = vst [vmem:[#allocation3] sm:$0x1] %v174_v1 }
  0x9f   :  { %v176_v2 = vstv %s2653_s8 }
  0xa0   :  { %177 = vst [vmem:[#allocation4] sm:$0x1] %v176_v2  ;;  %v180_v4 = vstv %s2672_s22 }
  0xa1   :  { %181 = vst [vmem:[#allocation6] sm:$0x1] %v180_v4  ;;  %v182_v5 = vstv %s2680_s1 }
  0xa2   :  { %183 = vst [vmem:[#allocation7] sm:$0x1] %v182_v5  ;;  %v184_v6 = vstv %s2688_s28 }
  0xa3   :  { %185 = vst [vmem:[#allocation8] sm:$0x1] %v184_v6 }
  0xa4   :  { %190 = vsyncpa [#allocation12], 0 }
  0xa5   :  { %191 = vsyncpa [#allocation15], 0 }
  0xa6   :  { %192 = vsyncpa [#allocation18], 0  ;;  %s326_s17 = sshll.u32 %s3478_s15, 4  ;;  %s327_s17 = int_to_ptr.hbm [resolvable:$true] %s326_s17 }
  0xa7   :  { %193 = vsyncpa [#allocation13], 0  ;;  %s3184_s0 = smov [#allocation14]   ;;  %s360_s8 = sshll.u32 %s3513_s6, 4  ;;  %s361_s8 = int_to_ptr.hbm [resolvable:$true] %s360_s8 }
  0xa8   :  { %s328_s3 = sshll.u32 %s3184_s0, 4  ;;  %s2949_s24 = sshra.s32 %s327_s17, 4  ;;  %s329_s3 = int_to_ptr.vmem [resolvable:$true] %s328_s3  ;;  %s2950_s24 = int_to_ptr.hbm [resolvable:$true] %s2949_s24 }
  0xa9   :  { %s2951_s20 = scalar_lea.hbm %s2950_s24, 1  ;;  %s2953_s11 = scalar_lea.hbm %s3478_s15, 1 }
  0xaa   :  { %p2952_p0 = scmp.ne.s32.totalorder %s2950_s24, %s2951_s20  ;;  %p2954_p1 = scmp.lt.s32.totalorder %s2950_s24, %s3478_s15 }
  0xab   :  { %p2955_p2 = scmp.lt.s32.totalorder %s2953_s11, %s2951_s20 }
  0xad   :  { %p2956_p3 = por %p2955_p2, %p2954_p1 }
  0xaf   :  { %p2957_p4 = pnand %p2956_p3, %p2952_p0 }
  0xb1   :  { %2960 = shalt.err (!%p2957_p4)
}
  0xb2   :  { %331 = dma.hbm_to_vmem [thread:$0]  %s327_s17, 16, %s329_s3, [#allocation15]  }
  0xb3   :  { %s3185_s22 = smov [#allocation17]   ;;  %s303_s1 = sshll.u32 %s3448_s4, 4  ;;  %s304_s1 = int_to_ptr.hbm [resolvable:$true] %s303_s1 }
  0xb4   :  { %s362_s18 = sshll.u32 %s3185_s22, 4  ;;  %s2973_s27 = sshra.s32 %s361_s8, 4  ;;  %s363_s18 = int_to_ptr.vmem [resolvable:$true] %s362_s18  ;;  %s2974_s27 = int_to_ptr.hbm [resolvable:$true] %s2973_s27 }
  0xb5   :  { %s2975_s26 = scalar_lea.hbm %s2974_s27, 1  ;;  %s2977_s28 = scalar_lea.hbm %s3513_s6, 1 }
  0xb6   :  { %p2976_p5 = scmp.ne.s32.totalorder %s2974_s27, %s2975_s26  ;;  %p2978_p6 = scmp.lt.s32.totalorder %s2974_s27, %s3513_s6 }
  0xb7   :  { %p2979_p7 = scmp.lt.s32.totalorder %s2977_s28, %s2975_s26 }
  0xb9   :  { %p2980_p8 = por %p2979_p7, %p2978_p6 }
  0xbb   :  { %p2981_p9 = pnand %p2980_p8, %p2976_p5 }
  0xbd   :  { %2984 = shalt.err (!%p2981_p9)
}
  0xbe   :  { %365 = dma.hbm_to_vmem [thread:$0]  %s361_s8, 16, %s363_s18, [#allocation18]  }
  0xbf   :  { %s337_s15 = sshll.u32 %s3483_s16, 4  ;;  %s3186_s10 = smov [#allocation11]   ;;  %s338_s15 = int_to_ptr.hbm [resolvable:$true] %s337_s15 }
  0xc0   :  { %s305_s2 = sshll.u32 %s3186_s10, 4  ;;  %s2997_s7 = sshra.s32 %s304_s1, 4  ;;  %s306_s2 = int_to_ptr.vmem [resolvable:$true] %s305_s2  ;;  %s2998_s7 = int_to_ptr.hbm [resolvable:$true] %s2997_s7 }
  0xc1   :  { %s2999_s12 = scalar_lea.hbm %s2998_s7, 1  ;;  %s3001_s25 = scalar_lea.hbm %s3448_s4, 1 }
  0xc2   :  { %p3000_p10 = scmp.ne.s32.totalorder %s2998_s7, %s2999_s12  ;;  %p3002_p11 = scmp.lt.s32.totalorder %s2998_s7, %s3448_s4 }
  0xc3   :  { %p3003_p12 = scmp.lt.s32.totalorder %s3001_s25, %s2999_s12 }
  0xc5   :  { %p3004_p13 = por %p3003_p12, %p3002_p11 }
  0xc7   :  { %p3005_p0 = pnand %p3004_p13, %p3000_p10 }
  0xc9   :  { %3008 = shalt.err (!%p3005_p0)
}
  0xca   :  { %308 = dma.hbm_to_vmem [thread:$0]  %s304_s1, 16, %s306_s2, [#allocation12]  }
  0xcb   :  { %s3187_s6 = smov [#allocation16]   ;;  %s371_s19 = sshll.u32 %s3518_s30, 4  ;;  %s372_s19 = int_to_ptr.hbm [resolvable:$true] %s371_s19 }
  0xcc   :  { %s339_s14 = sshll.u32 %s3187_s6, 4  ;;  %s3021_s23 = sshra.s32 %s338_s15, 4  ;;  %s340_s14 = int_to_ptr.vmem [resolvable:$true] %s339_s14  ;;  %s3022_s23 = int_to_ptr.hbm [resolvable:$true] %s3021_s23 }
  0xcd   :  { %s3023_s17 = scalar_lea.hbm %s3022_s23, 1  ;;  %s3025_s0 = scalar_lea.hbm %s3483_s16, 1 }
  0xce   :  { %p3024_p1 = scmp.ne.s32.totalorder %s3022_s23, %s3023_s17  ;;  %p3026_p2 = scmp.lt.s32.totalorder %s3022_s23, %s3483_s16 }
  0xcf   :  { %p3027_p3 = scmp.lt.s32.totalorder %s3025_s0, %s3023_s17 }
  0xd1   :  { %p3028_p4 = por %p3027_p3, %p3026_p2 }
  0xd3   :  { %p3029_p5 = pnand %p3028_p4, %p3024_p1 }
  0xd5   :  { %3032 = shalt.err (!%p3029_p5)
}
  0xd6   :  { %342 = dma.hbm_to_vmem [thread:$0]  %s338_s15, 16, %s340_s14, [#allocation15]  }
  0xd7   :  { %s3188_s4 = smov [#allocation19]   ;;  %s3045_s8 = sshra.s32 %s372_s19, 4  ;;  %s3046_s8 = int_to_ptr.hbm [resolvable:$true] %s3045_s8 }
  0xd8   :  { %s373_s3 = sshll.u32 %s3188_s4, 4  ;;  %s3047_s24 = scalar_lea.hbm %s3046_s8, 1  ;;  %s374_s3 = int_to_ptr.vmem [resolvable:$true] %s373_s3 }
  0xd9   :  { %p3048_p6 = scmp.ne.s32.totalorder %s3046_s8, %s3047_s24  ;;  %s3049_s20 = scalar_lea.hbm %s3518_s30, 1 }
  0xda   :  { %p3050_p7 = scmp.lt.s32.totalorder %s3046_s8, %s3518_s30  ;;  %p3051_p8 = scmp.lt.s32.totalorder %s3049_s20, %s3047_s24 }
  0xdc   :  { %p3052_p9 = por %p3051_p8, %p3050_p7 }
  0xde   :  { %p3053_p10 = pnand %p3052_p9, %p3048_p6 }
  0xe0   :  { %3056 = shalt.err (!%p3053_p10)
}
  0xe1   :  { %376 = dma.hbm_to_vmem [thread:$0]  %s372_s19, 16, %s374_s3, [#allocation18]  }
  0xe2   :  { %3093 = dma.done.wait [#allocation12], 16  }
  0xe3   :  { %3094 = vsyncadd [#allocation12], 4294967280 }
  0xe4   :  { %3095 = dma.done.wait [#allocation15], 32  }
  0xe5   :  { %3096 = vsyncadd [#allocation15], 4294967264 }
  0xe6   :  { %3097 = dma.done.wait [#allocation18], 32  }
  0xe7   :  { %3098 = vsyncadd [#allocation18], 4294967264  ;;  %v3189_v9 = vmov 0   ;;  %v3190_v10 = vmov 2   ;;  %v3191_v11 = vmov 4   ;;  %v425_v12 = vld [vmem:[%s3207_s5] sm:$0xff]  ;;  %v426_v35 = vlaneseq }
  0xe8   :  { %2873 = vset.pattern.permute.xlu0 %v3189_v9  ;;  %2875 = vset.pattern.permute.xlu1 %v3190_v10  ;;  %v443_v13 = vadd.s32 20, %v425_v12  ;;  %v435_v14 = vadd.s32 10, %v425_v12  ;;  %v451_v15 = vadd.s32 30, %v425_v12  ;;  %v459_v16 = vadd.s32 40, %v425_v12  ;;  %v491_v23 = vld [vmem:[%s3212_s9 + $0x40] sm:$0x3f] }
  0xe9   :  { %2877 = vset.pattern.permute.xlu2 %v3191_v11  ;;  %429 = vperm.xlu0 %2873, %v425_v12   ;;  %v3192_v17 = vmov 1   ;;  %v467_v18 = vadd.s32 50, %v425_v12  ;;  %v3193_v19 = vmov 3   ;;  %v3194_v20 = vmov 5   ;;  %v490_v24 = vld [vmem:[%s3212_s9 + $0x38] sm:$0xff]  ;;  %v489_v25 = vld [vmem:[%s3212_s9 + $0x30] sm:$0xff] }
  0xea   :  { %445 = vperm.xlu1 %2875, %v443_v13   ;;  %461 = vperm.xlu2 %2877, %v459_v16   ;;  %v475_v21 = vadd.s32 60, %v425_v12  ;;  %v3195_v22 = vmov 6   ;;  %vm496_vm0 = vcmask 1045504   ;;  %v488_v26 = vld [vmem:[%s3212_s9 + $0x28] sm:$0xff]  ;;  %v487_v27 = vld [vmem:[%s3212_s9 + $0x20] sm:$0xff]  ;;  %v486_v28 = vld [vmem:[%s3212_s9 + $0x18] sm:$0xff] }
  0xeb   :  { %2714 = vmatpush.msk.msra.mxu0 %vm496_vm0, %v491_v23  ;;  %v485_v29 = vld [vmem:[%s3212_s9 + $0x10] sm:$0xff]  ;;  %v484_v30 = vld [vmem:[%s3212_s9 + $0x8] sm:$0xff]  ;;  %v483_v31 = vld [vmem:[%s3212_s9] sm:$0xff]  ;;  %v427_v39 = vand.u32 127, %v426_v35  ;;  %v3196_v41 = vmov 0.0   ;;  %vm492_vm8 = vcmask 572416  }
  0xec   :  { %v544_v32 = vld [vmem:[%s3227_s21 + $0x18] sm:$0xff]  ;;  %v543_v33 = vld [vmem:[%s3227_s21 + $0x10] sm:$0xff]  ;;  %v542_v34 = vld [vmem:[%s3227_s21 + $0x8] sm:$0xff]  ;;  %s4382_s5 = sld [smem:[#allocation30_spill]]  ;;  %vm524_vm9 = vcmask 261120   ;;  %vm612_vm10 = vcmask 130048  }
  0xed   :  { %508 = vmatpush.msra.mxu0 %v490_v24  ;;  %564 = vmatpush.msra.mxu1 %v544_v32  ;;  %v541_v58 = vld [vmem:[%s3227_s21] sm:$0xff]  ;;  %v576_v59 = vld [vmem:[%s3237_s29 + $0x18] sm:$0xff]  ;;  %v575_v60 = vld [vmem:[%s3237_s29 + $0x10] sm:$0xff]  ;;  %s4383_s9 = sld [smem:[#allocation25_spill]]  ;;  %vm705_vm11 = vcmask 326656   ;;  %vm887_vm12 = vcmask 392192  }
  0xee   :  { %v574_v61 = vld [vmem:[%s3237_s29 + $0x8] sm:$0xff]  ;;  %v520_v62 = vld [vmem:[%s3217_s13] sm:$0x3]  ;;  %s4384_s13 = sld [smem:[#allocation26_spill]]  ;;  %vm1174_vm13 = vcmask 1046528   ;;  %vm1138_vm14 = vcmask 982016  }
  0xef   :  { %509 = vmatpush.msra.mxu0 %v489_v25  ;;  %565 = vmatpush.msra.mxu1 %v543_v33  ;;  %v522_v63 = vperm.slane %v520_v62, 0  ;;  %v573_v3 = vld [vmem:[%s3237_s29] sm:$0xff]  ;;  %s4385_s21 = sld [smem:[#allocation33_spill]]  ;;  %vm1170_vm15 = vcmask 121856  }
  0xf0   :  { %s4386_s29 = sld [smem:[#allocation29_spill]] }
  0xf1   :  { %2874 = vset.pattern.permute.xlu0 %v3192_v17  ;;  %510 = vmatpush.msra.mxu0 %v488_v26  ;;  %s4387_s30 = sld [smem:[#allocation28_spill]] }
  0xf2   :  { %437 = vperm.xlu0 %2874, %v435_v14   ;;  %2876 = vset.pattern.permute.xlu1 %v3193_v19  ;;  %v677_v4 = vld [vmem:[%s4382_s5 + $0x40] sm:$0x3f]  ;;  %v676_v5 = vld [vmem:[%s4382_s5 + $0x38] sm:$0xff]  ;;  %v675_v6 = vld [vmem:[%s4382_s5 + $0x30] sm:$0xff]  ;;  %s4388_s16 = sld [smem:[#allocation27_spill]] }
  0xf3   :  { %453 = vperm.xlu1 %2876, %v451_v15   ;;  %2878 = vset.pattern.permute.xlu2 %v3194_v20  ;;  %v674_v7 = vld [vmem:[%s4382_s5 + $0x28] sm:$0xff]  ;;  %v673_v8 = vld [vmem:[%s4382_s5 + $0x20] sm:$0xff]  ;;  %v671_v10 = vld [vmem:[%s4382_s5 + $0x10] sm:$0xff]  ;;  %s4389_s11 = sld [smem:[#allocation31_spill]] }
  0xf4   :  { %469 = vperm.xlu2 %2878, %v467_v18   ;;  %511 = vmatpush.msra.mxu0 %v487_v27  ;;  %v670_v11 = vld [vmem:[%s4382_s5 + $0x8] sm:$0xff]  ;;  %v669_v12 = vld [vmem:[%s4382_s5] sm:$0xff]  ;;  %v532_v18 = vperm.slane %v520_v62, 1  ;;  %s4390_s22 = sld [smem:[#allocation35_spill]] }
  0xf5   :  { %566 = vmatpush.msra.mxu1 %v542_v34  ;;  %v521_v13 = vld [vmem:[%s4383_s9] sm:$0x3]  ;;  %v723_v32 = vld [vmem:[%s4385_s21 + $0x8] sm:$0xff]  ;;  %s4391_s18 = sld [smem:[#allocation39_spill]] }
  0xf6   :  { %512 = vmatpush.msra.mxu0 %v486_v28  ;;  %v529_v14 = vperm.slane %v521_v13, 0  ;;  %v2882_v19 = vld [vmem:[%s4384_s13] ss:$0 sm:$0xff]  ;;  %v610_v27 = vld [vmem:[%s4386_s29 + $0x8] sm:$0xff]  ;;  %v725_v28 = vld [vmem:[%s4385_s21 + $0x18] sm:$0xff]  ;;  %s4392_s1 = sld [smem:[#allocation32_spill]] }
  0xf7   :  { %567 = vmatpush.msra.mxu1 %v541_v58  ;;  %v726_v26 = vld [vmem:[%s4385_s21 + $0x20] sm:$0xff]  ;;  %630 = vmatpush.msra.mxu3 %v610_v27  ;;  %v607_v33 = vld [vmem:[%s4387_s30 + $0x10] sm:$0xff]  ;;  %v606_v35 = vld [vmem:[%s4387_s30 + $0x8] sm:$0xff]  ;;  %s4393_s27 = sld [smem:[#allocation37_spill]] }
  0xf8   :  { %513 = vmatpush.msra.mxu0 %v485_v29  ;;  %745 = vmatpush.msra.mxu2 %v726_v26  ;;  %v609_v29 = vld [vmem:[%s4386_s29] sm:$0xff]  ;;  %s4394_s26 = sld [smem:[#allocation34_spill]] }
  0xf9   :  { %596 = vmatpush.msrb.mxu1 %v576_v59  ;;  %631 = vmatpush.msra.mxu3 %v609_v29  ;;  %v722_v34 = vld [vmem:[%s4385_s21] sm:$0xff]  ;;  %s4395_s28 = sld [smem:[#allocation38_spill]] }
  0xfa   :  { %2881 = vset.pattern.permute.xlu0 %v3189_v9  ;;  %514 = vmatpush.msra.mxu0 %v484_v30  ;;  %v724_v30 = vld [vmem:[%s4385_s21 + $0x10] sm:$0xff]  ;;  %s4396_s15 = sld [smem:[#allocation42_spill]] }
  0xfb   :  { %2879 = vset.pattern.permute.xlu1 %v3195_v22  ;;  %597 = vmatpush.msrb.mxu1 %v575_v60  ;;  %v857_v58 = vld [vmem:[%s4391_s18 + $0x30] sm:$0xff]  ;;  %v856_v59 = vld [vmem:[%s4391_s18 + $0x28] sm:$0xff]  ;;  %v855_v60 = vld [vmem:[%s4391_s18 + $0x20] sm:$0xff]  ;;  %s4397_s10 = sld [smem:[#allocation36_spill]] }
  0xfc   :  { %477 = vperm.xlu1 %2879, %v475_v21   ;;  %2880 = vset.pattern.permute.xlu2 %v3189_v9  ;;  %v672_v9 = vld [vmem:[%s4382_s5 + $0x18] sm:$0xff]  ;;  %v853_v62 = vld [vmem:[%s4391_s18 + $0x10] sm:$0xff]  ;;  %s4398_s2 = sld [smem:[#allocation40_spill]] }
  0xfd   :  { %515 = vmatpush.msra.mxu0 %v483_v31  ;;  %598 = vmatpush.msrb.mxu1 %v574_v61  ;;  %v608_v31 = vld [vmem:[%s4387_s30 + $0x18] sm:$0xff]  ;;  %s4399_s7 = sld [smem:[#allocation44_spill]] }
  0xfe   :  { %746 = vmatpush.msra.mxu2 %v725_v28  ;;  %651 = vmatpush.msrb.mxu3 %v608_v31  ;;  %v854_v61 = vld [vmem:[%s4391_s18 + $0x18] sm:$0xff]  ;;  %s4400_s12 = sld [smem:[#allocation41_spill]] }
  0xff   :  { %599 = vmatpush.msrb.mxu1 %v573_v3  ;;  %s4401_s25 = sld [smem:[#allocation46_spill]] }
 0x100   :  { %747 = vmatpush.msra.mxu2 %v724_v30  ;;  %652 = vmatpush.msrb.mxu3 %v607_v33  ;;  %v905_v27 = vld [vmem:[%s4396_s15 + $0x8] sm:$0xff]  ;;  %v904_v29 = vld [vmem:[%s4396_s15] sm:$0xff]  ;;  %s4402_s6 = sld [smem:[#allocation43_spill]] }
 0x101   :  { %s4403_s14 = sld [smem:[#allocation47_spill]] }
 0x102   :  { %748 = vmatpush.msra.mxu2 %v723_v32  ;;  %653 = vmatpush.msrb.mxu3 %v606_v35  ;;  %s4404_s19 = sld [smem:[#allocation48_spill]] }
 0x103   :  { %s4405_s23 = sld [smem:[#allocation45_spill]] }
 0x104   :  { %749 = vmatpush.msra.mxu2 %v722_v34  ;;  %v2886_v34 = vld [vmem:[%s4397_s10] ss:$0 sm:$0xff]  ;;  %s4406_s17 = sld [smem:[#allocation50_spill]] }
 0x105   :  { %s4407_s0 = sld [smem:[#allocation49_spill]] }
 0x106   :  { %s4408_s4 = sld [smem:[#allocation52_spill]] }
 0x107   :  { %s4409_s3 = sld [smem:[#allocation51_spill]] }
 0x108   :  { %s4410_s8 = sld [smem:[#allocation53_spill]] }
 0x109   :  { %s4411_s24 = sld [smem:[#allocation55_spill]] }
 0x10a   :  { %s4412_s20 = sld [smem:[#allocation58_spill]] }
 0x10b   :  { %s4413_s5 = sld [smem:[#allocation54_spill]] }
 0x10c   :  { %s4414_s9 = sld [smem:[#allocation65_spill]] }
 0x10d   :  { %s4415_s13 = sld [smem:[#allocation57_spill]] }
 0x10e   :  { %s4416_s21 = sld [smem:[#allocation61_spill]] }
 0x10f   :  { %s4417_s29 = sld [smem:[#allocation64_spill]] }
 0x110   :  { %s4428_s10 = sld [smem:[#allocation68_spill]] }
 0x144   :  { %v462_v37 = vpop.permute.xlu2 %461 }
 0x145   :  { %vm463_vm5 = vcmp.eq.s32.totalorder %v427_v39, %v462_v37  ;;  %v2883_v37 = vld [vmem:[%s4388_s16] ss:$0 sm:$0xff]  ;;  %s4419_s16 = sld [smem:[#allocation56_spill]] }
 0x146   :  { %v2711_v51 = vsel %vm463_vm5, 1.0, %v3196_v41 }
 0x14e   :  { %v470_v45 = vpop.permute.xlu2 %469 }
 0x14f   :  { %vm471_vm6 = vcmp.eq.s32.totalorder %v427_v39, %v470_v45 }
 0x150   :  { %v2712_v52 = vsel %vm471_vm6, 1.0, %v3196_v41 }
 0x15b   :  { %v430_v36 = vpop.permute.xlu0 %429 }
 0x15c   :  { %v446_v38 = vpop.permute.xlu1 %445  ;;  %vm431_vm1 = vcmp.eq.s32.totalorder %v427_v39, %v430_v36  ;;  %v605_v36 = vld [vmem:[%s4387_s30] sm:$0xff]  ;;  %s4418_s30 = sld [smem:[#allocation63_spill]] }
 0x15d   :  { %vm447_vm2 = vcmp.eq.s32.totalorder %v427_v39, %v446_v38  ;;  %v2707_v42 = vsel %vm431_vm1, 1.0, %v3196_v41  ;;  %654 = vmatpush.msrb.mxu3 %v605_v36  ;;  %vm2407_vm1 = vcmask 1044480  }
 0x15e   :  { %v2709_v47 = vsel %vm447_vm2, 1.0, %v3196_v41  ;;  %vm2403_vm2 = vcmask 171008  }
 0x164   :  { %v438_v40 = vpop.permute.xlu0 %437 }
 0x165   :  { %vm439_vm3 = vcmp.eq.s32.totalorder %v427_v39, %v438_v40  ;;  %v454_v44 = vpop.permute.xlu1 %453 }
 0x166   :  { %v2708_v43 = vsel %vm439_vm3, 1.0, %v3196_v41  ;;  %vm455_vm4 = vcmp.eq.s32.totalorder %v427_v39, %v454_v44 }
 0x167   :  { %v442_v46 = vadd.f32 %v2708_v43, %v2707_v42  ;;  %v2710_v49 = vsel %vm455_vm4, 1.0, %v3196_v41  ;;  %v538_v42 = vperm.slane %v521_v13, 1 }
 0x169   :  { %v450_v48 = vadd.f32 %v2709_v47, %v442_v46 }
 0x16b   :  { %v458_v50 = vadd.f32 %v2710_v49, %v450_v48 }
 0x16d   :  { %v466_v53 = vadd.f32 %v2711_v51, %v458_v50  ;;  %v758_v51 = vld [vmem:[%s4390_s22 + $0x18] sm:$0xff] }
 0x16e   :  { %v478_v55 = vpop.permute.xlu1 %477 }
 0x16f   :  { %v474_v54 = vadd.f32 %v2712_v52, %v466_v53  ;;  %vm479_vm7 = vcmp.eq.s32.totalorder %v427_v39, %v478_v55  ;;  %v757_v52 = vld [vmem:[%s4390_s22 + $0x10] sm:$0xff]  ;;  %v756_v53 = vld [vmem:[%s4390_s22 + $0x8] sm:$0xff]  ;;  %v859_v55 = vld [vmem:[%s4391_s18 + $0x40] sm:$0x3f] }
 0x170   :  { %v2713_v56 = vsel %vm479_vm7, 1.0, %v3196_v41  ;;  %v701_v41 = vld [vmem:[%s4389_s11] sm:$0x3]  ;;  %s4420_s11 = sld [smem:[#allocation59_spill]] }
 0x171   :  { %v3638_v57 = vadd.f32 %v2713_v56, %v474_v54  ;;  %v703_v45 = vperm.slane %v701_v41, 0  ;;  %v755_v54 = vld [vmem:[%s4390_s22] sm:$0xff]  ;;  %v858_v56 = vld [vmem:[%s4391_s18 + $0x38] sm:$0xff]  ;;  %s4421_s22 = sld [smem:[#allocation66_spill]] }
 0x173   :  { %2715 = vmatmul.msk.f32.vlgmr.msra.gmra.mxu0 %vm492_vm8, %v3638_v57 }
 0x1f0   :  { %v3647_v0 = vpop.f32.mrf.mxu0 }
 0x1f1   :  { %2716 = vmatmul.msk.f32.vlgmr.msra.gmra.mxu1 %vm524_vm9, %v3647_v0  ;;  %v523_v1 = vmul.f32 %v522_v63, %v3647_v0  ;;  %v852_v63 = vld [vmem:[%s4391_s18 + $0x8] sm:$0xff] }
 0x1f2   :  { %2720 = vmatpush.msk.msra.mxu1 %vm496_vm0, %v677_v4 }
 0x1f3   :  { %v525_v2 = vsel %vm524_vm9, %v523_v1, 0.0  ;;  %v702_v1 = vld [vmem:[%s4392_s1] sm:$0x3]  ;;  %s4423_s1 = sld [smem:[#allocation60_spill]] }
 0x1f4   :  { %526 = vadd.xlane.f32.xlu2 %v525_v2  ;;  %689 = vmatpush.msra.mxu1 %v676_v5  ;;  %v710_v2 = vperm.slane %v702_v1, 0 }
 0x1f6   :  { %690 = vmatpush.msra.mxu1 %v675_v6  ;;  %v713_v6 = vperm.slane %v701_v41, 1 }
 0x1f8   :  { %691 = vmatpush.msra.mxu1 %v674_v7  ;;  %v791_v7 = vld [vmem:[%s4393_s27 + $0x20] sm:$0xff] }
 0x1f9   :  { %832 = vmatpush.msrb.mxu2 %v791_v7 }
 0x1fa   :  { %692 = vmatpush.msra.mxu1 %v673_v8  ;;  %v790_v8 = vld [vmem:[%s4393_s27 + $0x18] sm:$0xff] }
 0x1fb   :  { %833 = vmatpush.msrb.mxu2 %v790_v8 }
 0x1fc   :  { %693 = vmatpush.msra.mxu1 %v672_v9 }
 0x1fe   :  { %694 = vmatpush.msra.mxu1 %v671_v10 }
 0x200   :  { %695 = vmatpush.msra.mxu1 %v670_v11 }
 0x202   :  { %696 = vmatpush.msra.mxu1 %v669_v12  ;;  %v2884_v12 = vld [vmem:[%s4394_s26] ss:$0 sm:$0xff]  ;;  %s4425_s26 = sld [smem:[#allocation62_spill]] }
 0x267   :  { %v527_v15 = vpop.xlane.xlu2 %526 }
 0x268   :  { %v528_v16 = vmul.f32 %v527_v15, %v3647_v0 }
 0x26a   :  { %v530_v17 = vadd.f32 %v529_v14, %v528_v16  ;;  %v789_v16 = vld [vmem:[%s4393_s27 + $0x10] sm:$0xff] }
 0x26b   :  { %834 = vmatpush.msrb.mxu2 %v789_v16 }
 0x26c   :  { %v531_v20 = vadd.f32 %v530_v17, %v3647_v0  ;;  %v788_v17 = vld [vmem:[%s4393_s27 + $0x8] sm:$0xff] }
 0x26d   :  { %835 = vmatpush.msrb.mxu2 %v788_v17 }
 0x26e   :  { %v569_v21 = vpop.f32.mrf.mxu1  ;;  %v533_v22 = vmul.f32 %v532_v18, %v531_v20  ;;  %v787_v18 = vld [vmem:[%s4393_s27] sm:$0xff]  ;;  %s4424_s27 = sld [smem:[#allocation70_spill]] }
 0x26f   :  { %v570_v23 = vadd.f32 %v2882_v19, %v569_v21  ;;  %836 = vmatpush.msrb.mxu2 %v787_v18  ;;  %v793_v19 = vld [vmem:[%s4395_s28 + $0x8] sm:$0xff] }
 0x270   :  { %v534_v24 = vsel %vm524_vm9, %v533_v22, 0.0  ;;  %812 = vmatpush.msrb.mxu0 %v793_v19  ;;  %v909_v21 = vld [vmem:[%s4396_s15 + $0x28] sm:$0xff]  ;;  %v908_v22 = vld [vmem:[%s4396_s15 + $0x20] sm:$0xff]  ;;  %v972_v19 = vld [vmem:[%s4401_s25 + $0x10] sm:$0xff] }
 0x271   :  { %v572_v25 = vmax.f32 %v570_v23, 0.0  ;;  %535 = vadd.xlane.f32.xlu0 %v534_v24  ;;  %v907_v23 = vld [vmem:[%s4396_s15 + $0x18] sm:$0xff]  ;;  %v719_v24 = vperm.slane %v702_v1, 1 }
 0x273   :  { %2717 = vmatmul.msk.f32.vlgmr.msrb.gmra.mxu1 %vm524_vm9, %v572_v25  ;;  %v906_v25 = vld [vmem:[%s4396_s15 + $0x10] sm:$0xff]  ;;  %s4427_s15 = sld [smem:[#allocation71_spill]] }
 0x27b   :  { %2721 = vmatmul.msk.f32.vlgmr.msra.gmra.mxu1 %vm492_vm8, %v3638_v57 }
 0x2e4   :  { %v536_v38 = vpop.xlane.xlu0 %535 }
 0x2e5   :  { %v537_v43 = vmul.f32 %v536_v38, %v3647_v0  ;;  %v851_v0 = vld [vmem:[%s4391_s18] sm:$0xff]  ;;  %s4422_s18 = sld [smem:[#allocation67_spill]] }
 0x2e7   :  { %v539_v46 = vadd.f32 %v538_v42, %v537_v43  ;;  %v941_v43 = vld [vmem:[%s4399_s7 + $0x18] sm:$0xff] }
 0x2e8   :  { %961 = vmatpush.msrb.mxu1 %v941_v43  ;;  %v1101_v43 = vld [vmem:[%s4406_s17 + $0x28] sm:$0xff] }
 0x2e9   :  { %v540_v49 = vadd.f32 %v539_v46, %v531_v20  ;;  %v792_v20 = vld [vmem:[%s4395_s28] sm:$0xff]  ;;  %s4426_s28 = sld [smem:[#allocation69_spill]] }
 0x2ea   :  { %813 = vmatpush.msrb.mxu0 %v792_v20  ;;  %v938_v46 = vld [vmem:[%s4399_s7] sm:$0xff]  ;;  %v971_v20 = vld [vmem:[%s4401_s25 + $0x8] sm:$0xff] }
 0x2ec   :  { %927 = vmatpush.msra.mxu0 %v909_v21  ;;  %v970_v21 = vld [vmem:[%s4401_s25] sm:$0xff] }
 0x2ee   :  { %928 = vmatpush.msra.mxu0 %v908_v22  ;;  %v977_v22 = vld [vmem:[%s4403_s14 + $0x8] sm:$0xff] }
 0x2f0   :  { %v601_v39 = vpop.f32.mrf.mxu1  ;;  %929 = vmatpush.msra.mxu0 %v907_v23  ;;  %v976_v23 = vld [vmem:[%s4403_s14] sm:$0xff]  ;;  %s4434_s14 = sld [smem:[#allocation81_spill]] }
 0x2f1   :  { %v602_v40 = vadd.f32 %v2883_v37, %v601_v39  ;;  %v883_v37 = vld [vmem:[%s4398_s2] sm:$0x3]  ;;  %s4429_s2 = sld [smem:[#allocation72_spill]] }
 0x2f2   :  { %930 = vmatpush.msra.mxu0 %v906_v25  ;;  %v885_v39 = vperm.slane %v883_v37, 0  ;;  %v1042_v25 = vld [vmem:[%s4404_s19 + $0x38] sm:$0xff] }
 0x2f3   :  { %v604_v44 = vmax.f32 %v602_v40, 0.0 }
 0x2f4   :  { %931 = vmatpush.msra.mxu0 %v905_v27  ;;  %v1040_v27 = vld [vmem:[%s4404_s19 + $0x28] sm:$0xff] }
 0x2f5   :  { %2718 = vmatmul.msk.f32.vlgmr.msra.gmra.mxu3 %vm612_vm10, %v604_v44  ;;  %v940_v44 = vld [vmem:[%s4399_s7 + $0x10] sm:$0xff] }
 0x2f6   :  { %778 = vmatpush.msra.mxu3 %v758_v51  ;;  %932 = vmatpush.msra.mxu0 %v904_v29  ;;  %v975_v51 = vld [vmem:[%s4401_s25 + $0x28] sm:$0xff]  ;;  %v1038_v29 = vld [vmem:[%s4404_s19 + $0x18] sm:$0xff] }
 0x2f7   :  { %962 = vmatpush.msrb.mxu1 %v940_v44  ;;  %v1072_v44 = vld [vmem:[%s4407_s0 + $0x28] sm:$0xff] }
 0x2f8   :  { %v3687_v47 = vpop.f32.mrf.mxu1  ;;  %779 = vmatpush.msra.mxu3 %v757_v52  ;;  %v974_v52 = vld [vmem:[%s4401_s25 + $0x20] sm:$0xff] }
 0x2f9   :  { %2722 = vmatmul.msk.f32.vlgmr.msra.gmra.mxu2 %vm705_vm11, %v3687_v47  ;;  %v704_v48 = vmul.f32 %v703_v45, %v3687_v47  ;;  %v939_v45 = vld [vmem:[%s4399_s7 + $0x8] sm:$0xff]  ;;  %s4430_s7 = sld [smem:[#allocation76_spill]] }
 0x2fa   :  { %780 = vmatpush.msra.mxu3 %v756_v53  ;;  %963 = vmatpush.msrb.mxu1 %v939_v45  ;;  %v973_v53 = vld [vmem:[%s4401_s25 + $0x18] sm:$0xff]  ;;  %s4432_s25 = sld [smem:[#allocation74_spill]] }
 0x2fb   :  { %v706_v50 = vsel %vm705_vm11, %v704_v48, 0.0  ;;  %v2885_v48 = vld [vmem:[#allocation2] ss:$0 sm:$0xff]  ;;  %996 = vmatpush.msra.mxu2 %v977_v22  ;;  %v1099_v45 = vld [vmem:[%s4406_s17 + $0x18] sm:$0xff]  ;;  %v1125_v22 = vld [vmem:[%s4409_s3 + $0x10] sm:$0xff] }
 0x2fc   :  { %707 = vadd.xlane.f32.xlu1 %v706_v50  ;;  %781 = vmatpush.msra.mxu3 %v755_v54  ;;  %v3745_v50 = vld [vmem:[%s4400_s12] sm:$0x3]  ;;  %s4431_s12 = sld [smem:[#allocation75_spill]] }
 0x2fd   :  { %2719 = vmatmul.msk.f32.vlgmr.msrb.gmra.mxu3 %vm524_vm9, %v540_v49  ;;  %964 = vmatpush.msrb.mxu1 %v938_v46  ;;  %v1071_v46 = vld [vmem:[%s4407_s0 + $0x20] sm:$0xff] }
 0x2fe   :  { %2726 = vmatpush.msk.msrb.mxu3 %vm496_vm0, %v859_v55  ;;  %v892_v55 = vperm.slane %v3745_v50, 0  ;;  %997 = vmatpush.msra.mxu2 %v976_v23  ;;  %v1124_v23 = vld [vmem:[%s4409_s3 + $0x8] sm:$0xff] }
 0x2ff   :  { %1015 = vmatpush.msra.mxu1 %v975_v51  ;;  %v1096_v51 = vld [vmem:[%s4406_s17] sm:$0xff] }
 0x300   :  { %871 = vmatpush.msrb.mxu3 %v858_v56 }
 0x301   :  { %1016 = vmatpush.msra.mxu1 %v974_v52  ;;  %v1068_v52 = vld [vmem:[%s4407_s0 + $0x8] sm:$0xff] }
 0x302   :  { %872 = vmatpush.msrb.mxu3 %v857_v58 }
 0x303   :  { %1017 = vmatpush.msra.mxu1 %v973_v53  ;;  %v1167_v53 = vld [vmem:[%s4408_s4 + $0x28] sm:$0xff] }
 0x304   :  { %873 = vmatpush.msrb.mxu3 %v856_v59  ;;  %v2887_v59 = vld [vmem:[#allocation3] ss:$0 sm:$0xff] }
 0x305   :  { %1018 = vmatpush.msra.mxu1 %v972_v19 }
 0x306   :  { %874 = vmatpush.msrb.mxu3 %v855_v60 }
 0x307   :  { %1019 = vmatpush.msra.mxu1 %v971_v20  ;;  %v1127_v20 = vld [vmem:[%s4409_s3 + $0x20] sm:$0xff] }
 0x308   :  { %875 = vmatpush.msrb.mxu3 %v854_v61 }
 0x309   :  { %1020 = vmatpush.msra.mxu1 %v970_v21  ;;  %v1126_v21 = vld [vmem:[%s4409_s3 + $0x18] sm:$0xff] }
 0x30a   :  { %876 = vmatpush.msrb.mxu3 %v853_v62 }
 0x30c   :  { %877 = vmatpush.msrb.mxu3 %v852_v63 }
 0x30e   :  { %878 = vmatpush.msrb.mxu3 %v851_v0  ;;  %v895_v0 = vperm.slane %v883_v37, 1 }
 0x36f   :  { %v708_v3 = vpop.xlane.xlu1 %707 }
 0x370   :  { %v709_v4 = vmul.f32 %v708_v3, %v3687_v47 }
 0x372   :  { %v711_v5 = vadd.f32 %v710_v2, %v709_v4 }
 0x374   :  { %v712_v9 = vadd.f32 %v711_v5, %v3687_v47 }
 0x376   :  { %v714_v10 = vmul.f32 %v713_v6, %v712_v9  ;;  %v2888_v6 = vld [vmem:[%s4402_s6] ss:$0 sm:$0xff]  ;;  %s4433_s6 = sld [smem:[#allocation77_spill]] }
 0x378   :  { %v715_v11 = vsel %vm705_vm11, %v714_v10, 0.0  ;;  %v633_v32 = vpop.f32.mrf.mxu3 }
 0x379   :  { %716 = vadd.xlane.f32.xlu2 %v715_v11 }
 0x37c   :  { %v751_v13 = vpop.f32.mrf.mxu2 }
 0x37d   :  { %v752_v14 = vadd.f32 %v2884_v12, %v751_v13 }
 0x37f   :  { %v754_v15 = vmax.f32 %v752_v14, 0.0 }
 0x380   :  { %v656_v33 = vpop.f32.mrf.mxu3 }
 0x381   :  { %2723 = vmatmul.msk.f32.vlgmr.msra.gmra.mxu3 %vm524_vm9, %v754_v15 }
 0x382   :  { %1112 = vmatpush.msra.mxu3 %v1101_v43  ;;  %v1291_v43 = vld [vmem:[%s4412_s20] sm:$0xff] }
 0x389   :  { %2727 = vmatmul.msk.f32.vlgmr.msrb.gmra.mxu3 %vm492_vm8, %v3638_v57 }
 0x3ec   :  { %v717_v26 = vpop.xlane.xlu2 %716 }
 0x3ed   :  { %v718_v28 = vmul.f32 %v717_v26, %v3687_v47  ;;  %v657_v47 = vadd.f32 %v656_v33, %v633_v32  ;;  %v1041_v26 = vld [vmem:[%s4404_s19 + $0x30] sm:$0xff]  ;;  %v1035_v32 = vld [vmem:[%s4404_s19] sm:$0xff]  ;;  %v901_v33 = vperm.slane %v3745_v50, 1 }
 0x3ee   :  { %v1069_v50 = vld [vmem:[%s4407_s0 + $0x10] sm:$0xff] }
 0x3ef   :  { %v720_v30 = vadd.f32 %v719_v24, %v718_v28  ;;  %v662_v49 = vadd.f32 %v2885_v48, %v657_v47  ;;  %v1043_v24 = vld [vmem:[%s4404_s19 + $0x40] sm:$0x3f]  ;;  %v1098_v47 = vld [vmem:[%s4406_s17 + $0x10] sm:$0xff]  ;;  %v1070_v48 = vld [vmem:[%s4407_s0 + $0x18] sm:$0xff] }
 0x3f0   :  { %v1039_v28 = vld [vmem:[%s4404_s19 + $0x20] sm:$0xff] }
 0x3f1   :  { %v721_v31 = vadd.f32 %v720_v30, %v712_v9  ;;  %v663_v54 = vsub.f32 0.0, %v662_v49  ;;  %v1037_v30 = vld [vmem:[%s4404_s19 + $0x10] sm:$0xff]  ;;  %v1097_v49 = vld [vmem:[%s4406_s17 + $0x8] sm:$0xff] }
 0x3f3   :  { %2725 = vmatmul.msk.f32.vlgmr.msrb.gmra.mxu2 %vm705_vm11, %v721_v31  ;;  %v664_v60 = vmul.f32 1.442695, %v663_v54  ;;  %v1036_v31 = vld [vmem:[%s4404_s19 + $0x8] sm:$0xff]  ;;  %v1067_v54 = vld [vmem:[%s4407_s0] sm:$0xff]  ;;  %s4435_s19 = sld [smem:[#allocation80_spill]] }
 0x3f4   :  { %2732 = vmatpush.msk.msrb.mxu2 %vm496_vm0, %v1043_v24  ;;  %v1123_v24 = vld [vmem:[%s4409_s3] sm:$0xff]  ;;  %s4438_s0 = sld [smem:[#allocation82_spill]] }
 0x3f5   :  { %2907 = vpow2.f32 %v664_v60  ;;  %v1162_v60 = vld [vmem:[%s4408_s4] sm:$0xff] }
 0x3f6   :  { %1055 = vmatpush.msrb.mxu2 %v1042_v25  ;;  %v1169_v25 = vld [vmem:[%s4410_s8 + $0x8] sm:$0x7f] }
 0x3f8   :  { %1056 = vmatpush.msrb.mxu2 %v1041_v26  ;;  %v1168_v26 = vld [vmem:[%s4410_s8] sm:$0xff]  ;;  %s4441_s8 = sld [smem:[#allocation78_spill]] }
 0x3fa   :  { %1057 = vmatpush.msrb.mxu2 %v1040_v27 }
 0x3fb   :  { %v2908_v11 = vpop.eup %2907 }
 0x3fc   :  { %v666_v13 = vadd.f32 1.0, %v2908_v11  ;;  %1058 = vmatpush.msrb.mxu2 %v1039_v28 }
 0x3fe   :  { %1059 = vmatpush.msrb.mxu2 %v1038_v29  ;;  %v1227_v29 = vld [vmem:[%s4411_s24 + $0x18] sm:$0xff] }
 0x400   :  { %1060 = vmatpush.msrb.mxu2 %v1037_v30  ;;  %v1226_v30 = vld [vmem:[%s4411_s24 + $0x10] sm:$0xff] }
 0x402   :  { %1061 = vmatpush.msrb.mxu2 %v1036_v31  ;;  %v1225_v31 = vld [vmem:[%s4411_s24 + $0x8] sm:$0xff] }
 0x404   :  { %v783_v35 = vpop.f32.mrf.mxu3  ;;  %1062 = vmatpush.msrb.mxu2 %v1035_v32  ;;  %v1224_v32 = vld [vmem:[%s4411_s24] sm:$0xff]  ;;  %s4442_s24 = sld [smem:[#allocation85_spill]] }
 0x405   :  { %v784_v36 = vadd.f32 %v2886_v34, %v783_v35 }
 0x407   :  { %v786_v38 = vmax.f32 %v784_v36, 0.0 }
 0x409   :  { %2724 = vmatmul.msk.f32.vlgmr.msrb.gmra.mxu0 %vm612_vm10, %v786_v38  ;;  %v2889_v38 = vld [vmem:[%s4405_s23] ss:$0 sm:$0xff]  ;;  %s4436_s23 = sld [smem:[#allocation79_spill]] }
 0x40a   :  { %1086 = vmatpush.msrb.mxu0 %v1072_v44 }
 0x40c   :  { %v3734_v40 = vpop.f32.mrf.mxu3  ;;  %1087 = vmatpush.msrb.mxu0 %v1071_v46 }
 0x40d   :  { %v886_v41 = vmul.f32 %v885_v39, %v3734_v40 }
 0x40e   :  { %1088 = vmatpush.msrb.mxu0 %v1070_v48 }
 0x40f   :  { %v888_v42 = vsel %vm887_vm12, %v886_v41, 0.0 }
 0x410   :  { %889 = vadd.xlane.f32.xlu2 %v888_v42  ;;  %1089 = vmatpush.msrb.mxu0 %v1069_v50  ;;  %v1514_v50 = vld [vmem:[%s4414_s9 + $0x38] sm:$0xff] }
 0x411   :  { %2728 = vmatmul.msk.f32.vlgmr.msra.gmra.mxu0 %vm887_vm12, %v3734_v40 }
 0x412   :  { %1090 = vmatpush.msrb.mxu0 %v1068_v52  ;;  %v1512_v52 = vld [vmem:[%s4414_s9 + $0x28] sm:$0xff] }
 0x414   :  { %1091 = vmatpush.msrb.mxu0 %v1067_v54  ;;  %v1510_v54 = vld [vmem:[%s4414_s9 + $0x18] sm:$0xff] }
 0x416   :  { %2737 = vmatpush.msk.msra.mxu0 %vm1174_vm13, %v1169_v25 }
 0x418   :  { %1193 = vmatpush.msra.mxu0 %v1168_v26  ;;  %v1429_v26 = vld [vmem:[%s4417_s29 + $0xe0] sm:$0xff] }
 0x476   :  { %v838_v61 = vpop.f32.mrf.mxu2 }
 0x483   :  { %v890_v56 = vpop.xlane.xlu2 %889 }
 0x484   :  { %v891_v58 = vmul.f32 %v890_v56, %v3734_v40  ;;  %v1165_v56 = vld [vmem:[%s4408_s4 + $0x18] sm:$0xff] }
 0x486   :  { %v893_v62 = vadd.f32 %v892_v55, %v891_v58  ;;  %v815_v63 = vpop.f32.mrf.mxu0  ;;  %v1166_v55 = vld [vmem:[%s4408_s4 + $0x20] sm:$0xff]  ;;  %v1164_v58 = vld [vmem:[%s4408_s4 + $0x10] sm:$0xff] }
 0x487   :  { %v839_v1 = vadd.f32 %v838_v61, %v815_v63  ;;  %v1137_v61 = vld [vmem:[%s4409_s3 + $0x70] sm:$0xff]  ;;  %v1135_v63 = vld [vmem:[%s4409_s3 + $0x60] sm:$0xff] }
 0x488   :  { %v894_v2 = vadd.f32 %v893_v62, %v3734_v40  ;;  %v1136_v62 = vld [vmem:[%s4409_s3 + $0x68] sm:$0xff] }
 0x489   :  { %v844_v3 = vadd.f32 %v2887_v59, %v839_v1  ;;  %v1163_v59 = vld [vmem:[%s4408_s4 + $0x8] sm:$0xff]  ;;  %v1133_v1 = vld [vmem:[%s4409_s3 + $0x50] sm:$0xff]  ;;  %s4439_s4 = sld [smem:[#allocation83_spill]] }
 0x48a   :  { %v896_v4 = vmul.f32 %v895_v0, %v894_v2  ;;  %v1134_v0 = vld [vmem:[%s4409_s3 + $0x58] sm:$0xff] }
 0x48b   :  { %v845_v5 = vsub.f32 0.0, %v844_v3  ;;  %v1131_v3 = vld [vmem:[%s4409_s3 + $0x40] sm:$0xff] }
 0x48c   :  { %v897_v7 = vsel %vm887_vm12, %v896_v4, 0.0  ;;  %v1130_v4 = vld [vmem:[%s4409_s3 + $0x38] sm:$0xff] }
 0x48d   :  { %v846_v8 = vmul.f32 1.442695, %v845_v5  ;;  %898 = vadd.xlane.f32.xlu0 %v897_v7  ;;  %v2890_v5 = vld [vmem:[#allocation4] ss:$0 sm:$0xff] }
 0x48e   :  { %v934_v9 = vpop.f32.mrf.mxu0 }
 0x48f   :  { %2909 = vpow2.f32 %v846_v8  ;;  %v935_v10 = vadd.f32 %v2888_v6, %v934_v9  ;;  %v1129_v8 = vld [vmem:[%s4409_s3 + $0x30] sm:$0xff] }
 0x490   :  { %2911 = vrcp.f32 %v666_v13 }
 0x491   :  { %v937_v12 = vmax.f32 %v935_v10, 0.0  ;;  %v1128_v10 = vld [vmem:[%s4409_s3 + $0x28] sm:$0xff] }
 0x493   :  { %2729 = vmatmul.msk.f32.vlgmr.msrb.gmra.mxu1 %vm524_vm9, %v937_v12 }
 0x494   :  { %1143 = vmatpush.msrb.mxu1 %v1137_v61  ;;  %v1256_v61 = vld [vmem:[%s4415_s13] sm:$0xff] }
 0x495   :  { %v2910_v14 = vpop.eup %2909 }
 0x496   :  { %v848_v15 = vadd.f32 1.0, %v2910_v14  ;;  %v2912_v16 = vpop.eup %2911  ;;  %1144 = vmatpush.msrb.mxu1 %v1136_v62  ;;  %v1342_v62 = vld [vmem:[%s4416_s21 + $0x20] sm:$0xff] }
 0x498   :  { %2913 = vrcp.f32 %v848_v15  ;;  %1145 = vmatpush.msrb.mxu1 %v1135_v63  ;;  %v1340_v63 = vld [vmem:[%s4416_s21 + $0x10] sm:$0xff] }
 0x49a   :  { %1146 = vmatpush.msrb.mxu1 %v1134_v0  ;;  %v1345_v0 = vld [vmem:[%s4416_s21 + $0x38] sm:$0xff] }
 0x49c   :  { %1147 = vmatpush.msrb.mxu1 %v1133_v1  ;;  %v1338_v1 = vld [vmem:[%s4416_s21] sm:$0xff] }
 0x49e   :  { %v2914_v17 = vpop.eup %2913 }
 0x49f   :  { %v3756_v18 = vadd.f32 %v2914_v17, %v2912_v16 }
 0x500   :  { %v899_v34 = vpop.xlane.xlu0 %898 }
 0x501   :  { %v900_v35 = vmul.f32 %v899_v34, %v3734_v40  ;;  %v1100_v40 = vld [vmem:[%s4406_s17 + $0x20] sm:$0xff]  ;;  %v1298_v34 = vld [vmem:[%s4412_s20 + $0x38] sm:$0xff]  ;;  %s4437_s17 = sld [smem:[#allocation73_spill]] }
 0x502   :  { %1113 = vmatpush.msra.mxu3 %v1100_v40  ;;  %v2891_v40 = vld [vmem:[%s4413_s5] ss:$0 sm:$0xff]  ;;  %s4444_s5 = sld [smem:[#allocation88_spill]] }
 0x503   :  { %v902_v36 = vadd.f32 %v901_v33, %v900_v35  ;;  %v1299_v33 = vld [vmem:[%s4412_s20 + $0x40] sm:$0x3f]  ;;  %v1297_v35 = vld [vmem:[%s4412_s20 + $0x30] sm:$0xff] }
 0x504   :  { %1114 = vmatpush.msra.mxu3 %v1099_v45 }
 0x505   :  { %v903_v37 = vadd.f32 %v902_v36, %v894_v2  ;;  %v1132_v2 = vld [vmem:[%s4409_s3 + $0x48] sm:$0xff]  ;;  %s4440_s3 = sld [smem:[#allocation84_spill]] }
 0x506   :  { %1115 = vmatpush.msra.mxu3 %v1098_v47  ;;  %1148 = vmatpush.msrb.mxu1 %v1132_v2  ;;  %v1296_v36 = vld [vmem:[%s4412_s20 + $0x28] sm:$0xff] }
 0x507   :  { %2731 = vmatmul.msk.f32.vlgmr.msra.gmra.mxu1 %vm887_vm12, %v903_v37  ;;  %v1295_v37 = vld [vmem:[%s4412_s20 + $0x20] sm:$0xff]  ;;  %v1343_v2 = vld [vmem:[%s4416_s21 + $0x28] sm:$0xff] }
 0x508   :  { %1116 = vmatpush.msra.mxu3 %v1097_v49  ;;  %1149 = vmatpush.msrb.mxu1 %v1131_v3  ;;  %v1515_v49 = vld [vmem:[%s4414_s9 + $0x40] sm:$0x3f]  ;;  %v1341_v3 = vld [vmem:[%s4416_s21 + $0x18] sm:$0xff] }
 0x50a   :  { %1117 = vmatpush.msra.mxu3 %v1096_v51  ;;  %1150 = vmatpush.msrb.mxu1 %v1130_v4  ;;  %v1513_v51 = vld [vmem:[%s4414_s9 + $0x30] sm:$0xff]  ;;  %v1339_v4 = vld [vmem:[%s4416_s21 + $0x8] sm:$0xff] }
 0x50c   :  { %1208 = vmatpush.msrb.mxu3 %v1167_v53  ;;  %1151 = vmatpush.msrb.mxu1 %v1129_v8  ;;  %v1511_v53 = vld [vmem:[%s4414_s9 + $0x20] sm:$0xff] }
 0x50d   :  { %v1413_v8 = vld [vmem:[%s4417_s29 + $0x60] sm:$0xff] }
 0x50e   :  { %1209 = vmatpush.msrb.mxu3 %v1166_v55  ;;  %1152 = vmatpush.msrb.mxu1 %v1128_v10  ;;  %v1509_v55 = vld [vmem:[%s4414_s9 + $0x10] sm:$0xff] }
 0x50f   :  { %v1399_v10 = vld [vmem:[%s4418_s30 + $0x10] sm:$0xff] }
 0x510   :  { %v966_v39 = vpop.f32.mrf.mxu1  ;;  %1210 = vmatpush.msrb.mxu3 %v1165_v56  ;;  %1153 = vmatpush.msrb.mxu1 %v1127_v20  ;;  %v1508_v56 = vld [vmem:[%s4414_s9 + $0x8] sm:$0xff]  ;;  %v1432_v20 = vld [vmem:[%s4417_s29 + $0xf8] sm:$0xff] }
 0x511   :  { %v967_v41 = vadd.f32 %v2889_v38, %v966_v39  ;;  %v1294_v39 = vld [vmem:[%s4412_s20 + $0x18] sm:$0xff] }
 0x512   :  { %1211 = vmatpush.msrb.mxu3 %v1164_v58  ;;  %1154 = vmatpush.msrb.mxu1 %v1126_v21  ;;  %v1507_v58 = vld [vmem:[%s4414_s9] sm:$0xff]  ;;  %s4445_s9 = sld [smem:[#allocation87_spill]] }
 0x513   :  { %v969_v42 = vmax.f32 %v967_v41, 0.0  ;;  %v1293_v41 = vld [vmem:[%s4412_s20 + $0x10] sm:$0xff]  ;;  %v2893_v21 = vld [vmem:[%s4420_s11] ss:$0 sm:$0xff] }
 0x514   :  { %1212 = vmatpush.msrb.mxu3 %v1163_v59  ;;  %1155 = vmatpush.msrb.mxu1 %v1125_v22  ;;  %v1257_v59 = vld [vmem:[%s4415_s13 + $0x8] sm:$0xff]  ;;  %v1431_v22 = vld [vmem:[%s4417_s29 + $0xf0] sm:$0xff]  ;;  %s4446_s13 = sld [smem:[#allocation89_spill]] }
 0x515   :  { %2730 = vmatmul.msk.f32.vlgmr.msra.gmra.mxu2 %vm612_vm10, %v969_v42  ;;  %v1292_v42 = vld [vmem:[%s4412_s20 + $0x8] sm:$0xff]  ;;  %s4443_s20 = sld [smem:[#allocation86_spill]] }
 0x516   :  { %1213 = vmatpush.msrb.mxu3 %v1162_v60  ;;  %1156 = vmatpush.msrb.mxu1 %v1124_v23  ;;  %v1344_v60 = vld [vmem:[%s4416_s21 + $0x30] sm:$0xff]  ;;  %v1430_v23 = vld [vmem:[%s4417_s29 + $0xe8] sm:$0xff]  ;;  %s3198_s21 = smov [#allocation20]  }
 0x517   :  { %1247 = vmatpush.msra.mxu2 %v1227_v29  ;;  %v2894_v29 = vld [vmem:[%s4421_s22] ss:$0 sm:$0xff] }
 0x518   :  { %1157 = vmatpush.msrb.mxu1 %v1123_v24 }
 0x519   :  { %1248 = vmatpush.msra.mxu2 %v1226_v30  ;;  %v1426_v30 = vld [vmem:[%s4417_s29 + $0xc8] sm:$0xff] }
 0x51a   :  { %s3085_s22 = scalar_lea.hbm %s4446_s13, 8 }
 0x51b   :  { %1249 = vmatpush.msra.mxu2 %v1225_v31  ;;  %v1425_v31 = vld [vmem:[%s4417_s29 + $0xc0] sm:$0xff] }
 0x51d   :  { %2733 = vmatmul.msk.f32.vlgmr.msrb.gmra.mxu2 %vm492_vm8, %v3638_v57 }
 0x51e   :  { %1250 = vmatpush.msra.mxu2 %v1224_v32 }
 0x520   :  { %2742 = vmatpush.msk.msrb.mxu2 %vm496_vm0, %v1299_v33 }
 0x522   :  { %1311 = vmatpush.msrb.mxu2 %v1298_v34 }
 0x524   :  { %1312 = vmatpush.msrb.mxu2 %v1297_v35  ;;  %v1409_v35 = vld [vmem:[%s4417_s29 + $0x40] sm:$0xff] }
 0x526   :  { %1313 = vmatpush.msrb.mxu2 %v1296_v36  ;;  %v1424_v36 = vld [vmem:[%s4417_s29 + $0xb8] sm:$0xff] }
 0x528   :  { %1314 = vmatpush.msrb.mxu2 %v1295_v37  ;;  %v1398_v37 = vld [vmem:[%s4418_s30 + $0x8] sm:$0xff] }
 0x52a   :  { %1315 = vmatpush.msrb.mxu2 %v1294_v39  ;;  %v1423_v39 = vld [vmem:[%s4417_s29 + $0xb0] sm:$0xff] }
 0x52c   :  { %1316 = vmatpush.msrb.mxu2 %v1293_v41  ;;  %v1397_v41 = vld [vmem:[%s4418_s30] sm:$0xff] }
 0x52e   :  { %1317 = vmatpush.msrb.mxu2 %v1292_v42  ;;  %v1562_v42 = vld [vmem:[%s4422_s18 + $0x40] sm:$0xff] }
 0x530   :  { %1318 = vmatpush.msrb.mxu2 %v1291_v43  ;;  %v1407_v43 = vld [vmem:[%s4417_s29 + $0x30] sm:$0xff] }
 0x584   :  { %v1022_v6 = vpop.f32.mrf.mxu1 }
 0x598   :  { %v999_v7 = vpop.f32.mrf.mxu2 }
 0x599   :  { %v1023_v9 = vadd.f32 %v1022_v6, %v999_v7  ;;  %v1415_v6 = vld [vmem:[%s4417_s29 + $0x70] sm:$0xff]  ;;  %v1414_v7 = vld [vmem:[%s4417_s29 + $0x68] sm:$0xff] }
 0x59b   :  { %v1028_v11 = vadd.f32 %v2890_v5, %v1023_v9  ;;  %v1416_v5 = vld [vmem:[%s4417_s29 + $0x78] sm:$0xff] }
 0x59c   :  { %v1400_v9 = vld [vmem:[%s4418_s30 + $0x18] sm:$0xff]  ;;  %s2612_s30 = sshll.u32 %s4446_s13, 4  ;;  %s2613_s30 = int_to_ptr.hbm [resolvable:$true] %s2612_s30 }
 0x59d   :  { %v1029_v12 = vsub.f32 0.0, %v1028_v11  ;;  %1489 = vmatpush.msra.mxu1 %v1400_v9  ;;  %v1412_v11 = vld [vmem:[%s4417_s29 + $0x58] sm:$0xff]  ;;  %v1632_v9 = vld [vmem:[%s4424_s27 + $0x60] sm:$0xff] }
 0x59f   :  { %v1030_v13 = vmul.f32 1.442695, %v1029_v12  ;;  %v2892_v12 = vld [vmem:[%s4419_s16] ss:$0 sm:$0xff]  ;;  %1490 = vmatpush.msra.mxu1 %v1399_v10  ;;  %s3081_s16 = sshra.s32 %s2613_s30, 4  ;;  %s3082_s16 = int_to_ptr.hbm [resolvable:$true] %s3081_s16 }
 0x5a0   :  { %v1064_v14 = vpop.f32.mrf.mxu2  ;;  %s3083_s11 = scalar_lea.hbm %s3082_s16, 8  ;;  %p3086_p12 = scmp.lt.s32.totalorder %s3082_s16, %s4446_s13 }
 0x5a1   :  { %2915 = vpow2.f32 %v1030_v13  ;;  %2734 = vmatmul.msk.f32.vlgmr.msrb.gmra.mxu0 %vm887_vm12, %v1064_v14  ;;  %2735 = vmatmul.msk.f32.vlgmr.msra.gmra.mxu3 %vm887_vm12, %v1064_v14  ;;  %v1411_v13 = vld [vmem:[%s4417_s29 + $0x50] sm:$0xff]  ;;  %p3084_p11 = scmp.ne.s32.totalorder %s3082_s16, %s3083_s11  ;;  %p3087_p13 = scmp.lt.s32.totalorder %s3085_s22, %s3083_s11 }
 0x5a2   :  { %1279 = vmatpush.msrb.mxu0 %v1257_v59  ;;  %1367 = vmatpush.msra.mxu3 %v1344_v60  ;;  %v1401_v59 = vld [vmem:[%s4417_s29] sm:$0xff] }
 0x5a3   :  { %1491 = vmatpush.msra.mxu1 %v1398_v37  ;;  %v2895_v60 = vld [vmem:[%s4423_s1] ss:$0 sm:$0xff]  ;;  %p3088_p0 = por %p3087_p13, %p3086_p12 }
 0x5a4   :  { %1280 = vmatpush.msrb.mxu0 %v1256_v61  ;;  %1368 = vmatpush.msra.mxu3 %v1342_v62  ;;  %v1651_v61 = vld [vmem:[%s4424_s27 + $0xf8] sm:$0xff]  ;;  %v1619_v37 = vld [vmem:[%s4426_s28 + $0x20] sm:$0xff] }
 0x5a5   :  { %1492 = vmatpush.msra.mxu1 %v1397_v41  ;;  %v1635_v62 = vld [vmem:[%s4424_s27 + $0x78] sm:$0xff]  ;;  %p3089_p1 = pnand %p3088_p0, %p3084_p11 }
 0x5a6   :  { %1369 = vmatpush.msra.mxu3 %v1340_v63  ;;  %v1650_v63 = vld [vmem:[%s4424_s27 + $0xf0] sm:$0xff] }
 0x5a7   :  { %v2916_v15 = vpop.eup %2915 }
 0x5a8   :  { %v1032_v16 = vadd.f32 1.0, %v2916_v15  ;;  %1370 = vmatpush.msra.mxu3 %v1338_v1  ;;  %v1410_v15 = vld [vmem:[%s4417_s29 + $0x48] sm:$0xff]  ;;  %v2896_v1 = vld [vmem:[#allocation5] ss:$0 sm:$0xff] }
 0x5a9   :  { %2739 = vmatmul.msk.f32.vlgmr.msrb.gmra.mxu3 %vm887_vm12, %v1064_v14 }
 0x5aa   :  { %2917 = vrcp.f32 %v1032_v16  ;;  %1434 = vmatpush.msrb.mxu3 %v1416_v5  ;;  %v1633_v5 = vld [vmem:[%s4424_s27 + $0x68] sm:$0xff] }
 0x5ac   :  { %1435 = vmatpush.msrb.mxu3 %v1415_v6 }
 0x5ae   :  { %1436 = vmatpush.msrb.mxu3 %v1414_v7 }
 0x5b0   :  { %v2918_v17 = vpop.eup %2917  ;;  %1437 = vmatpush.msrb.mxu3 %v1413_v8  ;;  %v1648_v8 = vld [vmem:[%s4424_s27 + $0xe0] sm:$0xff] }
 0x5b1   :  { %v3812_v19 = vadd.f32 %v2918_v17, %v3756_v18 }
 0x5b2   :  { %1438 = vmatpush.msrb.mxu3 %v1412_v11 }
 0x5b4   :  { %1439 = vmatpush.msrb.mxu3 %v1411_v13  ;;  %v1563_v13 = vld [vmem:[%s4422_s18 + $0x48] sm:$0xff] }
 0x5b6   :  { %1440 = vmatpush.msrb.mxu3 %v1410_v15 }
 0x5b8   :  { %1441 = vmatpush.msrb.mxu3 %v1409_v35 }
 0x61e   :  { %v1093_v18 = vpop.f32.mrf.mxu0 }
 0x624   :  { %v1119_v27 = vpop.f32.mrf.mxu3 }
 0x625   :  { %v1122_v28 = vmul.f32 %v1119_v27, %v1093_v18  ;;  %v1428_v27 = vld [vmem:[%s4417_s29 + $0xd8] sm:$0xff] }
 0x627   :  { %2736 = vmatmul.msk.f32.vlgmr.msrb.gmra.mxu1 %vm1138_vm14, %v1122_v28  ;;  %v1427_v28 = vld [vmem:[%s4417_s29 + $0xd0] sm:$0xff] }
 0x628   :  { %1584 = vmatpush.msrb.mxu1 %v1562_v42 }
 0x62c   :  { %v1215_v44 = vpop.f32.mrf.mxu3 }
 0x6a4   :  { %v1159_v38 = vpop.f32.mrf.mxu1 }
 0x6a5   :  { %2738 = vmatmul.msk.f32.vlgmr.msra.gmra.mxu0 %vm1170_vm15, %v1159_v38  ;;  %v1408_v38 = vld [vmem:[%s4417_s29 + $0x38] sm:$0xff] }
 0x6a6   :  { %1387 = vmatpush.msra.mxu0 %v1345_v0  ;;  %1442 = vmatpush.msrb.mxu3 %v1408_v38  ;;  %v1643_v38 = vld [vmem:[%s4424_s27 + $0xb8] sm:$0xff] }
 0x6a8   :  { %1388 = vmatpush.msra.mxu0 %v1343_v2  ;;  %1443 = vmatpush.msrb.mxu3 %v1407_v43  ;;  %v1634_v2 = vld [vmem:[%s4424_s27 + $0x70] sm:$0xff]  ;;  %v1618_v43 = vld [vmem:[%s4426_s28 + $0x18] sm:$0xff] }
 0x6aa   :  { %1389 = vmatpush.msra.mxu0 %v1341_v3 }
 0x6ac   :  { %1390 = vmatpush.msra.mxu0 %v1339_v4  ;;  %v1649_v4 = vld [vmem:[%s4424_s27 + $0xe8] sm:$0xff] }
 0x722   :  { %v1195_v45 = vpop.f32.mrf.mxu0 }
 0x723   :  { %v1216_v46 = vadd.f32 %v1215_v44, %v1195_v45  ;;  %v1560_v44 = vld [vmem:[%s4422_s18 + $0x30] sm:$0xff]  ;;  %v1406_v45 = vld [vmem:[%s4417_s29 + $0x28] sm:$0xff] }
 0x724   :  { %1585 = vmatpush.msrb.mxu1 %v1560_v44  ;;  %1444 = vmatpush.msrb.mxu3 %v1406_v45 }
 0x725   :  { %v1222_v47 = vadd.f32 %v2891_v40, %v1216_v46  ;;  %v1422_v40 = vld [vmem:[%s4417_s29 + $0xa8] sm:$0xff]  ;;  %v1421_v46 = vld [vmem:[%s4417_s29 + $0xa0] sm:$0xff] }
 0x727   :  { %v1223_v48 = vmax.f32 %v1222_v47, 0.0  ;;  %v1558_v47 = vld [vmem:[%s4422_s18 + $0x20] sm:$0xff] }
 0x728   :  { %1586 = vmatpush.msrb.mxu1 %v1558_v47  ;;  %v2897_v47 = vld [vmem:[#allocation11] ss:$0 sm:$0xff] }
 0x729   :  { %2740 = vmatmul.msk.f32.vlgmr.msra.gmra.mxu2 %vm524_vm9, %v1223_v48  ;;  %v1405_v48 = vld [vmem:[%s4417_s29 + $0x20] sm:$0xff] }
 0x72a   :  { %2747 = vmatpush.msk.msra.mxu2 %vm496_vm0, %v1515_v49  ;;  %v1420_v49 = vld [vmem:[%s4417_s29 + $0x98] sm:$0xff]  ;;  %1445 = vmatpush.msrb.mxu3 %v1405_v48 }
 0x72c   :  { %1527 = vmatpush.msra.mxu2 %v1514_v50  ;;  %v1556_v50 = vld [vmem:[%s4422_s18 + $0x10] sm:$0xff] }
 0x72d   :  { %1587 = vmatpush.msrb.mxu1 %v1556_v50  ;;  %v1615_v50 = vld [vmem:[%s4426_s28] sm:$0xff] }
 0x72e   :  { %1528 = vmatpush.msra.mxu2 %v1513_v51  ;;  %v1404_v51 = vld [vmem:[%s4417_s29 + $0x18] sm:$0xff] }
 0x72f   :  { %1446 = vmatpush.msrb.mxu3 %v1404_v51 }
 0x730   :  { %1529 = vmatpush.msra.mxu2 %v1512_v52  ;;  %v1419_v52 = vld [vmem:[%s4417_s29 + $0x90] sm:$0xff] }
 0x731   :  { %2743 = vmatmul.msk.f32.vlgmr.msrb.gmra.mxu2 %vm492_vm8, %v3638_v57 }
 0x732   :  { %1530 = vmatpush.msra.mxu2 %v1511_v53  ;;  %v1554_v53 = vld [vmem:[%s4422_s18] sm:$0xff] }
 0x733   :  { %1588 = vmatpush.msrb.mxu1 %v1554_v53 }
 0x734   :  { %1531 = vmatpush.msra.mxu2 %v1510_v54  ;;  %v1403_v54 = vld [vmem:[%s4417_s29 + $0x10] sm:$0xff] }
 0x735   :  { %1447 = vmatpush.msrb.mxu3 %v1403_v54 }
 0x736   :  { %1532 = vmatpush.msra.mxu2 %v1509_v55  ;;  %v1418_v55 = vld [vmem:[%s4417_s29 + $0x88] sm:$0xff] }
 0x738   :  { %1533 = vmatpush.msra.mxu2 %v1508_v56  ;;  %v1402_v56 = vld [vmem:[%s4417_s29 + $0x8] sm:$0xff] }
 0x739   :  { %1448 = vmatpush.msrb.mxu3 %v1402_v56  ;;  %v1641_v56 = vld [vmem:[%s4424_s27 + $0xa8] sm:$0xff] }
 0x73a   :  { %1534 = vmatpush.msra.mxu2 %v1507_v58  ;;  %v1417_v58 = vld [vmem:[%s4417_s29 + $0x80] sm:$0xff]  ;;  %s2610_s29 = sshll.u32 %s3198_s21, 4  ;;  %s2611_s29 = int_to_ptr.vmem [resolvable:$true] %s2610_s29 }
 0x73b   :  { %2748 = vmatmul.msk.f32.vlgmr.msra.gmra.mxu2 %vm492_vm8, %v3638_v57  ;;  %1449 = vmatpush.msrb.mxu3 %v1401_v59  ;;  %v1640_v59 = vld [vmem:[%s4424_s27 + $0xa0] sm:$0xff] }
 0x73c   :  { %1653 = vmatpush.msrb.mxu2 %v1635_v62  ;;  %v1622_v62 = vld [vmem:[%s4424_s27 + $0x10] sm:$0xff] }
 0x73e   :  { %1654 = vmatpush.msrb.mxu2 %v1634_v2  ;;  %v1620_v2 = vld [vmem:[%s4424_s27] sm:$0xff] }
 0x740   :  { %1655 = vmatpush.msrb.mxu2 %v1633_v5  ;;  %v1732_v5 = vld [vmem:[%s4427_s15 + $0x30] sm:$0xff] }
 0x742   :  { %1656 = vmatpush.msrb.mxu2 %v1632_v9  ;;  %v1728_v9 = vld [vmem:[%s4427_s15 + $0x10] sm:$0xff] }
 0x7ac   :  { %v1252_v14 = vpop.f32.mrf.mxu2 }
 0x7ad   :  { %v1253_v16 = vadd.f32 %v2892_v12, %v1252_v14  ;;  %v1346_v12 = vld [vmem:[%s4425_s26] sm:$0x3]  ;;  %v1647_v14 = vld [vmem:[%s4424_s27 + $0xd8] sm:$0xff] }
 0x7af   :  { %v1255_v17 = vmax.f32 %v1253_v16, 0.0  ;;  %v1631_v16 = vld [vmem:[%s4424_s27 + $0x58] sm:$0xff] }
 0x7b0   :  { %1657 = vmatpush.msrb.mxu2 %v1631_v16 }
 0x7b1   :  { %2741 = vmatmul.msk.f32.vlgmr.msrb.gmra.mxu0 %vm612_vm10, %v1255_v17  ;;  %v1561_v17 = vld [vmem:[%s4422_s18 + $0x38] sm:$0xff] }
 0x7b2   :  { %1454 = vmatpush.msrb.mxu0 %v1432_v20  ;;  %v1646_v20 = vld [vmem:[%s4424_s27 + $0xd0] sm:$0xff] }
 0x7b4   :  { %v3876_v24 = vpop.f32.mrf.mxu2  ;;  %1455 = vmatpush.msrb.mxu0 %v1431_v22  ;;  %v1349_v22 = vperm.slane %v1346_v12, 1 }
 0x7b5   :  { %2744 = vmatmul.msk.f32.vlgmr.msra.gmra.mxu3 %vm524_vm9, %v3876_v24  ;;  %v1328_v25 = vmul.f32 %v2893_v21, %v3876_v24 }
 0x7b6   :  { %1456 = vmatpush.msrb.mxu0 %v1430_v23  ;;  %1673 = vmatpush.msra.mxu3 %v1651_v61  ;;  %v1630_v23 = vld [vmem:[%s4424_s27 + $0x50] sm:$0xff]  ;;  %v1639_v61 = vld [vmem:[%s4424_s27 + $0x98] sm:$0xff] }
 0x7b7   :  { %v1329_v18 = vsel %vm524_vm9, %v1328_v25, 0.0  ;;  %v1645_v25 = vld [vmem:[%s4424_s27 + $0xc8] sm:$0xff]  ;;  %1658 = vmatpush.msrb.mxu2 %v1630_v23 }
 0x7b8   :  { %1330 = vadd.xlane.f32.xlu1 %v1329_v18  ;;  %1457 = vmatpush.msrb.mxu0 %v1429_v26  ;;  %v1348_v26 = vperm.slane %v1346_v12, 0  ;;  %v1629_v18 = vld [vmem:[%s4424_s27 + $0x48] sm:$0xff] }
 0x7b9   :  { %2745 = vmatmul.msk.f32.vlgmr.msra.gmra.mxu0 %vm524_vm9, %v3876_v24  ;;  %1674 = vmatpush.msra.mxu3 %v1650_v63  ;;  %v1637_v63 = vld [vmem:[%s4424_s27 + $0x88] sm:$0xff] }
 0x7ba   :  { %1458 = vmatpush.msrb.mxu0 %v1428_v27  ;;  %1659 = vmatpush.msrb.mxu2 %v1629_v18 }
 0x7bb   :  { %1675 = vmatpush.msra.mxu3 %v1649_v4  ;;  %v1733_v4 = vld [vmem:[%s4427_s15 + $0x38] sm:$0xff] }
 0x7bc   :  { %1459 = vmatpush.msrb.mxu0 %v1427_v28  ;;  %v1557_v28 = vld [vmem:[%s4422_s18 + $0x18] sm:$0xff] }
 0x7bd   :  { %1676 = vmatpush.msra.mxu3 %v1648_v8  ;;  %v1729_v8 = vld [vmem:[%s4427_s15 + $0x18] sm:$0xff] }
 0x7be   :  { %v3890_v32 = vpop.f32.mrf.mxu2  ;;  %1460 = vmatpush.msrb.mxu0 %v1426_v30 }
 0x7bf   :  { %v1544_v33 = vmul.f32 %v2894_v29, %v3890_v32  ;;  %1677 = vmatpush.msra.mxu3 %v1647_v14  ;;  %v1644_v29 = vld [vmem:[%s4424_s27 + $0xc0] sm:$0xff] }
 0x7c0   :  { %1461 = vmatpush.msrb.mxu0 %v1425_v31  ;;  %v1628_v31 = vld [vmem:[%s4424_s27 + $0x40] sm:$0xff] }
 0x7c1   :  { %v1545_v34 = vsel %vm705_vm11, %v1544_v33, 0.0  ;;  %1678 = vmatpush.msra.mxu3 %v1646_v20  ;;  %1660 = vmatpush.msrb.mxu2 %v1628_v31  ;;  %v1784_v20 = vld [vmem:[%s4429_s2 + $0x58] sm:$0xff] }
 0x7c2   :  { %1546 = vadd.xlane.f32.xlu2 %v1545_v34  ;;  %1462 = vmatpush.msrb.mxu0 %v1424_v36  ;;  %v1555_v34 = vld [vmem:[%s4422_s18 + $0x8] sm:$0xff] }
 0x7c3   :  { %1679 = vmatpush.msra.mxu3 %v1645_v25 }
 0x7c4   :  { %1463 = vmatpush.msrb.mxu0 %v1423_v39  ;;  %v1627_v39 = vld [vmem:[%s4424_s27 + $0x38] sm:$0xff] }
 0x7c5   :  { %1680 = vmatpush.msra.mxu3 %v1644_v29  ;;  %1661 = vmatpush.msrb.mxu2 %v1627_v39  ;;  %v1778_v39 = vld [vmem:[%s4429_s2 + $0x28] sm:$0xff] }
 0x7c6   :  { %1464 = vmatpush.msrb.mxu0 %v1422_v40  ;;  %v1642_v40 = vld [vmem:[%s4424_s27 + $0xb0] sm:$0xff] }
 0x7c7   :  { %1681 = vmatpush.msra.mxu3 %v1643_v38  ;;  %v1780_v38 = vld [vmem:[%s4429_s2 + $0x38] sm:$0xff] }
 0x7c8   :  { %1465 = vmatpush.msrb.mxu0 %v1421_v46  ;;  %v1617_v46 = vld [vmem:[%s4426_s28 + $0x10] sm:$0xff] }
 0x7c9   :  { %1682 = vmatpush.msra.mxu3 %v1642_v40  ;;  %v1781_v40 = vld [vmem:[%s4429_s2 + $0x40] sm:$0xff] }
 0x7ca   :  { %1466 = vmatpush.msrb.mxu0 %v1420_v49  ;;  %v1616_v49 = vld [vmem:[%s4426_s28 + $0x8] sm:$0xff] }
 0x7cb   :  { %1683 = vmatpush.msra.mxu3 %v1641_v56  ;;  %v1948_v56 = vld [vmem:[%s4430_s7] sm:$0xff] }
 0x7cc   :  { %1467 = vmatpush.msrb.mxu0 %v1419_v52 }
 0x7cd   :  { %1684 = vmatpush.msra.mxu3 %v1640_v59  ;;  %v1873_v59 = vld [vmem:[%s4431_s12 + $0xf8] sm:$0xff] }
 0x7ce   :  { %1468 = vmatpush.msrb.mxu0 %v1418_v55  ;;  %v1626_v55 = vld [vmem:[%s4424_s27 + $0x30] sm:$0xff] }
 0x7cf   :  { %1662 = vmatpush.msrb.mxu2 %v1626_v55  ;;  %1685 = vmatpush.msra.mxu3 %v1639_v61  ;;  %v1949_v55 = vld [vmem:[%s4430_s7 + $0x8] sm:$0xff]  ;;  %v1872_v61 = vld [vmem:[%s4431_s12 + $0xf0] sm:$0xff] }
 0x7d0   :  { %1469 = vmatpush.msrb.mxu0 %v1417_v58  ;;  %v1625_v58 = vld [vmem:[%s4424_s27 + $0x28] sm:$0xff] }
 0x7d1   :  { %1663 = vmatpush.msrb.mxu2 %v1625_v58  ;;  %v1857_v58 = vld [vmem:[%s4431_s12 + $0x78] sm:$0xff] }
 0x7d2   :  { %1824 = vmatpush.msra.mxu0 %v1784_v20 }
 0x82b   :  { %v1331_v0 = vpop.xlane.xlu1 %1330 }
 0x82c   :  { %v1332_v3 = vmul.f32 %v1331_v0, %v3876_v24  ;;  %v1621_v0 = vld [vmem:[%s4424_s27 + $0x8] sm:$0xff] }
 0x82e   :  { %v1336_v6 = vadd.f32 %v2895_v60, %v1332_v3  ;;  %v1282_v7 = vpop.f32.mrf.mxu0  ;;  %v1624_v60 = vld [vmem:[%s4424_s27 + $0x20] sm:$0xff] }
 0x82f   :  { %v1283_v10 = vadd.f32 %v2896_v1, %v1282_v7  ;;  %1664 = vmatpush.msrb.mxu2 %v1624_v60  ;;  %v1636_v1 = vld [vmem:[%s4424_s27 + $0x80] sm:$0xff]  ;;  %v1856_v60 = vld [vmem:[%s4431_s12 + $0x70] sm:$0xff] }
 0x830   :  { %v1337_v11 = vadd.f32 %v1336_v6, %v3876_v24  ;;  %v1559_v24 = vld [vmem:[%s4422_s18 + $0x28] sm:$0xff]  ;;  %v1734_v3 = vld [vmem:[%s4427_s15 + $0x40] sm:$0x3f] }
 0x831   :  { %v1285_v15 = vsub.f32 0.0, %v1283_v10  ;;  %v1731_v6 = vld [vmem:[%s4427_s15 + $0x28] sm:$0xff]  ;;  %v1730_v7 = vld [vmem:[%s4427_s15 + $0x20] sm:$0xff] }
 0x832   :  { %2746 = vmatmul.msk.f32.vlgmr.msra.gmra.mxu1 %vm524_vm9, %v1337_v11  ;;  %v1727_v10 = vld [vmem:[%s4427_s15 + $0x8] sm:$0xff]  ;;  %v1726_v11 = vld [vmem:[%s4427_s15] sm:$0xff] }
 0x833   :  { %v1286_v21 = vmul.f32 1.442695, %v1285_v15  ;;  %1604 = vmatpush.msra.mxu1 %v1563_v13  ;;  %v1564_v13 = vld [vmem:[%s4428_s10] sm:$0x3] }
 0x834   :  { %v1566_v14 = vperm.slane %v1564_v13, 0 }
 0x835   :  { %2919 = vpow2.f32 %v1286_v21  ;;  %1605 = vmatpush.msra.mxu1 %v1561_v17  ;;  %v1547_v45 = vpop.xlane.xlu2 %1546  ;;  %v1782_v21 = vld [vmem:[%s4429_s2 + $0x48] sm:$0xff] }
 0x836   :  { %v1392_v27 = vpop.f32.mrf.mxu0  ;;  %v1548_v48 = vmul.f32 %v1547_v45, %v3890_v32  ;;  %1825 = vmatpush.msra.mxu0 %v1782_v21  ;;  %v1779_v45 = vld [vmem:[%s4429_s2 + $0x30] sm:$0xff]  ;;  %v2009_v21 = vld [vmem:[%s4433_s6 + $0x68] sm:$0xff] }
 0x837   :  { %v1393_v30 = vadd.f32 %v1392_v27, %v1349_v22  ;;  %1606 = vmatpush.msra.mxu1 %v1559_v24  ;;  %v1567_v22 = vperm.slane %v1564_v13, 1  ;;  %v2898_v27 = vld [vmem:[#allocation6] ss:$0 sm:$0xff]  ;;  %v1838_v13 = vld [vmem:[%s4432_s25 + $0x10] sm:$0xff] }
 0x838   :  { %v1372_v33 = vpop.f32.mrf.mxu3  ;;  %v1552_v52 = vadd.f32 %v2897_v47, %v1548_v48  ;;  %1826 = vmatpush.msra.mxu0 %v1780_v38  ;;  %v1777_v47 = vld [vmem:[%s4429_s2 + $0x20] sm:$0xff]  ;;  %v1954_v48 = vld [vmem:[%s4430_s7 + $0x30] sm:$0xff] }
 0x839   :  { %v1396_v35 = vmax.f32 %v1393_v30, 0.0  ;;  %v1373_v36 = vadd.f32 %v1372_v33, %v1348_v26  ;;  %1607 = vmatpush.msra.mxu1 %v1557_v28 }
 0x83a   :  { %2749 = vmatmul.msk.f32.vlgmr.msrb.gmra.mxu1 %vm705_vm11, %v3890_v32  ;;  %v1553_v54 = vadd.f32 %v1552_v52, %v3890_v32  ;;  %1827 = vmatpush.msra.mxu0 %v1778_v39  ;;  %v1952_v52 = vld [vmem:[%s4430_s7 + $0x20] sm:$0xff] }
 0x83b   :  { %v2920_v41 = vpop.eup %2919  ;;  %v1395_v42 = vmax.f32 %v1373_v36, 0.0  ;;  %1470 = vmatmul.f32.vlgmr.msrb.gmra.mxu0 %v1396_v35  ;;  %1608 = vmatpush.msra.mxu1 %v1555_v34 }
 0x83c   :  { %v1288_v44 = vadd.f32 1.0, %v2920_v41  ;;  %v1783_v41 = vld [vmem:[%s4429_s2 + $0x50] sm:$0xff] }
 0x83d   :  { %1707 = vmatpush.msrb.mxu1 %v1619_v37  ;;  %1450 = vmatmul.f32.vlgmr.msrb.gmra.mxu3 %v1395_v42  ;;  %v1776_v42 = vld [vmem:[%s4429_s2 + $0x18] sm:$0xff] }
 0x83e   :  { %2921 = vrcp.f32 %v1288_v44  ;;  %1828 = vmatpush.msra.mxu0 %v1776_v42  ;;  %v1956_v44 = vld [vmem:[%s4430_s7 + $0x40] sm:$0x3f]  ;;  %v1847_v42 = vld [vmem:[%s4431_s12 + $0x28] sm:$0xff] }
 0x83f   :  { %1708 = vmatpush.msrb.mxu1 %v1618_v43  ;;  %v1774_v43 = vld [vmem:[%s4429_s2 + $0x8] sm:$0xff] }
 0x840   :  { %1829 = vmatpush.msra.mxu0 %v1774_v43  ;;  %v1863_v43 = vld [vmem:[%s4431_s12 + $0xa8] sm:$0xff] }
 0x841   :  { %1709 = vmatpush.msrb.mxu1 %v1617_v46  ;;  %v1955_v46 = vld [vmem:[%s4430_s7 + $0x38] sm:$0xff] }
 0x842   :  { %2750 = vmatmul.msk.f32.vlgmr.msra.gmra.mxu1 %vm705_vm11, %v3890_v32  ;;  %v1638_v32 = vld [vmem:[%s4424_s27 + $0x90] sm:$0xff]  ;;  %2757 = vmatpush.msk.msrb.mxu0 %vm496_vm0, %v1956_v44  ;;  %v2001_v44 = vld [vmem:[%s4433_s6 + $0x28] sm:$0xff] }
 0x843   :  { %1710 = vmatpush.msrb.mxu1 %v1616_v49  ;;  %1686 = vmatpush.msra.mxu3 %v1638_v32  ;;  %v1775_v49 = vld [vmem:[%s4429_s2 + $0x10] sm:$0xff]  ;;  %v1871_v32 = vld [vmem:[%s4431_s12 + $0xe8] sm:$0xff] }
 0x844   :  { %v2922_v51 = vpop.eup %2921  ;;  %1968 = vmatpush.msrb.mxu0 %v1955_v46  ;;  %v1862_v46 = vld [vmem:[%s4431_s12 + $0xa0] sm:$0xff] }
 0x845   :  { %v3958_v53 = vadd.f32 %v2922_v51, %v3812_v19  ;;  %1711 = vmatpush.msrb.mxu1 %v1615_v50  ;;  %v1623_v19 = vld [vmem:[%s4424_s27 + $0x18] sm:$0xff]  ;;  %1687 = vmatpush.msra.mxu3 %v1637_v63  ;;  %v1953_v50 = vld [vmem:[%s4430_s7 + $0x28] sm:$0xff]  ;;  %v1773_v51 = vld [vmem:[%s4429_s2] sm:$0xff] }
 0x846   :  { %1665 = vmatpush.msrb.mxu2 %v1623_v19  ;;  %1969 = vmatpush.msrb.mxu0 %v1954_v48  ;;  %v1855_v19 = vld [vmem:[%s4431_s12 + $0x68] sm:$0xff]  ;;  %v1870_v63 = vld [vmem:[%s4431_s12 + $0xe0] sm:$0xff]  ;;  %v1845_v48 = vld [vmem:[%s4431_s12 + $0x18] sm:$0xff] }
 0x847   :  { %1688 = vmatpush.msra.mxu3 %v1636_v1  ;;  %1804 = vmatpush.msra.mxu1 %v1783_v41  ;;  %v2003_v41 = vld [vmem:[%s4433_s6 + $0x38] sm:$0xff] }
 0x848   :  { %1666 = vmatpush.msrb.mxu2 %v1622_v62  ;;  %1970 = vmatpush.msrb.mxu0 %v1953_v50  ;;  %v1854_v62 = vld [vmem:[%s4431_s12 + $0x60] sm:$0xff]  ;;  %v2006_v50 = vld [vmem:[%s4433_s6 + $0x50] sm:$0xff] }
 0x849   :  { %2752 = vmatpush.msk.msrb.mxu3 %vm496_vm0, %v1734_v3  ;;  %1805 = vmatpush.msra.mxu1 %v1781_v40  ;;  %v1840_v3 = vld [vmem:[%s4432_s25 + $0x20] sm:$0xff] }
 0x84a   :  { %2751 = vmatmul.msk.f32.vlgmr.msrb.gmra.mxu1 %vm705_vm11, %v1553_v54  ;;  %1667 = vmatpush.msrb.mxu2 %v1621_v0  ;;  %v1950_v54 = vld [vmem:[%s4430_s7 + $0x10] sm:$0xff]  ;;  %v1841_v0 = vld [vmem:[%s4432_s25 + $0x28] sm:$0xff]  ;;  %v1836_v40 = vld [vmem:[%s4432_s25] sm:$0xff] }
 0x84b   :  { %1746 = vmatpush.msrb.mxu3 %v1733_v4  ;;  %1806 = vmatpush.msra.mxu1 %v1779_v45  ;;  %v1846_v45 = vld [vmem:[%s4431_s12 + $0x20] sm:$0xff] }
 0x84c   :  { %1668 = vmatpush.msrb.mxu2 %v1620_v2  ;;  %1971 = vmatpush.msrb.mxu0 %v1952_v52  ;;  %v1844_v52 = vld [vmem:[%s4431_s12 + $0x10] sm:$0xff] }
 0x84d   :  { %1747 = vmatpush.msrb.mxu3 %v1732_v5  ;;  %1807 = vmatpush.msra.mxu1 %v1777_v47  ;;  %v2899_v5 = vld [vmem:[#allocation7] ss:$0 sm:$0xff]  ;;  %v1999_v47 = vld [vmem:[%s4433_s6 + $0x18] sm:$0xff] }
 0x84e   :  { %1895 = vmatpush.msra.mxu2 %v1873_v59  ;;  %v2002_v59 = vld [vmem:[%s4433_s6 + $0x30] sm:$0xff] }
 0x84f   :  { %1748 = vmatpush.msrb.mxu3 %v1731_v6  ;;  %1808 = vmatpush.msra.mxu1 %v1775_v49  ;;  %v1853_v6 = vld [vmem:[%s4431_s12 + $0x58] sm:$0xff] }
 0x850   :  { %1896 = vmatpush.msra.mxu2 %v1872_v61  ;;  %v1861_v49 = vld [vmem:[%s4431_s12 + $0x98] sm:$0xff]  ;;  %v1842_v61 = vld [vmem:[%s4431_s12] sm:$0xff] }
 0x851   :  { %1749 = vmatpush.msrb.mxu3 %v1730_v7  ;;  %1809 = vmatpush.msra.mxu1 %v1773_v51  ;;  %v1869_v7 = vld [vmem:[%s4431_s12 + $0xd8] sm:$0xff]  ;;  %v1997_v51 = vld [vmem:[%s4433_s6 + $0x8] sm:$0xff] }
 0x852   :  { %1897 = vmatpush.msra.mxu2 %v1871_v32  ;;  %v2000_v32 = vld [vmem:[%s4433_s6 + $0x20] sm:$0xff] }
 0x853   :  { %1750 = vmatpush.msrb.mxu3 %v1729_v8  ;;  %1875 = vmatpush.msrb.mxu1 %v1857_v58  ;;  %v1859_v58 = vld [vmem:[%s4431_s12 + $0x88] sm:$0xff] }
 0x854   :  { %1898 = vmatpush.msra.mxu2 %v1870_v63  ;;  %v1998_v63 = vld [vmem:[%s4433_s6 + $0x10] sm:$0xff] }
 0x855   :  { %1751 = vmatpush.msrb.mxu3 %v1728_v9  ;;  %1876 = vmatpush.msrb.mxu1 %v1856_v60  ;;  %v1839_v9 = vld [vmem:[%s4432_s25 + $0x18] sm:$0xff] }
 0x856   :  { %1899 = vmatpush.msra.mxu2 %v1869_v7  ;;  %v2181_v60 = vld [vmem:[%s4434_s14 + $0x38] sm:$0xff] }
 0x857   :  { %1752 = vmatpush.msrb.mxu3 %v1727_v10  ;;  %1877 = vmatpush.msrb.mxu1 %v1855_v19  ;;  %v1858_v19 = vld [vmem:[%s4431_s12 + $0x80] sm:$0xff]  ;;  %v2083_v7 = vld [vmem:[%s4435_s19 + $0x78] sm:$0xff] }
 0x859   :  { %1753 = vmatpush.msrb.mxu3 %v1726_v11  ;;  %1878 = vmatpush.msrb.mxu1 %v1854_v62  ;;  %v1852_v11 = vld [vmem:[%s4431_s12 + $0x50] sm:$0xff] }
 0x85a   :  { %v2180_v62 = vld [vmem:[%s4434_s14 + $0x30] sm:$0xff] }
 0x85b   :  { %1879 = vmatpush.msrb.mxu1 %v1853_v6  ;;  %v2174_v6 = vld [vmem:[%s4434_s14] sm:$0xff] }
 0x85d   :  { %1880 = vmatpush.msrb.mxu1 %v1852_v11  ;;  %v2066_v11 = vld [vmem:[%s4436_s23 + $0x28] sm:$0xff] }
 0x8af   :  { %v1494_v12 = vpop.f32.mrf.mxu1 }
 0x8b7   :  { %v1590_v15 = vpop.f32.mrf.mxu1 }
 0x8b8   :  { %v1591_v16 = vadd.f32 %v1590_v15, %v1566_v14  ;;  %v1471_v24 = vpop.f32.mrf.mxu0  ;;  %v2900_v15 = vld [vmem:[#allocation14] ss:$0 sm:$0xff] }
 0x8ba   :  { %v1613_v17 = vmax.f32 %v1591_v16, 0.0  ;;  %v1851_v16 = vld [vmem:[%s4431_s12 + $0x48] sm:$0xff] }
 0x8bb   :  { %1881 = vmatpush.msrb.mxu1 %v1851_v16  ;;  %v2901_v16 = vld [vmem:[#allocation16] ss:$0 sm:$0xff] }
 0x8bc   :  { %1669 = vmatmul.f32.vlgmr.msrb.gmra.mxu2 %v1613_v17  ;;  %v1867_v17 = vld [vmem:[%s4431_s12 + $0xc8] sm:$0xff] }
 0x8bf   :  { %v1610_v23 = vpop.f32.mrf.mxu1 }
 0x8c0   :  { %v1611_v25 = vadd.f32 %v1610_v23, %v1567_v22  ;;  %v1451_v26 = vpop.f32.mrf.mxu3  ;;  %v1850_v22 = vld [vmem:[%s4431_s12 + $0x40] sm:$0xff] }
 0x8c1   :  { %v1472_v18 = vadd.f32 %v1471_v24, %v1451_v26  ;;  %v1866_v24 = vld [vmem:[%s4431_s12 + $0xc0] sm:$0xff]  ;;  %1882 = vmatpush.msrb.mxu1 %v1850_v22 }
 0x8c2   :  { %v1614_v28 = vmax.f32 %v1611_v25, 0.0  ;;  %v1837_v25 = vld [vmem:[%s4432_s25 + $0x8] sm:$0xff] }
 0x8c3   :  { %v1495_v29 = vadd.f32 %v1494_v12, %v1472_v18  ;;  %v1868_v12 = vld [vmem:[%s4431_s12 + $0xd0] sm:$0xff] }
 0x8c4   :  { %1689 = vmatmul.f32.vlgmr.msra.gmra.mxu3 %v1614_v28  ;;  %1900 = vmatpush.msra.mxu2 %v1868_v12  ;;  %v1849_v28 = vld [vmem:[%s4431_s12 + $0x38] sm:$0xff]  ;;  %v2065_v12 = vld [vmem:[%s4436_s23 + $0x20] sm:$0xff] }
 0x8c5   :  { %v1500_v30 = vadd.f32 %v2898_v27, %v1495_v29  ;;  %1928 = vmatpush.msra.mxu3 %v1841_v0  ;;  %v2007_v27 = vld [vmem:[%s4433_s6 + $0x58] sm:$0xff]  ;;  %1883 = vmatpush.msrb.mxu1 %v1849_v28  ;;  %v2179_v0 = vld [vmem:[%s4434_s14 + $0x28] sm:$0xff] }
 0x8c6   :  { %1901 = vmatpush.msra.mxu2 %v1867_v17  ;;  %v1865_v29 = vld [vmem:[%s4431_s12 + $0xb8] sm:$0xff]  ;;  %v2063_v17 = vld [vmem:[%s4436_s23 + $0x10] sm:$0xff] }
 0x8c7   :  { %v1501_v31 = vsub.f32 0.0, %v1500_v30  ;;  %v1713_v8 = vpop.f32.mrf.mxu1  ;;  %1929 = vmatpush.msra.mxu3 %v1840_v3  ;;  %v2177_v3 = vld [vmem:[%s4434_s14 + $0x18] sm:$0xff] }
 0x8c8   :  { %1902 = vmatpush.msra.mxu2 %v1866_v24  ;;  %v1785_v24 = vld [vmem:[%s4437_s17] sm:$0x3] }
 0x8c9   :  { %v1502_v33 = vmul.f32 1.442695, %v1501_v31  ;;  %1930 = vmatpush.msra.mxu3 %v1839_v9  ;;  %v2005_v31 = vld [vmem:[%s4433_s6 + $0x48] sm:$0xff]  ;;  %v2067_v9 = vld [vmem:[%s4436_s23 + $0x30] sm:$0xff]  ;;  %v1787_v28 = vperm.slane %v1785_v24, 0 }
 0x8ca   :  { %1903 = vmatpush.msra.mxu2 %v1865_v29  ;;  %v1788_v29 = vperm.slane %v1785_v24, 1  ;;  %v2263_v24 = vld [vmem:[%s4439_s4] sm:$0xff] }
 0x8cb   :  { %2923 = vpow2.f32 %v1502_v33  ;;  %1931 = vmatpush.msra.mxu3 %v1838_v13  ;;  %v1848_v33 = vld [vmem:[%s4431_s12 + $0x30] sm:$0xff]  ;;  %v2080_v13 = vld [vmem:[%s4435_s19 + $0x60] sm:$0xff] }
 0x8cc   :  { %2753 = vmatmul.msk.f32.vlgmr.msrb.gmra.mxu3 %vm492_vm8, %v3638_v57  ;;  %1884 = vmatpush.msrb.mxu1 %v1848_v33  ;;  %v2099_v33 = vld [vmem:[%s4435_s19 + $0xf8] sm:$0xff] }
 0x8cd   :  { %1932 = vmatpush.msra.mxu3 %v1837_v25  ;;  %v2062_v25 = vld [vmem:[%s4436_s23 + $0x8] sm:$0xff] }
 0x8ce   :  { %1885 = vmatpush.msrb.mxu1 %v1847_v42 }
 0x8cf   :  { %1933 = vmatpush.msra.mxu3 %v1836_v40 }
 0x8d0   :  { %1886 = vmatpush.msrb.mxu1 %v1846_v45  ;;  %v2218_v45 = vld [vmem:[%s4438_s0 + $0x60] sm:$0xff] }
 0x8d1   :  { %v2924_v34 = vpop.eup %2923 }
 0x8d2   :  { %v1504_v35 = vadd.f32 1.0, %v2924_v34  ;;  %v1864_v34 = vld [vmem:[%s4431_s12 + $0xb0] sm:$0xff]  ;;  %1887 = vmatpush.msrb.mxu1 %v1845_v48 }
 0x8d3   :  { %1904 = vmatpush.msra.mxu2 %v1864_v34  ;;  %v2075_v34 = vld [vmem:[%s4435_s19 + $0x38] sm:$0xff] }
 0x8d4   :  { %2925 = vrcp.f32 %v1504_v35  ;;  %1888 = vmatpush.msrb.mxu1 %v1844_v52  ;;  %v2093_v52 = vld [vmem:[%s4435_s19 + $0xc8] sm:$0xff] }
 0x8d5   :  { %1905 = vmatpush.msra.mxu2 %v1863_v43  ;;  %v2074_v43 = vld [vmem:[%s4435_s19 + $0x30] sm:$0xff] }
 0x8d7   :  { %1906 = vmatpush.msra.mxu2 %v1862_v46  ;;  %v2902_v46 = vld [vmem:[#allocation17] ss:$0 sm:$0xff] }
 0x8d9   :  { %1907 = vmatpush.msra.mxu2 %v1861_v49 }
 0x8da   :  { %v2926_v36 = vpop.eup %2925 }
 0x8db   :  { %v3991_v37 = vadd.f32 %v2926_v36, %v3958_v53  ;;  %v1951_v53 = vld [vmem:[%s4430_s7 + $0x18] sm:$0xff] }
 0x8dc   :  { %1972 = vmatpush.msrb.mxu0 %v1951_v53  ;;  %v1860_v53 = vld [vmem:[%s4431_s12 + $0x90] sm:$0xff] }
 0x8dd   :  { %1908 = vmatpush.msra.mxu2 %v1860_v53  ;;  %v2092_v53 = vld [vmem:[%s4435_s19 + $0xc0] sm:$0xff] }
 0x8de   :  { %1973 = vmatpush.msrb.mxu0 %v1950_v54  ;;  %v2004_v54 = vld [vmem:[%s4433_s6 + $0x40] sm:$0xff] }
 0x8df   :  { %1909 = vmatpush.msra.mxu2 %v1859_v58  ;;  %v2089_v58 = vld [vmem:[%s4435_s19 + $0xa8] sm:$0xff] }
 0x8e0   :  { %1974 = vmatpush.msrb.mxu0 %v1949_v55  ;;  %v2182_v55 = vld [vmem:[%s4434_s14 + $0x40] sm:$0x3f] }
 0x8e1   :  { %1910 = vmatpush.msra.mxu2 %v1858_v19  ;;  %v2072_v19 = vld [vmem:[%s4435_s19 + $0x20] sm:$0xff] }
 0x8e2   :  { %1975 = vmatpush.msrb.mxu0 %v1948_v56  ;;  %v1843_v56 = vld [vmem:[%s4431_s12 + $0x8] sm:$0xff] }
 0x8e3   :  { %1889 = vmatpush.msrb.mxu1 %v1843_v56  ;;  %2153 = vmatpush.msrb.mxu2 %v2067_v9  ;;  %v2216_v56 = vld [vmem:[%s4438_s0 + $0x50] sm:$0xff]  ;;  %v2206_v9 = vld [vmem:[%s4438_s0] sm:$0xff] }
 0x8e5   :  { %1890 = vmatpush.msrb.mxu1 %v1842_v61  ;;  %2154 = vmatpush.msrb.mxu2 %v2066_v11  ;;  %v2088_v61 = vld [vmem:[%s4435_s19 + $0xa0] sm:$0xff]  ;;  %v2211_v11 = vld [vmem:[%s4438_s0 + $0x28] sm:$0xff] }
 0x8e7   :  { %2155 = vmatpush.msrb.mxu2 %v2065_v12  ;;  %v2068_v12 = vld [vmem:[%s4435_s19] sm:$0xff] }
 0x93f   :  { %v1670_v1 = vpop.f32.mrf.mxu2 }
 0x947   :  { %v1690_v2 = vpop.f32.mrf.mxu3 }
 0x948   :  { %v1691_v4 = vadd.f32 %v1690_v2, %v1670_v1  ;;  %v1996_v1 = vld [vmem:[%s4433_s6] sm:$0xff] }
 0x949   :  { %v2178_v2 = vld [vmem:[%s4434_s14 + $0x20] sm:$0xff] }
 0x94a   :  { %v1714_v10 = vadd.f32 %v1713_v8, %v1691_v4  ;;  %v2176_v4 = vld [vmem:[%s4434_s14 + $0x10] sm:$0xff] }
 0x94b   :  { %v2082_v8 = vld [vmem:[%s4435_s19 + $0x70] sm:$0xff] }
 0x94c   :  { %v1719_v14 = vadd.f32 %v2899_v5, %v1714_v10  ;;  %v2175_v5 = vld [vmem:[%s4434_s14 + $0x8] sm:$0xff] }
 0x94d   :  { %v2081_v10 = vld [vmem:[%s4435_s19 + $0x68] sm:$0xff] }
 0x94e   :  { %v1720_v20 = vsub.f32 0.0, %v1719_v14  ;;  %v2064_v14 = vld [vmem:[%s4436_s23 + $0x18] sm:$0xff] }
 0x94f   :  { %v4033_v23 = vpop.f32.mrf.mxu3  ;;  %2156 = vmatpush.msrb.mxu2 %v2064_v14  ;;  %v2275_v14 = vld [vmem:[%s4439_s4 + $0x60] sm:$0xff] }
 0x950   :  { %v1721_v26 = vmul.f32 1.442695, %v1720_v20  ;;  %2754 = vmatmul.msk.f32.vlgmr.msra.gmra.mxu1 %vm887_vm12, %v4033_v23  ;;  %2755 = vmatmul.msk.f32.vlgmr.msra.gmra.mxu0 %vm887_vm12, %v4033_v23  ;;  %v1763_v18 = vmul.f32 %v2900_v15, %v4033_v23  ;;  %v2079_v15 = vld [vmem:[%s4435_s19 + $0x58] sm:$0xff] }
 0x951   :  { %2048 = vmatpush.msra.mxu0 %v2009_v21  ;;  %2101 = vmatpush.msra.mxu1 %v2083_v7  ;;  %v2078_v21 = vld [vmem:[%s4435_s19 + $0x50] sm:$0xff]  ;;  %v2213_v7 = vld [vmem:[%s4438_s0 + $0x38] sm:$0xff] }
 0x952   :  { %2927 = vpow2.f32 %v1721_v26  ;;  %v1764_v30 = vsel %vm887_vm12, %v1763_v18, 0.0  ;;  %2157 = vmatpush.msrb.mxu2 %v2063_v17  ;;  %v2077_v26 = vld [vmem:[%s4435_s19 + $0x48] sm:$0xff]  ;;  %v2271_v17 = vld [vmem:[%s4439_s4 + $0x40] sm:$0xff] }
 0x953   :  { %1765 = vadd.xlane.f32.xlu0 %v1764_v30  ;;  %2049 = vmatpush.msra.mxu0 %v2007_v27  ;;  %v2061_v27 = vld [vmem:[%s4436_s23] sm:$0xff] }
 0x954   :  { %2102 = vmatpush.msra.mxu1 %v2082_v8  ;;  %2158 = vmatpush.msrb.mxu2 %v2062_v25  ;;  %v2076_v30 = vld [vmem:[%s4435_s19 + $0x40] sm:$0xff]  ;;  %v2069_v8 = vld [vmem:[%s4435_s19 + $0x8] sm:$0xff]  ;;  %v2334_v25 = vld [vmem:[%s4440_s3 + $0x78] sm:$0xff] }
 0x955   :  { %2050 = vmatpush.msra.mxu0 %v2005_v31 }
 0x956   :  { %2103 = vmatpush.msra.mxu1 %v2081_v10  ;;  %2159 = vmatpush.msrb.mxu2 %v2061_v27  ;;  %v2084_v10 = vld [vmem:[%s4435_s19 + $0x80] sm:$0xff]  ;;  %v2332_v27 = vld [vmem:[%s4440_s3 + $0x68] sm:$0xff] }
 0x957   :  { %2051 = vmatpush.msra.mxu0 %v2003_v41 }
 0x958   :  { %v2928_v35 = vpop.eup %2927  ;;  %2758 = vmatmul.msk.f32.vlgmr.msrb.gmra.mxu0 %vm492_vm8, %v3638_v57  ;;  %2104 = vmatpush.msra.mxu1 %v2080_v13  ;;  %v2209_v13 = vld [vmem:[%s4438_s0 + $0x18] sm:$0xff] }
 0x959   :  { %v1723_v36 = vadd.f32 1.0, %v2928_v35  ;;  %2052 = vmatpush.msra.mxu0 %v2001_v44  ;;  %v2097_v44 = vld [vmem:[%s4435_s19 + $0xe8] sm:$0xff] }
 0x95a   :  { %2105 = vmatpush.msra.mxu1 %v2079_v15  ;;  %v2207_v15 = vld [vmem:[%s4438_s0 + $0x8] sm:$0xff] }
 0x95b   :  { %2929 = vrcp.f32 %v1723_v36  ;;  %2053 = vmatpush.msra.mxu0 %v1999_v47  ;;  %v2095_v47 = vld [vmem:[%s4435_s19 + $0xd8] sm:$0xff] }
 0x95c   :  { %2106 = vmatpush.msra.mxu1 %v2078_v21  ;;  %v2267_v21 = vld [vmem:[%s4439_s4 + $0x20] sm:$0xff] }
 0x95d   :  { %2054 = vmatpush.msra.mxu0 %v1997_v51 }
 0x95e   :  { %2107 = vmatpush.msra.mxu1 %v2077_v26  ;;  %v2333_v26 = vld [vmem:[%s4440_s3 + $0x70] sm:$0xff] }
 0x95f   :  { %2762 = vmatpush.msk.msrb.mxu0 %vm496_vm0, %v2182_v55  ;;  %vm1986_vm0 = vcmask 457728   ;;  %v2090_v55 = vld [vmem:[%s4435_s19 + $0xb0] sm:$0xff] }
 0x960   :  { %2108 = vmatpush.msra.mxu1 %v2076_v30  ;;  %v2010_v30 = vld [vmem:[%s4441_s8] sm:$0x3] }
 0x961   :  { %v2930_v38 = vpop.eup %2929  ;;  %2194 = vmatpush.msrb.mxu0 %v2181_v60  ;;  %v2214_v60 = vld [vmem:[%s4438_s0 + $0x40] sm:$0xff] }
 0x962   :  { %v4052_v39 = vadd.f32 %v2930_v38, %v3991_v37  ;;  %v2008_v37 = vld [vmem:[%s4433_s6 + $0x60] sm:$0xff]  ;;  %v2098_v38 = vld [vmem:[%s4435_s19 + $0xf0] sm:$0xff]  ;;  %2109 = vmatpush.msra.mxu1 %v2075_v34  ;;  %v2330_v34 = vld [vmem:[%s4440_s3 + $0x58] sm:$0xff] }
 0x963   :  { %2028 = vmatpush.msrb.mxu3 %v2008_v37  ;;  %2195 = vmatpush.msrb.mxu0 %v2180_v62  ;;  %v2096_v37 = vld [vmem:[%s4435_s19 + $0xe0] sm:$0xff]  ;;  %v2087_v62 = vld [vmem:[%s4435_s19 + $0x98] sm:$0xff] }
 0x964   :  { %2110 = vmatpush.msra.mxu1 %v2074_v43 }
 0x965   :  { %2029 = vmatpush.msrb.mxu3 %v2006_v50  ;;  %2196 = vmatpush.msrb.mxu0 %v2179_v0  ;;  %v2094_v50 = vld [vmem:[%s4435_s19 + $0xd0] sm:$0xff]  ;;  %v2071_v0 = vld [vmem:[%s4435_s19 + $0x18] sm:$0xff] }
 0x967   :  { %2030 = vmatpush.msrb.mxu3 %v2004_v54  ;;  %2197 = vmatpush.msrb.mxu0 %v2178_v2  ;;  %v2091_v54 = vld [vmem:[%s4435_s19 + $0xb8] sm:$0xff]  ;;  %v2086_v2 = vld [vmem:[%s4435_s19 + $0x90] sm:$0xff] }
 0x969   :  { %2031 = vmatpush.msrb.mxu3 %v2002_v59  ;;  %2198 = vmatpush.msrb.mxu0 %v2177_v3  ;;  %v2073_v59 = vld [vmem:[%s4435_s19 + $0x28] sm:$0xff] }
 0x96a   :  { %2111 = vmatpush.msra.mxu1 %v2073_v59  ;;  %v2215_v3 = vld [vmem:[%s4438_s0 + $0x48] sm:$0xff] }
 0x96b   :  { %2032 = vmatpush.msrb.mxu3 %v2000_v32  ;;  %2199 = vmatpush.msrb.mxu0 %v2176_v4  ;;  %v2212_v32 = vld [vmem:[%s4438_s0 + $0x30] sm:$0xff] }
 0x96c   :  { %2112 = vmatpush.msra.mxu1 %v2072_v19  ;;  %v2070_v4 = vld [vmem:[%s4435_s19 + $0x10] sm:$0xff] }
 0x96d   :  { %2033 = vmatpush.msrb.mxu3 %v1998_v63  ;;  %2200 = vmatpush.msrb.mxu0 %v2175_v5  ;;  %v2217_v63 = vld [vmem:[%s4438_s0 + $0x58] sm:$0xff]  ;;  %v2208_v5 = vld [vmem:[%s4438_s0 + $0x10] sm:$0xff] }
 0x96e   :  { %2113 = vmatpush.msra.mxu1 %v2071_v0 }
 0x96f   :  { %2034 = vmatpush.msrb.mxu3 %v1996_v1  ;;  %2201 = vmatpush.msrb.mxu0 %v2174_v6  ;;  %v2210_v1 = vld [vmem:[%s4438_s0 + $0x20] sm:$0xff]  ;;  %v2085_v6 = vld [vmem:[%s4435_s19 + $0x88] sm:$0xff] }
 0x970   :  { %2114 = vmatpush.msra.mxu1 %v2070_v4  ;;  %v2324_v4 = vld [vmem:[%s4440_s3 + $0x28] sm:$0xff] }
 0x972   :  { %2115 = vmatpush.msra.mxu1 %v2069_v8  ;;  %v2337_v8 = vld [vmem:[%s4440_s3 + $0x90] sm:$0xff] }
 0x974   :  { %2116 = vmatpush.msra.mxu1 %v2068_v12  ;;  %v2335_v12 = vld [vmem:[%s4440_s3 + $0x80] sm:$0xff] }
 0x9c6   :  { %v1766_v20 = vpop.xlane.xlu0 %1765 }
 0x9c7   :  { %v1767_v22 = vmul.f32 %v1766_v20, %v4033_v23  ;;  %v2269_v20 = vld [vmem:[%s4439_s4 + $0x30] sm:$0xff] }
 0x9c9   :  { %v1771_v18 = vadd.f32 %v2901_v16, %v1767_v22  ;;  %v2273_v16 = vld [vmem:[%s4439_s4 + $0x50] sm:$0xff] }
 0x9ca   :  { %v2265_v22 = vld [vmem:[%s4439_s4 + $0x10] sm:$0xff] }
 0x9cb   :  { %v1772_v31 = vadd.f32 %v1771_v18, %v4033_v23  ;;  %v2903_v18 = vld [vmem:[#allocation19] ss:$0 sm:$0xff] }
 0x9cd   :  { %v1811_v35 = vpop.f32.mrf.mxu1  ;;  %v1831_v36 = vpop.f32.mrf.mxu0  ;;  %2756 = vmatmul.msk.f32.vlgmr.msra.gmra.mxu3 %vm887_vm12, %v1772_v31  ;;  %v2331_v31 = vld [vmem:[%s4440_s3 + $0x60] sm:$0xff] }
 0x9ce   :  { %v1812_v41 = vadd.f32 %v1811_v35, %v1787_v28  ;;  %v1832_v42 = vadd.f32 %v1831_v36, %v1788_v29  ;;  %2121 = vmatpush.msra.mxu3 %v2099_v33  ;;  %v2013_v36 = vperm.slane %v2010_v30, 1 }
 0x9d0   :  { %v1834_v23 = vmax.f32 %v1812_v41, 0.0  ;;  %v1835_v40 = vmax.f32 %v1832_v42, 0.0  ;;  %2122 = vmatpush.msra.mxu3 %v2098_v38  ;;  %v2276_v41 = vld [vmem:[%s4439_s4 + $0x68] sm:$0xff]  ;;  %v2329_v42 = vld [vmem:[%s4440_s3 + $0x50] sm:$0xff] }
 0x9d2   :  { %1891 = vmatmul.f32.vlgmr.msrb.gmra.mxu1 %v1834_v23  ;;  %1911 = vmatmul.f32.vlgmr.msra.gmra.mxu2 %v1835_v40  ;;  %v2274_v23 = vld [vmem:[%s4439_s4 + $0x58] sm:$0xff]  ;;  %v2328_v40 = vld [vmem:[%s4440_s3 + $0x48] sm:$0xff] }
 0x9d3   :  { %2123 = vmatpush.msra.mxu3 %v2097_v44  ;;  %2232 = vmatpush.msra.mxu2 %v2218_v45 }
 0x9d4   :  { %2286 = vmatpush.msrb.mxu1 %v2275_v14  ;;  %v2395_v14 = vld [vmem:[%s4442_s24 + $0x60] sm:$0xff] }
 0x9d5   :  { %v4115_v48 = vpop.f32.mrf.mxu0  ;;  %2124 = vmatpush.msra.mxu3 %v2096_v37  ;;  %2233 = vmatpush.msra.mxu2 %v2216_v56  ;;  %v2272_v37 = vld [vmem:[%s4439_s4 + $0x48] sm:$0xff] }
 0x9d6   :  { %2759 = vmatmul.msk.f32.vlgmr.msrb.gmra.mxu3 %vm1986_vm0, %v4115_v48  ;;  %2760 = vmatmul.msk.f32.vlgmr.msra.gmra.mxu0 %vm1986_vm0, %v4115_v48  ;;  %v1985_v49 = vmul.f32 %v2902_v46, %v4115_v48 }
 0x9d7   :  { %2125 = vmatpush.msra.mxu3 %v2095_v47  ;;  %2234 = vmatpush.msra.mxu2 %v2214_v60 }
 0x9d8   :  { %v1987_v51 = vsel %vm1986_vm0, %v1985_v49, 0.0  ;;  %2287 = vmatpush.msrb.mxu1 %v2273_v16  ;;  %v2391_v16 = vld [vmem:[%s4442_s24 + $0x40] sm:$0xff] }
 0x9d9   :  { %1988 = vadd.xlane.f32.xlu1 %v1987_v51  ;;  %2126 = vmatpush.msra.mxu3 %v2094_v50  ;;  %v2012_v50 = vperm.slane %v2010_v30, 0  ;;  %v2327_v51 = vld [vmem:[%s4440_s3 + $0x40] sm:$0xff] }
 0x9da   :  { %2235 = vmatpush.msra.mxu2 %v2212_v32  ;;  %2288 = vmatpush.msrb.mxu1 %v2271_v17  ;;  %v2264_v32 = vld [vmem:[%s4439_s4 + $0x8] sm:$0xff]  ;;  %v2389_v17 = vld [vmem:[%s4442_s24 + $0x30] sm:$0xff] }
 0x9db   :  { %2127 = vmatpush.msra.mxu3 %v2093_v52  ;;  %v2270_v52 = vld [vmem:[%s4439_s4 + $0x38] sm:$0xff] }
 0x9dc   :  { %2236 = vmatpush.msra.mxu2 %v2210_v1  ;;  %2289 = vmatpush.msrb.mxu1 %v2269_v20  ;;  %v2387_v20 = vld [vmem:[%s4442_s24 + $0x20] sm:$0xff] }
 0x9dd   :  { %2128 = vmatpush.msra.mxu3 %v2092_v53 }
 0x9de   :  { %2763 = vmatmul.msk.f32.vlgmr.msrb.gmra.mxu0 %vm492_vm8, %v3638_v57  ;;  %v2219_v57 = vld [vmem:[%s4438_s0 + $0x68] sm:$0xff]  ;;  %2237 = vmatpush.msra.mxu2 %v2208_v5  ;;  %v2339_v5 = vld [vmem:[%s4440_s3 + $0xa0] sm:$0xff] }
 0x9df   :  { %2129 = vmatpush.msra.mxu3 %v2091_v54  ;;  %2252 = vmatpush.msra.mxu0 %v2219_v57  ;;  %v2266_v57 = vld [vmem:[%s4439_s4 + $0x18] sm:$0xff] }
 0x9e0   :  { %2238 = vmatpush.msra.mxu2 %v2206_v9  ;;  %2290 = vmatpush.msrb.mxu1 %v2267_v21  ;;  %v2321_v9 = vld [vmem:[%s4440_s3 + $0x10] sm:$0xff] }
 0x9e1   :  { %2130 = vmatpush.msra.mxu3 %v2090_v55  ;;  %2253 = vmatpush.msra.mxu0 %v2217_v63  ;;  %v2385_v21 = vld [vmem:[%s4442_s24 + $0x10] sm:$0xff] }
 0x9e2   :  { %2291 = vmatpush.msrb.mxu1 %v2265_v22  ;;  %v2383_v22 = vld [vmem:[%s4442_s24] sm:$0xff] }
 0x9e3   :  { %2131 = vmatpush.msra.mxu3 %v2089_v58  ;;  %2254 = vmatpush.msra.mxu0 %v2215_v3  ;;  %v2268_v58 = vld [vmem:[%s4439_s4 + $0x28] sm:$0xff]  ;;  %v2325_v3 = vld [vmem:[%s4440_s3 + $0x30] sm:$0xff] }
 0x9e4   :  { %2292 = vmatpush.msrb.mxu1 %v2263_v24  ;;  %v2401_v24 = vld [vmem:[%s4443_s20 + $0x20] sm:$0x1f] }
 0x9e5   :  { %2132 = vmatpush.msra.mxu3 %v2088_v61  ;;  %2255 = vmatpush.msra.mxu0 %v2213_v7  ;;  %v2338_v7 = vld [vmem:[%s4440_s3 + $0x98] sm:$0xff] }
 0x9e7   :  { %2133 = vmatpush.msra.mxu3 %v2087_v62  ;;  %2256 = vmatpush.msra.mxu0 %v2211_v11  ;;  %v2320_v11 = vld [vmem:[%s4440_s3 + $0x8] sm:$0xff] }
 0x9e9   :  { %2134 = vmatpush.msra.mxu3 %v2086_v2  ;;  %2257 = vmatpush.msra.mxu0 %v2209_v13  ;;  %v2326_v2 = vld [vmem:[%s4440_s3 + $0x38] sm:$0xff]  ;;  %v2319_v13 = vld [vmem:[%s4440_s3] sm:$0xff] }
 0x9eb   :  { %2135 = vmatpush.msra.mxu3 %v2085_v6  ;;  %2258 = vmatpush.msra.mxu0 %v2207_v15  ;;  %v2323_v6 = vld [vmem:[%s4440_s3 + $0x20] sm:$0xff]  ;;  %v2393_v15 = vld [vmem:[%s4442_s24 + $0x50] sm:$0xff] }
 0x9ed   :  { %2136 = vmatpush.msra.mxu3 %v2084_v10  ;;  %2374 = vmatpush.msrb.mxu0 %v2339_v5  ;;  %v2336_v10 = vld [vmem:[%s4440_s3 + $0x88] sm:$0xff]  ;;  %v2512_v5 = vld [vmem:[%s4444_s5 + $0x40] sm:$0xff] }
 0x9ef   :  { %2343 = vmatpush.msrb.mxu3 %v2334_v25  ;;  %2375 = vmatpush.msrb.mxu0 %v2338_v7  ;;  %v2399_v25 = vld [vmem:[%s4443_s20 + $0x10] sm:$0xff]  ;;  %v2511_v7 = vld [vmem:[%s4444_s5 + $0x38] sm:$0xff] }
 0x9f1   :  { %2344 = vmatpush.msrb.mxu3 %v2333_v26  ;;  %2376 = vmatpush.msrb.mxu0 %v2337_v8  ;;  %v2402_v26 = vld [vmem:[%s4443_s20 + $0x28] sm:$0x1f] }
 0x9f2   :  { %v2509_v8 = vld [vmem:[%s4444_s5 + $0x28] sm:$0xff] }
 0x9f3   :  { %2345 = vmatpush.msrb.mxu3 %v2332_v27  ;;  %2377 = vmatpush.msrb.mxu0 %v2336_v10 }
 0x9f5   :  { %2346 = vmatpush.msrb.mxu3 %v2331_v31  ;;  %2378 = vmatpush.msrb.mxu0 %v2335_v12  ;;  %v2905_v31 = vld [vmem:[#allocation9] ss:$0 sm:$0xff] }
 0x9f7   :  { %2347 = vmatpush.msrb.mxu3 %v2330_v34 }
 0x9f9   :  { %2348 = vmatpush.msrb.mxu3 %v2329_v42 }
 0x9fb   :  { %2349 = vmatpush.msrb.mxu3 %v2328_v40 }
 0x9fd   :  { %2350 = vmatpush.msrb.mxu3 %v2327_v51  ;;  %v2392_v51 = vld [vmem:[%s4442_s24 + $0x48] sm:$0xff] }
 0x9ff   :  { %2351 = vmatpush.msrb.mxu3 %v2326_v2  ;;  %v2530_v2 = vld [vmem:[%s4444_s5 + $0xd0] sm:$0xff] }
 0xa01   :  { %2352 = vmatpush.msrb.mxu3 %v2325_v3  ;;  %v2513_v3 = vld [vmem:[%s4444_s5 + $0x48] sm:$0xff] }
 0xa03   :  { %2353 = vmatpush.msrb.mxu3 %v2324_v4  ;;  %v2529_v4 = vld [vmem:[%s4444_s5 + $0xc8] sm:$0xff] }
 0xa05   :  { %2354 = vmatpush.msrb.mxu3 %v2323_v6  ;;  %v2528_v6 = vld [vmem:[%s4444_s5 + $0xc0] sm:$0xff] }
 0xa4c   :  { %v1989_v28 = vpop.xlane.xlu1 %1988 }
 0xa4d   :  { %v1990_v29 = vmul.f32 %v1989_v28, %v4115_v48 }
 0xa4f   :  { %v1994_v33 = vadd.f32 %v2903_v18, %v1990_v29  ;;  %v1892_v45 = vpop.f32.mrf.mxu1  ;;  %v2397_v18 = vld [vmem:[%s4443_s20] sm:$0xff] }
 0xa50   :  { %v1935_v35 = vpop.f32.mrf.mxu3 }
 0xa51   :  { %v1995_v38 = vadd.f32 %v1994_v33, %v4115_v48  ;;  %v2904_v48 = vld [vmem:[#allocation8] ss:$0 sm:$0xff] }
 0xa53   :  { %v2056_v43 = vpop.f32.mrf.mxu0  ;;  %2761 = vmatmul.msk.f32.vlgmr.msrb.gmra.mxu2 %vm1986_vm0, %v1995_v38 }
 0xa54   :  { %v2057_v44 = vadd.f32 %v2056_v43, %v2013_v36  ;;  %2306 = vmatpush.msrb.mxu2 %v2276_v41 }
 0xa55   :  { %v1912_v46 = vpop.f32.mrf.mxu2 }
 0xa56   :  { %v2060_v47 = vmax.f32 %v2057_v44, 0.0  ;;  %v1913_v49 = vadd.f32 %v1912_v46, %v1892_v45  ;;  %2307 = vmatpush.msrb.mxu2 %v2274_v23 }
 0xa58   :  { %v1936_v53 = vadd.f32 %v1935_v35, %v1913_v49  ;;  %2137 = vmatmul.f32.vlgmr.msra.gmra.mxu3 %v2060_v47  ;;  %2308 = vmatpush.msrb.mxu2 %v2272_v37  ;;  %v2396_v47 = vld [vmem:[%s4442_s24 + $0x68] sm:$0xff]  ;;  %v2400_v49 = vld [vmem:[%s4443_s20 + $0x18] sm:$0xff] }
 0xa59   :  { %v2036_v54 = vpop.f32.mrf.mxu3 }
 0xa5a   :  { %v1941_v55 = vadd.f32 %v2904_v48, %v1936_v53  ;;  %v2037_v56 = vadd.f32 %v2036_v54, %v2012_v50  ;;  %2309 = vmatpush.msrb.mxu2 %v2270_v52  ;;  %v2394_v48 = vld [vmem:[%s4442_s24 + $0x58] sm:$0xff]  ;;  %v2398_v50 = vld [vmem:[%s4443_s20 + $0x8] sm:$0xff] }
 0xa5b   :  { %v4179_v59 = vpop.f32.mrf.mxu0  ;;  %v2390_v52 = vld [vmem:[%s4442_s24 + $0x38] sm:$0xff]  ;;  %v2388_v53 = vld [vmem:[%s4442_s24 + $0x28] sm:$0xff] }
 0xa5c   :  { %v1942_v60 = vsub.f32 0.0, %v1941_v55  ;;  %v2059_v61 = vmax.f32 %v2037_v56, 0.0  ;;  %2764 = vmatmul.msk.f32.vlgmr.msra.gmra.mxu2 %vm1986_vm0, %v4179_v59  ;;  %2765 = vmatmul.msk.f32.vlgmr.msra.gmra.mxu0 %vm1986_vm0, %v4179_v59  ;;  %v2386_v54 = vld [vmem:[%s4442_s24 + $0x18] sm:$0xff]  ;;  %v2384_v55 = vld [vmem:[%s4442_s24 + $0x8] sm:$0xff] }
 0xa5d   :  { %2310 = vmatpush.msrb.mxu2 %v2268_v58  ;;  %2463 = vmatpush.msra.mxu0 %v2395_v14  ;;  %v2519_v56 = vld [vmem:[%s4444_s5 + $0x78] sm:$0xff]  ;;  %v2518_v58 = vld [vmem:[%s4444_s5 + $0x70] sm:$0xff] }
 0xa5e   :  { %v1943_v19 = vmul.f32 1.442695, %v1942_v60  ;;  %2117 = vmatmul.f32.vlgmr.msra.gmra.mxu1 %v2059_v61  ;;  %v2535_v60 = vld [vmem:[%s4444_s5 + $0xf8] sm:$0xff]  ;;  %v2517_v61 = vld [vmem:[%s4444_s5 + $0x68] sm:$0xff] }
 0xa5f   :  { %2311 = vmatpush.msrb.mxu2 %v2266_v57  ;;  %2464 = vmatpush.msra.mxu0 %v2393_v15  ;;  %v2534_v57 = vld [vmem:[%s4444_s5 + $0xf0] sm:$0xff]  ;;  %v2527_v14 = vld [vmem:[%s4444_s5 + $0xb8] sm:$0xff] }
 0xa60   :  { %2931 = vpow2.f32 %v1943_v19  ;;  %2769 = vmatpush.msk.msra.mxu1 %vm2407_vm1, %v2401_v24  ;;  %v2533_v19 = vld [vmem:[%s4444_s5 + $0xe8] sm:$0xff]  ;;  %v2506_v15 = vld [vmem:[%s4444_s5 + $0x10] sm:$0xff] }
 0xa61   :  { %2312 = vmatpush.msrb.mxu2 %v2264_v32  ;;  %2465 = vmatpush.msra.mxu0 %v2391_v16  ;;  %v2516_v32 = vld [vmem:[%s4444_s5 + $0x60] sm:$0xff]  ;;  %v2526_v16 = vld [vmem:[%s4444_s5 + $0xb0] sm:$0xff] }
 0xa62   :  { %2428 = vmatpush.msra.mxu1 %v2399_v25  ;;  %v2522_v24 = vld [vmem:[%s4444_s5 + $0x90] sm:$0xff]  ;;  %v2521_v25 = vld [vmem:[%s4444_s5 + $0x88] sm:$0xff] }
 0xa63   :  { %2466 = vmatpush.msra.mxu0 %v2389_v17  ;;  %2771 = vmatpush.msk.msra.mxu2 %vm2407_vm1, %v2402_v26  ;;  %v2505_v17 = vld [vmem:[%s4444_s5 + $0x8] sm:$0xff]  ;;  %v2520_v26 = vld [vmem:[%s4444_s5 + $0x80] sm:$0xff] }
 0xa64   :  { %2767 = vmatmul.msk.f32.vlgmr.msrb.gmra.mxu2 %vm1986_vm0, %v4179_v59  ;;  %2429 = vmatpush.msra.mxu1 %v2397_v18  ;;  %v2494_v18 = vld [vmem:[%s4445_s9] sm:$0x3] }
 0xa65   :  { %2467 = vmatpush.msra.mxu0 %v2387_v20  ;;  %2448 = vmatpush.msra.mxu2 %v2400_v49  ;;  %v2525_v20 = vld [vmem:[%s4444_s5 + $0xa8] sm:$0xff] }
 0xa66   :  { %v2932_v62 = vpop.eup %2931  ;;  %2766 = vmatmul.msk.f32.vlgmr.msrb.gmra.mxu1 %vm1986_vm0, %v4179_v59 }
 0xa67   :  { %v1945_v63 = vadd.f32 1.0, %v2932_v62  ;;  %2468 = vmatpush.msra.mxu0 %v2385_v21  ;;  %2483 = vmatpush.msrb.mxu1 %v2396_v47  ;;  %v2532_v62 = vld [vmem:[%s4444_s5 + $0xe0] sm:$0xff] }
 0xa68   :  { %2449 = vmatpush.msra.mxu2 %v2398_v50  ;;  %v2504_v21 = vld [vmem:[%s4444_s5] sm:$0xff] }
 0xa69   :  { %2933 = vrcp.f32 %v1945_v63  ;;  %2469 = vmatpush.msra.mxu0 %v2383_v22  ;;  %2484 = vmatpush.msrb.mxu1 %v2394_v48  ;;  %v2515_v63 = vld [vmem:[%s4444_s5 + $0x58] sm:$0xff]  ;;  %v2524_v22 = vld [vmem:[%s4444_s5 + $0xa0] sm:$0xff] }
 0xa6a   :  { %2540 = vmatpush.msrb.mxu2 %v2519_v56 }
 0xa6b   :  { %2485 = vmatpush.msrb.mxu1 %v2392_v51 }
 0xa6c   :  { %2541 = vmatpush.msrb.mxu2 %v2518_v58 }
 0xa6d   :  { %2486 = vmatpush.msrb.mxu1 %v2390_v52 }
 0xa6e   :  { %2542 = vmatpush.msrb.mxu2 %v2517_v61 }
 0xa6f   :  { %v2934_v0 = vpop.eup %2933  ;;  %2487 = vmatpush.msrb.mxu1 %v2388_v53 }
 0xa70   :  { %v4192_v1 = vadd.f32 %v2934_v0, %v4052_v39  ;;  %v2322_v39 = vld [vmem:[%s4440_s3 + $0x18] sm:$0xff]  ;;  %2543 = vmatpush.msrb.mxu2 %v2516_v32 }
 0xa71   :  { %2355 = vmatpush.msrb.mxu3 %v2322_v39  ;;  %2488 = vmatpush.msrb.mxu1 %v2386_v54  ;;  %v2531_v0 = vld [vmem:[%s4444_s5 + $0xd8] sm:$0xff]  ;;  %v2510_v39 = vld [vmem:[%s4444_s5 + $0x30] sm:$0xff] }
 0xa72   :  { %2544 = vmatpush.msrb.mxu2 %v2515_v63 }
 0xa73   :  { %2356 = vmatpush.msrb.mxu3 %v2321_v9  ;;  %2489 = vmatpush.msrb.mxu1 %v2384_v55  ;;  %v2508_v9 = vld [vmem:[%s4444_s5 + $0x20] sm:$0xff] }
 0xa75   :  { %2357 = vmatpush.msrb.mxu3 %v2320_v11 }
 0xa77   :  { %2358 = vmatpush.msrb.mxu3 %v2319_v13  ;;  %v2507_v13 = vld [vmem:[%s4444_s5 + $0x18] sm:$0xff] }
 0xad6   :  { %v2161_v27 = vpop.f32.mrf.mxu2 }
 0xad9   :  { %v2260_v43 = vpop.f32.mrf.mxu0 }
 0xadb   :  { %v2118_v28 = vpop.f32.mrf.mxu1  ;;  %v2138_v29 = vpop.f32.mrf.mxu3 }
 0xadc   :  { %v2139_v30 = vadd.f32 %v2138_v29, %v2118_v28 }
 0xade   :  { %v2162_v33 = vadd.f32 %v2161_v27, %v2139_v30  ;;  %v2496_v27 = vperm.slane %v2494_v18, 0 }
 0xadf   :  { %v2240_v34 = vpop.f32.mrf.mxu2 }
 0xae0   :  { %v2167_v35 = vadd.f32 %v2905_v31, %v2162_v33 }
 0xae2   :  { %v2168_v36 = vsub.f32 0.0, %v2167_v35 }
 0xae3   :  { %v2294_v38 = vpop.f32.mrf.mxu1 }
 0xae4   :  { %v2169_v41 = vmul.f32 1.442695, %v2168_v36  ;;  %v2317_v42 = vmul.f32 %v2294_v38, %v2240_v34  ;;  %v2497_v34 = vperm.slane %v2494_v18, 1 }
 0xae6   :  { %2935 = vpow2.f32 %v2169_v41  ;;  %2359 = vmatmul.f32.vlgmr.msrb.gmra.mxu3 %v2317_v42 }
 0xae7   :  { %v2314_v23 = vpop.f32.mrf.mxu2 }
 0xae8   :  { %v2318_v40 = vmul.f32 %v2314_v23, %v2260_v43  ;;  %v2906_v43 = vld [vmem:[#allocation10] ss:$0 sm:$0xff]  ;;  %v3197_v23 = vmov 9.0  }
 0xaea   :  { %2768 = vmatmul.msk.f32.vlgmr.msrb.gmra.mxu0 %vm705_vm11, %v2318_v40 }
 0xaeb   :  { %2560 = vmatpush.msrb.mxu0 %v2535_v60 }
 0xaec   :  { %v2936_v44 = vpop.eup %2935 }
 0xaed   :  { %v2171_v45 = vadd.f32 1.0, %v2936_v44  ;;  %2561 = vmatpush.msrb.mxu0 %v2534_v57 }
 0xaef   :  { %2937 = vrcp.f32 %v2171_v45  ;;  %2562 = vmatpush.msrb.mxu0 %v2533_v19 }
 0xaf0   :  { %2939 = vrcp.f32 %v3197_v23 }
 0xaf1   :  { %2563 = vmatpush.msrb.mxu0 %v2532_v62 }
 0xaf2   :  { %2773 = vmatmul.msk.f32.vlgmr.msra.gmra.mxu0 %vm1986_vm0, %v4179_v59 }
 0xaf3   :  { %2564 = vmatpush.msrb.mxu0 %v2531_v0 }
 0xaf5   :  { %v2938_v46 = vpop.eup %2937  ;;  %2565 = vmatpush.msrb.mxu0 %v2530_v2 }
 0xaf6   :  { %v4222_v37 = vadd.f32 %v2938_v46, %v4192_v1  ;;  %v2514_v1 = vld [vmem:[%s4444_s5 + $0x50] sm:$0xff]  ;;  %v2940_v47 = vpop.eup %2939 }
 0xaf7   :  { %2545 = vmatpush.msrb.mxu2 %v2514_v1  ;;  %2566 = vmatpush.msrb.mxu0 %v2529_v4  ;;  %v2587_v50 = vmul.f32 9.0, %v2940_v47  ;;  %vm2591_vm3 = vweird.f32 %v2940_v47 }
 0xaf9   :  { %2546 = vmatpush.msrb.mxu2 %v2513_v3  ;;  %2567 = vmatpush.msrb.mxu0 %v2528_v6  ;;  %v2588_v51 = vsub.f32 1.0, %v2587_v50 }
 0xafb   :  { %2547 = vmatpush.msrb.mxu2 %v2512_v5  ;;  %2568 = vmatpush.msrb.mxu0 %v2527_v14  ;;  %v2589_v54 = vmul.f32 %v2940_v47, %v2588_v51 }
 0xafd   :  { %2548 = vmatpush.msrb.mxu2 %v2511_v7  ;;  %2569 = vmatpush.msrb.mxu0 %v2526_v16  ;;  %v2590_v55 = vadd.f32 %v2940_v47, %v2589_v54 }
 0xaff   :  { %2549 = vmatpush.msrb.mxu2 %v2510_v39  ;;  %2570 = vmatpush.msrb.mxu0 %v2525_v20  ;;  %v2592_v58 = vsel %vm2591_vm3, %v2940_v47, %v2590_v55 }
 0xb01   :  { %2550 = vmatpush.msrb.mxu2 %v2509_v8  ;;  %2571 = vmatpush.msrb.mxu0 %v2524_v22 }
 0xb03   :  { %2551 = vmatpush.msrb.mxu2 %v2508_v9 }
 0xb05   :  { %2552 = vmatpush.msrb.mxu2 %v2507_v13 }
 0xb07   :  { %2553 = vmatpush.msrb.mxu2 %v2506_v15 }
 0xb09   :  { %2554 = vmatpush.msrb.mxu2 %v2505_v17 }
 0xb0b   :  { %2555 = vmatpush.msrb.mxu2 %v2504_v21 }
 0xb67   :  { %v2380_v10 = vpop.f32.mrf.mxu0 }
 0xb69   :  { %v2360_v11 = vpop.f32.mrf.mxu3 }
 0xb6a   :  { %v2381_v12 = vadd.f32 %v2380_v10, %v2360_v11 }
 0xb6c   :  { %2770 = vmatmul.msk.f32.vlgmr.msra.gmra.mxu1 %vm2403_vm2, %v2381_v12  ;;  %2772 = vmatmul.msk.f32.vlgmr.msra.gmra.mxu2 %vm2403_vm2, %v2381_v12 }
 0xb6f   :  { %v2471_v28 = vpop.f32.mrf.mxu0 }
 0xb74   :  { %2774 = vmatmul.msk.f32.vlgmr.msrb.gmra.mxu1 %vm1986_vm0, %v4179_v59  ;;  %v2523_v59 = vld [vmem:[%s4444_s5 + $0x98] sm:$0xff] }
 0xb75   :  { %2572 = vmatpush.msrb.mxu0 %v2523_v59 }
 0xb77   :  { %2573 = vmatpush.msrb.mxu0 %v2522_v24 }
 0xb79   :  { %2574 = vmatpush.msrb.mxu0 %v2521_v25 }
 0xb7b   :  { %2575 = vmatpush.msrb.mxu0 %v2520_v26 }
 0xbe9   :  { %v2431_v29 = vpop.f32.mrf.mxu1 }
 0xbea   :  { %v2472_v30 = vadd.f32 %v2471_v28, %v2431_v29 }
 0xbec   :  { %v2500_v31 = vadd.f32 %v2496_v27, %v2472_v30 }
 0xbee   :  { %v2502_v33 = vmax.f32 %v2500_v31, 0.0 }
 0xbef   :  { %v2451_v35 = vpop.f32.mrf.mxu2 }
 0xbf0   :  { %2556 = vmatmul.f32.vlgmr.msrb.gmra.mxu2 %v2502_v33 }
 0xbf1   :  { %v2491_v36 = vpop.f32.mrf.mxu1 }
 0xbf2   :  { %v2492_v38 = vadd.f32 %v2491_v36, %v2451_v35 }
 0xbf4   :  { %v2501_v41 = vadd.f32 %v2497_v34, %v2492_v38 }
 0xbf6   :  { %v2503_v42 = vmax.f32 %v2501_v41, 0.0 }
 0xbf8   :  { %2576 = vmatmul.f32.vlgmr.msrb.gmra.mxu0 %v2503_v42 }
 0xc73   :  { %v2557_v40 = vpop.f32.mrf.mxu2 }
 0xc74   :  { %v2558_v44 = vadd.f32 %v2906_v43, %v2557_v40 }
 0xc75   :  { %v2577_v45 = vpop.f32.mrf.mxu0 }
 0xc76   :  { %v2578_v46 = vadd.f32 %v2577_v45, %v2558_v44 }
 0xc78   :  { %v2580_v49 = vsub.f32 0.0, %v2578_v46 }
 0xc7a   :  { %v2581_v48 = vmul.f32 1.442695, %v2580_v49 }
 0xc7c   :  { %2941 = vpow2.f32 %v2581_v48 }
 0xc82   :  { %v2942_v52 = vpop.eup %2941 }
 0xc83   :  { %v2583_v53 = vadd.f32 1.0, %v2942_v52 }
 0xc85   :  { %2943 = vrcp.f32 %v2583_v53 }
 0xc8b   :  { %v2944_v56 = vpop.eup %2943 }
 0xc8c   :  { %v2585_v60 = vadd.f32 %v2944_v56, %v4222_v37 }
 0xc8e   :  { %v2593_v61 = vmul.f32 %v2592_v58, %v2585_v60 }
 0xc90   :  { %v2594_v57 = vsub.f32 0.0, %v2593_v61 }
 0xc92   :  { %v2595_v19 = vmul.f32 1.442695, %v2594_v57 }
 0xc94   :  { %2945 = vpow2.f32 %v2595_v19 }
 0xc9a   :  { %v2946_v32 = vpop.eup %2945 }
 0xc9b   :  { %v2597_v62 = vadd.f32 1.0, %v2946_v32 }
 0xc9d   :  { %2947 = vrcp.f32 %v2597_v62 }
 0xca3   :  { %v2948_v63 = vpop.eup %2947 }
 0xca4   :  { %2601 = vperm.xlu2 %2880, %v2948_v63  }
 0xcfe   :  { %v2602_v0 = vpop.permute.xlu2 %2601 }
 0xcff   :  { %2604 = vst [vmem:[#allocation20] sm:$0xff] %v2602_v0 }
 0xd00   :  { %3092 = shalt.err (!%p3089_p1)
}
 0xd01   :  { %2615 = dma.vmem_to_hbm [thread:$0]  %s2611_s29, 128, %s2613_s30, [#allocation13]  }
 0xd02   :  { %3099 = dma.done.wait [#allocation13], 128  }
 0xd03   :  { %3100 = vsyncadd [#allocation13], 4294967168 }
 0xd04   :  { %2620 = vsyncpa [#allocation12], 1 }
 0xd05   :  { %2621 = vsyncpa [#allocation15], 1 }
 0xd06   :  { %2622 = vsyncpa [#allocation18], 1 }
 0xd07   :  { %2623 = vsyncpa [#allocation13], 1 }

</bundles_post_ra>
